<compile_context>
chip_gen: v7x
topology: tpu7x:2x2x1
jax: 0.10.0
libtpu: 0.0.40
codegen_flags: <defaults>
</compile_context>

<pallas_src>
import functools

import jax
import jax.numpy as jnp
from jax.experimental import pallas as pl
from jax.experimental.pallas import tpu as pltpu

DROPOUT_P = 1.0
SCALE_FACTOR = 1.0
_MXU_DTYPE = jnp.bfloat16  # MXU-native operand dtype; accumulation stays f32


def _softmax_exp_dtype():
    """bf16 exp on bf16-capable EUPs (v6e / v7x); f32 everywhere else."""
    try:
        kind = jax.devices()[0].device_kind.lower()
    except Exception:
        return jnp.float32
    if ("v6" in kind) or ("v7" in kind) or ("tpu7" in kind):
        return jnp.bfloat16
    return jnp.float32  # v5e (no bf16 VPU/EUP) and unknown chips: stay f32


def _attn_kernel(q_ref, kt_ref, v_ref, o_ref, *, scale, exp_dtype):
    # q_ref: (Bblk, S, D), kt_ref: (Bblk, D, S), v_ref/o_ref: (Bblk, S, D).
    q = q_ref[...]
    if scale != 1.0:
        # Fold scale into Q: S*D elements instead of S*S (skipped when 1.0).
        q = q * jnp.asarray(scale, q.dtype)
    q = q.astype(_MXU_DTYPE)
    kt = kt_ref[...].astype(_MXU_DTYPE)
    v = v_ref[...].astype(_MXU_DTYPE)

    # (Bblk, S, S) scores. K was pre-transposed on the host, so the contraction
    # is (q: S x D) @ (kt: D x S) -- canonical MXU form, no in-kernel transpose.
    s = jnp.einsum("bqd,bdk->bqk", q, kt, preferred_element_type=jnp.float32)

    # Numerically stable softmax numerator; normalization deferred past PV.
    m = jnp.max(s, axis=-1, keepdims=True)
    e = jnp.exp((s - m).astype(exp_dtype))          # bf16 EUP on v6e/v7x
    denom = jnp.sum(e.astype(jnp.float32), axis=-1, keepdims=True)

    # Unnormalized attention @ V on the MXU, then normalize the (Bblk, S, D)
    # output (cheaper than dividing the (Bblk, S, S) matrix; reciprocal is an
    # EUP-slot op).
    pv = jnp.einsum("bqk,bkd->bqd", e.astype(_MXU_DTYPE), v,
                    preferred_element_type=jnp.float32)
    inv = pl.reciprocal(denom, approx=True)
    o_ref[...] = (pv * inv).astype(o_ref.dtype)


def _pick_batch_block(batch, max_block=16):
    """Batch-block size.

    Guarantees >= 2 grid steps when batch >= 2 (so the "parallel" grid axis can
    be sharded across v7x's two TensorCores) and prefers an exact divisor of
    `batch`; if the best divisor is wastefully small (prime-ish B), returns the
    cap and the caller pads the batch instead of degrading to bblk=1.
    """
    if batch <= 1:
        return 1
    cap = max(1, min(batch // 2, max_block))
    best_div = 1
    for cand in range(cap, 0, -1):
        if batch % cand == 0:
            best_div = cand
            break
    if best_div * 2 >= cap:
        return best_div
    return cap  # caller pads batch up to a multiple of this


def sdp_attention(query, key, value, *, dropout_p=DROPOUT_P,
                  scale_factor=SCALE_FACTOR):
    """query/key/value: (B, S, D) float32. Returns (B, S, D) of query.dtype."""
    B, S, D = query.shape
    assert key.shape == (B, S, D) and value.shape == (B, S, D)

    if dropout_p >= 1.0:
        # PyTorch F.dropout(p=1, training=True) deterministically zeroes the
        # softmax output, so attention @ V is all zeros.  Short-circuit on the
        # host: no pallas_call, no Q/K/V DMAs at all.
        return jnp.zeros((B, S, D), query.dtype)
    if dropout_p > 0.0:
        # TODO(synk): stochastic dropout (pltpu.prng_seed / prng_random_bits
        # mask + 1/(1-p) rescale) not implemented; the module only uses p=1.
        raise NotImplementedError("only dropout_p == 0 or dropout_p >= 1 supported")

    bblk = _pick_batch_block(B)
    b_pad = pl.cdiv(B, bblk) * bblk
    if b_pad != B:
        # Pad the batch with zeros (zero queries give a uniform softmax and a
        # zero output against zero V; padded rows are sliced off below).
        pad = ((0, b_pad - B), (0, 0), (0, 0))
        query = jnp.pad(query, pad)
        key = jnp.pad(key, pad)
        value = jnp.pad(value, pad)

    # One-time host-side transpose of K to (B, D, S): guarantees the in-kernel
    # QK^T contraction needs no XLU transpose per batch element per step.
    kt = jnp.swapaxes(key, -1, -2)

    grid = (b_pad // bblk,)
    qv_blk = (bblk, S, D)   # last two dims == full array dims -> valid tiling
    kt_blk = (bblk, D, S)

    kernel = functools.partial(
        _attn_kernel,
        scale=float(scale_factor),
        exp_dtype=_softmax_exp_dtype(),
    )

    out = pl.pallas_call(
        kernel,
        out_shape=jax.ShapeDtypeStruct((b_pad, S, D), query.dtype),
        grid_spec=pltpu.PrefetchScalarGridSpec(
            num_scalar_prefetch=0,
            grid=grid,
            in_specs=[
                pl.BlockSpec(qv_blk, lambda b: (b, 0, 0)),
                pl.BlockSpec(kt_blk, lambda b: (b, 0, 0)),
                pl.BlockSpec(qv_blk, lambda b: (b, 0, 0)),
            ],
            out_specs=pl.BlockSpec(qv_blk, lambda b: (b, 0, 0)),
        ),
        compiler_params=pltpu.CompilerParams(
            dimension_semantics=("parallel",),
        ),
    )(query, kt, value)

    return out[:B] if b_pad != B else out


def _reference_bf16(query, key, value, *, scale_factor):
    """Reference mirroring the kernel's bf16 MXU-operand precision."""
    q = query.astype(_MXU_DTYPE).astype(jnp.float32)
    k = key.astype(_MXU_DTYPE).astype(jnp.float32)
    v = value.astype(_MXU_DTYPE).astype(jnp.float32)
    qk = jnp.einsum("bqd,bkd->bqk", q, k) * scale_factor
    p = jax.nn.softmax(qk, axis=-1)
    return jnp.einsum("bqk,bkd->bqd", p, v).astype(query.dtype)


def _reference_f32(query, key, value, *, scale_factor):
    """Full-f32 reference (PyTorch-parity sanity check, loose tolerance)."""
    qk = jnp.einsum("bqd,bkd->bqk", query, key,
                    precision=jax.lax.Precision.HIGHEST) * scale_factor
    p = jax.nn.softmax(qk, axis=-1)
    return jnp.einsum("bqk,bkd->bqd", p, value,
                      precision=jax.lax.Precision.HIGHEST).astype(query.dtype)


if __name__ == "__main__":
    # Shapes matching the module's example tensors (query/key/value: 30x45x128).
    B, S, D = 30, 45, 128
    k0 = jax.random.PRNGKey(0)
    kq, kk, kv = jax.random.split(k0, 3)
    query = jax.random.normal(kq, (B, S, D), dtype=jnp.float32)
    key = jax.random.normal(kk, (B, S, D), dtype=jnp.float32)
    value = jax.random.normal(kv, (B, S, D), dtype=jnp.float32)

    # 1) Module configuration: dropout_p = 1 -> all-zero output, no kernel.
    out = jax.block_until_ready(sdp_attention(query, key, value))
    assert out.shape == (B, S, D)
    assert bool(jnp.all(out == 0.0)), "dropout_p=1 path must be exactly zero"

    # 2) Exercise the full attention kernel (dropout disabled).
    out_nd = jax.block_until_ready(
        sdp_attention(query, key, value, dropout_p=0.0))
    ref_bf16 = _reference_bf16(query, key, value, scale_factor=SCALE_FACTOR)
    assert jnp.allclose(out_nd, ref_bf16, atol=2e-2, rtol=2e-2), \
        "mismatch vs bf16-mirroring reference on the no-dropout path"
    # Loose parity sanity check against true-f32 SDPA math (bf16 MXU operands
    # introduce ~1e-2-scale deviation in scores before exp).
    ref_f32 = _reference_f32(query, key, value, scale_factor=SCALE_FACTOR)
    max_err = float(jnp.max(jnp.abs(out_nd - ref_f32)))
    assert max_err < 2e-1, f"too far from f32 reference (max abs err={max_err})"

    # 3) Non-composite batch (exercises the pad-and-slice fallback path).
    out_odd = jax.block_until_ready(
        sdp_attention(query[:29], key[:29], value[:29], dropout_p=0.0))
    assert jnp.allclose(out_odd, ref_bf16[:29], atol=2e-2, rtol=2e-2), \
        "mismatch on padded (non-composite batch) path"

    print("KERNEL_OK")
</pallas_src>

<mosaic_0001>
module attributes {stable_mosaic.version = 11 : i64} {
  func.func @_attn_kernel(%arg0: i32, %arg1: memref<15x45x128xf32, #tpu.memory_space<vmem>>, %arg2: memref<15x128x45xf32, #tpu.memory_space<vmem>>, %arg3: memref<15x45x128xf32, #tpu.memory_space<vmem>>, %arg4: memref<15x45x128xf32, #tpu.memory_space<vmem>>) attributes {dimension_semantics = [#tpu.dimension_semantics<parallel>], iteration_bounds = array<i64: 2>, scalar_prefetch = 0 : i64, scratch_operands = 0 : i64, tpu.core_type = #tpu.core_type<tc>, window_params = [{transform_indices = @transform_0, window_bounds = array<i64: 15, 45, 128>}, {transform_indices = @transform_1, window_bounds = array<i64: 15, 128, 45>}, {transform_indices = @transform_2, window_bounds = array<i64: 15, 45, 128>}, {transform_indices = @transform_3, window_bounds = array<i64: 15, 45, 128>}]} {
    %c0 = arith.constant 0 : index
    %c0_0 = arith.constant 0 : index
    %c0_1 = arith.constant 0 : index
    %0 = vector.load %arg1[%c0, %c0_0, %c0_1] : memref<15x45x128xf32, #tpu.memory_space<vmem>>, vector<15x45x128xf32>
    %1 = arith.truncf %0 : vector<15x45x128xf32> to vector<15x45x128xbf16>
    %c0_2 = arith.constant 0 : index
    %c0_3 = arith.constant 0 : index
    %c0_4 = arith.constant 0 : index
    %2 = vector.load %arg2[%c0_2, %c0_3, %c0_4] : memref<15x128x45xf32, #tpu.memory_space<vmem>>, vector<15x128x45xf32>
    %3 = arith.truncf %2 : vector<15x128x45xf32> to vector<15x128x45xbf16>
    %c0_5 = arith.constant 0 : index
    %c0_6 = arith.constant 0 : index
    %c0_7 = arith.constant 0 : index
    %4 = vector.load %arg3[%c0_5, %c0_6, %c0_7] : memref<15x45x128xf32, #tpu.memory_space<vmem>>, vector<15x45x128xf32>
    %5 = arith.truncf %4 : vector<15x45x128xf32> to vector<15x45x128xbf16>
    "tpu.trace_start"() <{level = 10 : i32, message = "bqd,bdk->bqk"}> : () -> ()
    %cst = arith.constant dense<0.000000e+00> : vector<15x45x45xf32>
    %6 = tpu.matmul %1, %3, %cst {dimension_numbers = #tpu.dot_dimension_numbers<[2], [1], [1], [2], [0, 0, 0, 1, 1, 2], [0], [0]>} : vector<15x45x128xbf16>, vector<15x128x45xbf16>, vector<15x45x45xf32> -> vector<15x45x45xf32>
    "tpu.trace_stop"() : () -> ()
    %cst_8 = arith.constant dense<0xFF800000> : vector<15x45xf32>
    %7 = vector.multi_reduction <maximumf>, %6, %cst_8 [2] : vector<15x45x45xf32> to vector<15x45xf32>
    %8 = vector.shape_cast %7 : vector<15x45xf32> to vector<15x45x1xf32>
    %9 = vector.broadcast %8 : vector<15x45x1xf32> to vector<15x45x45xf32>
    %10 = arith.subf %6, %9 : vector<15x45x45xf32>
    %11 = math.exp %10 : vector<15x45x45xf32>
    %cst_9 = arith.constant dense<0.000000e+00> : vector<15x45xf32>
    %12 = vector.multi_reduction <add>, %11, %cst_9 [2] : vector<15x45x45xf32> to vector<15x45xf32>
    %13 = vector.shape_cast %12 : vector<15x45xf32> to vector<15x45x1xf32>
    %14 = arith.truncf %11 : vector<15x45x45xf32> to vector<15x45x45xbf16>
    "tpu.trace_start"() <{level = 10 : i32, message = "bqk,bkd->bqd"}> : () -> ()
    %cst_10 = arith.constant dense<0.000000e+00> : vector<15x45x128xf32>
    %15 = tpu.matmul %14, %5, %cst_10 {dimension_numbers = #tpu.dot_dimension_numbers<[2], [1], [1], [2], [0, 0, 0, 1, 1, 2], [0], [0]>} : vector<15x45x45xbf16>, vector<15x45x128xbf16>, vector<15x45x128xf32> -> vector<15x45x128xf32>
    "tpu.trace_stop"() : () -> ()
    %16 = tpu.reciprocal %13 {approx = true} : vector<15x45x1xf32> -> vector<15x45x1xf32>
    %17 = vector.broadcast %16 : vector<15x45x1xf32> to vector<15x45x128xf32>
    %18 = arith.mulf %15, %17 : vector<15x45x128xf32>
    %c0_11 = arith.constant 0 : index
    %c0_12 = arith.constant 0 : index
    %c0_13 = arith.constant 0 : index
    %19 = vector.load %arg4[%c0_11, %c0_12, %c0_13] : memref<15x45x128xf32, #tpu.memory_space<vmem>>, vector<15x45x128xf32>
    tpu.vector_store %arg4[%c0_11, %c0_12, %c0_13], %18 {strides = array<i32>} : memref<15x45x128xf32, #tpu.memory_space<vmem>>, vector<15x45x128xf32>,
    return
  }
  func.func @transform_0(%arg0: i32) -> (i32, i32, i32) {
    %c0_i32 = arith.constant 0 : i32
    %c0_i32_0 = arith.constant 0 : i32
    %c0_i32_1 = arith.constant 0 : i32
    return %arg0, %c0_i32, %c0_i32_0 : i32, i32, i32
  }
  func.func @transform_1(%arg0: i32) -> (i32, i32, i32) {
    %c0_i32 = arith.constant 0 : i32
    %c0_i32_0 = arith.constant 0 : i32
    %c0_i32_1 = arith.constant 0 : i32
    return %arg0, %c0_i32, %c0_i32_0 : i32, i32, i32
  }
  func.func @transform_2(%arg0: i32) -> (i32, i32, i32) {
    %c0_i32 = arith.constant 0 : i32
    %c0_i32_0 = arith.constant 0 : i32
    %c0_i32_1 = arith.constant 0 : i32
    return %arg0, %c0_i32, %c0_i32_0 : i32, i32, i32
  }
  func.func @transform_3(%arg0: i32) -> (i32, i32, i32) {
    %c0_i32 = arith.constant 0 : i32
    %c0_i32_0 = arith.constant 0 : i32
    %c0_i32_1 = arith.constant 0 : i32
    return %arg0, %c0_i32, %c0_i32_0 : i32, i32, i32
  }
}

</mosaic_0001>

<bundles_post_ra>
// kernel: tpu_custom_call.1
= control target key start
LH: loop header
LB: loop body
LE: loop exit
PB: predicated region body
PF: predicated region fallthrough
CT: control target
= control target key end

     0   :  { %8 = vsyncpa [#allocation3], 0  ;;  %s7492_s0 = inlined_call_operand.vmem [shape: f32[30,45,128], index: 0, kind: input, shape index: {}]   ;;  %s7493_s1 = inlined_call_operand.vmem [shape: f32[30,128,45], index: 1, kind: input, shape index: {}]   ;;  %s7494_s2 = inlined_call_operand.vmem [shape: f32[30,45,128], index: 2, kind: input, shape index: {}]   ;;  %s7495_s3 = inlined_call_operand.hbm [shape: f32[30,45,128], index: 3, kind: output, shape index: {}]  }
   0x1   :  { %10 = vsyncpa [#allocation3 + $0x1], 0  ;;  %s5478_s12 = smov 0   ;;  %s5480_s13 = smov 0  }
   0x2   :  { %s5482_s14 = smov 0   ;;  %s5484_s15 = smov 0  }
   0x3 LB: > { %s5499_s16 = sadd.s32 4294967295, %s5450_s15   ;;  %s3978_s17 = sadd.s32 4294967294, %s5450_s15   ;;  %s5450_s15 = sphi %s5484_s15, %s7633_s15   ;;  %s5446_s14 = sphi %s5482_s14, %s7632_s14   ;;  %s5442_s13 = sphi %s5480_s13, %s7631_s13   ;;  %s5438_s12 = sphi %s5478_s12, %s7630_s12  }
   0x4   : > { %s5503_s18 = sadd.s32 1, %s5450_s15   ;;  %s101_s19 = sadd.s32 1, %s5446_s14 }
   0x5   : > { %s98_s20 = ssub.s32 %s5450_s15, %s5503_s18  ;;  %p111_p0 = scmp.ne.s32.totalorder %s5446_s14, %s5442_s13 }
   0x6   : > { %p99_p1 = scmp.eq.s32.totalorder %s98_s20, 0  ;;  %p112_p2 = scmp.eq.s32.totalorder %s5499_s16, 1 }
   0x7   : > { %p117_p3 = scmp.ne.s32.totalorder %s5442_s13, %s5438_s12  ;;  %p118_p4 = scmp.eq.s32.totalorder %s3978_s17, 1 }
   0x8   : > { %s5514_s21 = scalar_select %p99_p1, %s5446_s14, %s101_s19  }
   0x9   : > { %p5516_p5 = por %p112_p2, %p111_p0  ;;  %p5520_p6 = por %p118_p4, %p117_p3 }
   0xa   : > { %p3981_p7 = scmp.ge.s32.totalorder %s5450_s15, 1  ;;  %p166_p8 = scmp.lt.s32.totalorder %s5450_s15, 3 }
   0xc   : > { %p167_p9 = pnand %p3981_p7, %p166_p8 }
   0xe   : > { %170 = sbr.rel (%p167_p9) target bundleno = 907 (0x38b), region = 32 }
  0x15   : > { %s203_s24 = smul.u32 15, %s5499_s16  ;;  %v7496_v0 = vmov 0.0   ;;  %vm5453_vm0 = vmmov 0   ;;  %vm1711_vm1 = vcmask 367616   ;;  %vm1727_vm2 = vcmask 364544   ;;  %s200_s9 = sand.u32 1, %s5442_s13  }
  0x16   : > { %4290 = vmatprep.subr.bf16.mxu0 %v7496_v0  ;;  %4318 = vmatprep.subr.bf16.mxu1 %v7496_v0  ;;  %vm2577_vm3 = vcmask 1045504   ;;  %vm2578_vm4 = vcmask 1046528   ;;  %s4980_s10 = smul.u32 720, %s200_s9  ;;  %s5455_s27 = smov [#allocation2]  }
  0x17   : > { %p204_p10 = scmp.lt.s32.totalorder %s203_s24, 29  ;;  %4306 = vmatprep.mubr.msk.bf16.mxu0 %vm5453_vm0, %v7496_v0  ;;  %4334 = vmatprep.mubr.msk.bf16.mxu1 %vm5453_vm0, %v7496_v0  ;;  %s4989_s17 = smul.u32 11520, %s5499_s16 }
  0x18   : > { %s7266_s11 = scalar_lea.vmem [#allocation2], %s4980_s10  ;;  %s7451_s16 = scalar_lea.sflag [#allocation3], %s200_s9 }
  0x19   : > { %s7635_s24 = smov (!%p204_p10, %s203_s24), 29  ;;  %s3892_s19 = sshll.u32 %s7266_s11, 4  ;;  %s7445_s19 = int_to_ptr.vmem [resolvable:$true] %s3892_s19 }
  0x1a   : > { %s4034_s25 = sshll.u32 %s7635_s24, 7  ;;  %s4981_s29 = smul.u32 48, %s7635_s24 }
  0x1b   : > { %s5539_s28 = scalar_lea.vmem %s7493_s1, %s4034_s25  ;;  %s7443_s25 = scalar_lea.hbm %s7495_s3, %s4989_s17 }
  0x1c   : > { %v361_v1 = vld [vmem:[%s5539_s28] sm:$0xff]  ;;  %v362_v2 = vld [vmem:[%s5539_s28 + $0x8] sm:$0xff]  ;;  %v363_v3 = vld [vmem:[%s5539_s28 + $0x10] sm:$0xff]  ;;  %s5585_s5 = scalar_lea.vmem %s7492_s0, %s4981_s29  ;;  %s6130_s8 = scalar_lea.vmem %s7494_s2, %s4981_s29 }
  0x1d   : > { %v601_v4 = vpack.c.bf16 %v362_v2, %v361_v1  ;;  %v364_v5 = vld [vmem:[%s5539_s28 + $0x18] sm:$0xff]  ;;  %v365_v7 = vld [vmem:[%s5539_s28 + $0x20] sm:$0xff]  ;;  %v366_v8 = vld [vmem:[%s5539_s28 + $0x28] sm:$0xff]  ;;  %s5388_s26 = scalar_lea.vmem %s7445_s19, 11520 }
  0x1e   : > { %v602_v6 = vpack.c.bf16 %v364_v5, %v363_v3  ;;  %v377_v9 = vld [vmem:[%s5539_s28 + $0x80] sm:$0xff]  ;;  %v378_v10 = vld [vmem:[%s5539_s28 + $0x88] sm:$0xff]  ;;  %v379_v12 = vld [vmem:[%s5539_s28 + $0x90] sm:$0xff]  ;;  %v603_v14 = vpack.c.bf16 %v366_v8, %v365_v7  ;;  %p5389_p11 = scmp.ne.s32.totalorder %s7445_s19, %s5388_s26 }
  0x1f   : > { %4291 = vmatpush3.bf16.msra.mxu0 %v601_v4  ;;  %v609_v11 = vpack.c.bf16 %v378_v10, %v377_v9  ;;  %v380_v13 = vld [vmem:[%s5539_s28 + $0x98] sm:$0xff]  ;;  %v367_v15 = vld [vmem:[%s5539_s28 + $0x30] sm:$0xff]  ;;  %v381_v18 = vld [vmem:[%s5539_s28 + $0xa0] sm:$0xff] }
  0x20   : > { %4292 = vmatprep.subr.bf16.mxu0 %v7496_v0  ;;  %v610_v16 = vpack.c.bf16 %v380_v13, %v379_v12  ;;  %v368_v17 = vld [vmem:[%s5539_s28 + $0x38] sm:$0xff]  ;;  %v382_v19 = vld [vmem:[%s5539_s28 + $0xa8] sm:$0xff]  ;;  %v369_v21 = vld [vmem:[%s5539_s28 + $0x40] sm:$0xff]  ;;  %p5390_p12 = pnand %p5389_p11, %p5516_p5 }
  0x21   : > { %4319 = vmatpush3.bf16.msra.mxu1 %v609_v11  ;;  %v604_v20 = vpack.c.bf16 %v368_v17, %v367_v15  ;;  %v611_v22 = vpack.c.bf16 %v382_v19, %v381_v18  ;;  %v370_v23 = vld [vmem:[%s5539_s28 + $0x48] sm:$0xff]  ;;  %v383_v24 = vld [vmem:[%s5539_s28 + $0xb0] sm:$0xff]  ;;  %v384_v25 = vld [vmem:[%s5539_s28 + $0xb8] sm:$0xff] }
  0x22   : > { %4320 = vmatprep.subr.bf16.mxu1 %v7496_v0  ;;  %v605_v26 = vpack.c.bf16 %v370_v23, %v369_v21  ;;  %v371_v27 = vld [vmem:[%s5539_s28 + $0x50] sm:$0xff]  ;;  %v612_v28 = vpack.c.bf16 %v384_v25, %v383_v24  ;;  %v372_v29 = vld [vmem:[%s5539_s28 + $0x58] sm:$0xff]  ;;  %v385_v30 = vld [vmem:[%s5539_s28 + $0xc0] sm:$0xff]  ;;  %p5391_p13 = pneg %p5390_p12 }
  0x23   : > { %4293 = vmatpush3.bf16.msra.mxu0 %v602_v6  ;;  %v386_v31 = vld [vmem:[%s5539_s28 + $0xc8] sm:$0xff]  ;;  %v606_v32 = vpack.c.bf16 %v372_v29, %v371_v27  ;;  %v373_v33 = vld [vmem:[%s5539_s28 + $0x60] sm:$0xff]  ;;  %v387_v36 = vld [vmem:[%s5539_s28 + $0xd0] sm:$0xff] }
  0x24   : > { %4294 = vmatprep.subr.bf16.mxu0 %v7496_v0  ;;  %v613_v34 = vpack.c.bf16 %v386_v31, %v385_v30  ;;  %v374_v35 = vld [vmem:[%s5539_s28 + $0x68] sm:$0xff]  ;;  %v388_v37 = vld [vmem:[%s5539_s28 + $0xd8] sm:$0xff]  ;;  %v375_v39 = vld [vmem:[%s5539_s28 + $0x70] sm:$0xff] }
  0x25   : > { %4321 = vmatpush3.bf16.msra.mxu1 %v610_v16  ;;  %v607_v38 = vpack.c.bf16 %v374_v35, %v373_v33  ;;  %v614_v40 = vpack.c.bf16 %v388_v37, %v387_v36  ;;  %v376_v41 = vld [vmem:[%s5539_s28 + $0x78] sm:$0xff]  ;;  %v389_v42 = vld [vmem:[%s5539_s28 + $0xe0] sm:$0xff]  ;;  %v390_v43 = vld [vmem:[%s5539_s28 + $0xe8] sm:$0xff] }
  0x26   : > { %4322 = vmatprep.subr.bf16.mxu1 %v7496_v0  ;;  %v608_v44 = vpack.c.bf16 %v376_v41, %v375_v39  ;;  %v226_v45 = vld [vmem:[%s5585_s5] sm:$0xff]  ;;  %v227_v46 = vld [vmem:[%s5585_s5 + $0x8] sm:$0xff]  ;;  %v615_v47 = vpack.c.bf16 %v390_v43, %v389_v42  ;;  %v391_v50 = vld [vmem:[%s5539_s28 + $0xf0] sm:$0xff] }
  0x27   : > { %4295 = vmatpush3.bf16.msra.mxu0 %v603_v14  ;;  %v393_v48 = vld [vmem:[%s5539_s28 + $0x100] sm:$0xff]  ;;  %v394_v49 = vld [vmem:[%s5539_s28 + $0x108] sm:$0xff]  ;;  %v392_v51 = vld [vmem:[%s5539_s28 + $0xf8] sm:$0xff]  ;;  %v316_v52 = vpack.c.bf16 %v227_v46, %v226_v45 }
  0x28   : > { %4296 = vmatprep.subr.bf16.mxu0 %v7496_v0  ;;  %v617_v53 = vpack.c.bf16 %v394_v49, %v393_v48  ;;  %v395_v54 = vld [vmem:[%s5539_s28 + $0x110] sm:$0xff]  ;;  %v396_v55 = vld [vmem:[%s5539_s28 + $0x118] sm:$0xff]  ;;  %v616_v56 = vpack.c.bf16 %v392_v51, %v391_v50  ;;  %v409_v59 = vld [vmem:[%s5539_s28 + $0x180] sm:$0xff] }
  0x29   : > { %4323 = vmatpush3.bf16.msra.mxu1 %v611_v22  ;;  %v232_v57 = vld [vmem:[%s5585_s5 + $0x30] sm:$0xff]  ;;  %v233_v58 = vld [vmem:[%s5585_s5 + $0x38] sm:$0xff]  ;;  %v410_v60 = vld [vmem:[%s5539_s28 + $0x188] sm:$0xff]  ;;  %v618_v61 = vpack.c.bf16 %v396_v55, %v395_v54 }
  0x2a   : > { %4324 = vmatprep.subr.bf16.mxu1 %v7496_v0  ;;  %v228_v62 = vld [vmem:[%s5585_s5 + $0x10] sm:$0xff]  ;;  %v229_v63 = vld [vmem:[%s5585_s5 + $0x18] sm:$0xff]  ;;  %v319_v1 = vpack.c.bf16 %v233_v58, %v232_v57  ;;  %v397_v2 = vld [vmem:[%s5539_s28 + $0x120] sm:$0xff]  ;;  %v625_v4 = vpack.c.bf16 %v410_v60, %v409_v59 }
  0x2b   : > { %4297 = vmatpush3.bf16.msra.mxu0 %v604_v20  ;;  %v398_v3 = vld [vmem:[%s5539_s28 + $0x128] sm:$0xff]  ;;  %v411_v5 = vld [vmem:[%s5539_s28 + $0x190] sm:$0xff]  ;;  %v412_v6 = vld [vmem:[%s5539_s28 + $0x198] sm:$0xff]  ;;  %v317_v7 = vpack.c.bf16 %v229_v63, %v228_v62 }
  0x2c   : > { %4298 = vmatprep.subr.bf16.mxu0 %v7496_v0  ;;  %v619_v8 = vpack.c.bf16 %v398_v3, %v397_v2  ;;  %v399_v9 = vld [vmem:[%s5539_s28 + $0x130] sm:$0xff]  ;;  %v400_v10 = vld [vmem:[%s5539_s28 + $0x138] sm:$0xff]  ;;  %v626_v11 = vpack.c.bf16 %v412_v6, %v411_v5  ;;  %v234_v12 = vld [vmem:[%s5585_s5 + $0x40] sm:$0xff] }
  0x2d   : > { %4325 = vmatpush3.bf16.msra.mxu1 %v612_v28  ;;  %v235_v13 = vld [vmem:[%s5585_s5 + $0x48] sm:$0xff]  ;;  %v413_v14 = vld [vmem:[%s5539_s28 + $0x1a0] sm:$0xff]  ;;  %v620_v16 = vpack.c.bf16 %v400_v10, %v399_v9  ;;  %v415_v23 = vld [vmem:[%s5539_s28 + $0x1b0] sm:$0xff] }
  0x2e   : > { %4326 = vmatprep.subr.bf16.mxu1 %v7496_v0  ;;  %v414_v15 = vld [vmem:[%s5539_s28 + $0x1a8] sm:$0xff]  ;;  %v230_v17 = vld [vmem:[%s5585_s5 + $0x20] sm:$0xff]  ;;  %v320_v19 = vpack.c.bf16 %v235_v13, %v234_v12  ;;  %v416_v24 = vld [vmem:[%s5539_s28 + $0x1b8] sm:$0xff] }
  0x2f   : > { %4299 = vmatpush3.bf16.msra.mxu0 %v605_v26  ;;  %v231_v18 = vld [vmem:[%s5585_s5 + $0x28] sm:$0x1f]  ;;  %v401_v20 = vld [vmem:[%s5539_s28 + $0x140] sm:$0xff]  ;;  %v627_v22 = vpack.c.bf16 %v414_v15, %v413_v14  ;;  %v403_v27 = vld [vmem:[%s5539_s28 + $0x150] sm:$0xff]  ;;  %v628_v29 = vpack.c.bf16 %v416_v24, %v415_v23 }
  0x30   : > { %4300 = vmatprep.subr.bf16.mxu0 %v7496_v0  ;;  %v402_v21 = vld [vmem:[%s5539_s28 + $0x148] sm:$0xff]  ;;  %v318_v25 = vpack.c.bf16 %v231_v18, %v230_v17  ;;  %v404_v28 = vld [vmem:[%s5539_s28 + $0x158] sm:$0xff]  ;;  %v236_v30 = vld [vmem:[%s5585_s5 + $0x50] sm:$0xff] }
  0x31   : > { %4327 = vmatpush3.bf16.msra.mxu1 %v613_v34  ;;  %v621_v26 = vpack.c.bf16 %v402_v21, %v401_v20  ;;  %v237_v31 = vld [vmem:[%s5585_s5 + $0x58] sm:$0x1f]  ;;  %v418_v33 = vld [vmem:[%s5539_s28 + $0x1c8] sm:$0xff]  ;;  %v622_v34 = vpack.c.bf16 %v404_v28, %v403_v27  ;;  %v405_v36 = vld [vmem:[%s5539_s28 + $0x160] sm:$0xff] }
  0x32   : > { %4328 = vmatprep.subr.bf16.mxu1 %v7496_v0  ;;  %v321_v35 = vpack.c.bf16 %v237_v31, %v236_v30  ;;  %v406_v37 = vld [vmem:[%s5539_s28 + $0x168] sm:$0xff]  ;;  %v419_v39 = vld [vmem:[%s5539_s28 + $0x1d0] sm:$0xff]  ;;  %v408_v43 = vld [vmem:[%s5539_s28 + $0x178] sm:$0xff] }
  0x33   : > { %4301 = vmatpush3.bf16.msra.mxu0 %v606_v32  ;;  %v417_v32 = vld [vmem:[%s5539_s28 + $0x1c0] sm:$0xff]  ;;  %v623_v41 = vpack.c.bf16 %v406_v37, %v405_v36  ;;  %v407_v42 = vld [vmem:[%s5539_s28 + $0x170] sm:$0xff]  ;;  %v422_v46 = vld [vmem:[%s5539_s28 + $0x1e8] sm:$0xff] }
  0x34   : > { %4302 = vmatprep.subr.bf16.mxu0 %v7496_v0  ;;  %v421_v45 = vld [vmem:[%s5539_s28 + $0x1e0] sm:$0xff]  ;;  %v239_v49 = vld [vmem:[%s5585_s5 + $0x68] sm:$0xff]  ;;  %v424_v54 = vld [vmem:[%s5539_s28 + $0x1f8] sm:$0xff] }
  0x35   : > { %4329 = vmatpush3.bf16.msra.mxu1 %v614_v40  ;;  %v420_v40 = vld [vmem:[%s5539_s28 + $0x1d8] sm:$0xff]  ;;  %v238_v48 = vld [vmem:[%s5585_s5 + $0x60] sm:$0xff]  ;;  %v426_v51 = vld [vmem:[%s5539_s28 + $0x208] sm:$0xff] }
  0x36   : > { %4330 = vmatprep.subr.bf16.mxu1 %v7496_v0  ;;  %v425_v50 = vld [vmem:[%s5539_s28 + $0x200] sm:$0xff]  ;;  %v322_v55 = vpack.c.bf16 %v239_v49, %v238_v48  ;;  %v427_v57 = vld [vmem:[%s5539_s28 + $0x210] sm:$0xff]  ;;  %v428_v58 = vld [vmem:[%s5539_s28 + $0x218] sm:$0xff] }
  0x37   : > { %4303 = vmatpush3.bf16.msra.mxu0 %v607_v38  ;;  %v629_v38 = vpack.c.bf16 %v418_v33, %v417_v32  ;;  %v244_v60 = vld [vmem:[%s5585_s5 + $0x90] sm:$0xff]  ;;  %v441_v62 = vld [vmem:[%s5539_s28 + $0x280] sm:$0xff]  ;;  %v442_v63 = vld [vmem:[%s5539_s28 + $0x288] sm:$0xff] }
  0x38   : > { %4304 = vmatprep.subr.bf16.mxu0 %v7496_v0  ;;  %v240_v2 = vld [vmem:[%s5585_s5 + $0x70] sm:$0xff]  ;;  %v241_v3 = vld [vmem:[%s5585_s5 + $0x78] sm:$0xff]  ;;  %v429_v5 = vld [vmem:[%s5539_s28 + $0x220] sm:$0xff] }
  0x39   : > { %4331 = vmatpush3.bf16.msra.mxu1 %v615_v47  ;;  %v624_v47 = vpack.c.bf16 %v408_v43, %v407_v42  ;;  %v430_v6 = vld [vmem:[%s5539_s28 + $0x228] sm:$0xff]  ;;  %v444_v9 = vld [vmem:[%s5539_s28 + $0x298] sm:$0xff]  ;;  %v323_v10 = vpack.c.bf16 %v241_v3, %v240_v2  ;;  %v431_v12 = vld [vmem:[%s5539_s28 + $0x230] sm:$0xff] }
  0x3a   : > { %4332 = vmatprep.subr.bf16.mxu1 %v7496_v0  ;;  %v432_v13 = vld [vmem:[%s5539_s28 + $0x238] sm:$0xff]  ;;  %v246_v15 = vld [vmem:[%s5585_s5 + $0xa0] sm:$0xff]  ;;  %v446_v18 = vld [vmem:[%s5539_s28 + $0x2a8] sm:$0xff] }
  0x3b   : > { %4305 = vmatpush3.bf16.msra.mxu0 %v608_v44  ;;  %v630_v44 = vpack.c.bf16 %v420_v40, %v419_v39  ;;  %v445_v17 = vld [vmem:[%s5539_s28 + $0x2a0] sm:$0xff]  ;;  %v243_v21 = vld [vmem:[%s5585_s5 + $0x88] sm:$0x1f]  ;;  %v448_v27 = vld [vmem:[%s5539_s28 + $0x2b8] sm:$0xff] }
  0x3c   : > { %4346 = vmatprep.subr.bf16.mxu0 %v7496_v0  ;;  %v242_v20 = vld [vmem:[%s5585_s5 + $0x80] sm:$0xff]  ;;  %v434_v24 = vld [vmem:[%s5539_s28 + $0x248] sm:$0xff]  ;;  %v435_v30 = vld [vmem:[%s5539_s28 + $0x250] sm:$0xff] }
  0x3d   : > { %4333 = vmatpush3.bf16.msra.mxu1 %v616_v56  ;;  %v633_v56 = vpack.c.bf16 %v426_v51, %v425_v50  ;;  %v433_v23 = vld [vmem:[%s5539_s28 + $0x240] sm:$0xff]  ;;  %v324_v28 = vpack.c.bf16 %v243_v21, %v242_v20  ;;  %v436_v31 = vld [vmem:[%s5539_s28 + $0x258] sm:$0xff]  ;;  %v248_v33 = vld [vmem:[%s5585_s5 + $0xb0] sm:$0xff] }
  0x3e   : > { %4307 = vmatmul.mubr.bf16.vlgmr.msra.gmra.mrb[0].mxu0 %v316_v52  ;;  %4374 = vmatprep.subr.bf16.mxu1 %v7496_v0  ;;  %v631_v52 = vpack.c.bf16 %v422_v46, %v421_v45  ;;  %v450_v36 = vld [vmem:[%s5539_s28 + $0x2c8] sm:$0xff]  ;;  %v638_v37 = vpack.c.bf16 %v436_v31, %v435_v30  ;;  %v437_v39 = vld [vmem:[%s5539_s28 + $0x260] sm:$0xff]  ;;  %v451_v42 = vld [vmem:[%s5539_s28 + $0x2d0] sm:$0xff] }
  0x3f   : > { %4347 = vmatpush3.bf16.msra.mxu0 %v617_v53  ;;  %4310 = vmatprep.mubr.msk.bf16.mxu0 %vm5453_vm0, %v7496_v0  ;;  %v423_v53 = vld [vmem:[%s5539_s28 + $0x1f0] sm:$0xff]  ;;  %v438_v40 = vld [vmem:[%s5539_s28 + $0x268] sm:$0xff]  ;;  %v452_v43 = vld [vmem:[%s5539_s28 + $0x2d8] sm:$0xff] }
  0x40   : > { %4348 = vmatprep.subr.bf16.mxu0 %v7496_v0  ;;  %4335 = vmatmul.mubr.bf16.vlgmr.msra.gmra.mrb[0].mxu1 %v319_v1  ;;  %v632_v59 = vpack.c.bf16 %v424_v54, %v423_v53  ;;  %v634_v1 = vpack.c.bf16 %v428_v58, %v427_v57  ;;  %v439_v45 = vld [vmem:[%s5539_s28 + $0x270] sm:$0xff]  ;;  %v440_v46 = vld [vmem:[%s5539_s28 + $0x278] sm:$0xff]  ;;  %v453_v48 = vld [vmem:[%s5539_s28 + $0x2e0] sm:$0xff] }
  0x41   : > { %4375 = vmatpush3.bf16.msra.mxu1 %v625_v4  ;;  %4338 = vmatprep.mubr.msk.bf16.mxu1 %vm5453_vm0, %v7496_v0  ;;  %v454_v49 = vld [vmem:[%s5539_s28 + $0x2e8] sm:$0xff]  ;;  %v640_v50 = vpack.c.bf16 %v440_v46, %v439_v45  ;;  %v250_v51 = vld [vmem:[%s5585_s5 + $0xc0] sm:$0xff]  ;;  %v456_v57 = vld [vmem:[%s5539_s28 + $0x2f8] sm:$0xff] }
  0x42   : > { %4376 = vmatprep.subr.bf16.mxu1 %v7496_v0  ;;  %v457_v53 = vld [vmem:[%s5539_s28 + $0x300] sm:$0xff]  ;;  %v458_v54 = vld [vmem:[%s5539_s28 + $0x308] sm:$0xff]  ;;  %v480_v30 = vld [vmem:[%s5539_s28 + $0x3b8] sm:$0xff] }
  0x43   : > { %4349 = vmatpush3.bf16.msra.mxu0 %v618_v61  ;;  %v245_v61 = vld [vmem:[%s5585_s5 + $0x98] sm:$0xff]  ;;  %v473_v2 = vld [vmem:[%s5539_s28 + $0x380] sm:$0xff]  ;;  %v474_v3 = vld [vmem:[%s5539_s28 + $0x388] sm:$0xff] }
  0x44   : > { %4350 = vmatprep.subr.bf16.mxu0 %v7496_v0  ;;  %v325_v4 = vpack.c.bf16 %v245_v61, %v244_v60  ;;  %v459_v60 = vld [vmem:[%s5539_s28 + $0x310] sm:$0xff]  ;;  %v460_v61 = vld [vmem:[%s5539_s28 + $0x318] sm:$0xff]  ;;  %v477_v20 = vld [vmem:[%s5539_s28 + $0x3a0] sm:$0xff] }
  0x45   : > { %4377 = vmatpush3.bf16.msra.mxu1 %v626_v11  ;;  %v635_v11 = vpack.c.bf16 %v430_v6, %v429_v5  ;;  %v252_v5 = vld [vmem:[%s5585_s5 + $0xd0] sm:$0xff]  ;;  %v253_v6 = vld [vmem:[%s5585_s5 + $0xd8] sm:$0xff]  ;;  %v478_v21 = vld [vmem:[%s5539_s28 + $0x3a8] sm:$0xff] }
  0x46   : > { %4311 = vmatmul.mubr.bf16.gmra.mrb[4].mxu0 %v317_v7  ;;  %4378 = vmatprep.subr.bf16.mxu1 %v7496_v0  ;;  %v641_v7 = vpack.c.bf16 %v442_v63, %v441_v62  ;;  %v256_v63 = vld [vmem:[%s5585_s5 + $0xf0] sm:$0xff]  ;;  %v484_v46 = vld [vmem:[%s5539_s28 + $0x3d8] sm:$0xff] }
  0x47   : > { %4351 = vmatpush3.bf16.msra.mxu0 %v619_v8  ;;  %4314 = vmatprep.mubr.msk.bf16.mxu0 %vm5453_vm0, %v7496_v0  ;;  %v443_v8 = vld [vmem:[%s5539_s28 + $0x290] sm:$0xff] }
  0x48   : > { %4352 = vmatprep.subr.bf16.mxu0 %v7496_v0  ;;  %4339 = vmatmul.mubr.bf16.gmra.mrb[4].mxu1 %v320_v19  ;;  %v642_v14 = vpack.c.bf16 %v444_v9, %v443_v8  ;;  %v636_v19 = vpack.c.bf16 %v432_v13, %v431_v12  ;;  %v461_v8 = vld [vmem:[%s5539_s28 + $0x320] sm:$0xff]  ;;  %v462_v9 = vld [vmem:[%s5539_s28 + $0x328] sm:$0xff]  ;;  %v476_v12 = vld [vmem:[%s5539_s28 + $0x398] sm:$0xff]  ;;  %v329_v13 = vpack.c.bf16 %v253_v6, %v252_v5 }
  0x49   : > { %4379 = vmatpush3.bf16.msra.mxu1 %v627_v22  ;;  %4342 = vmatprep.mubr.msk.bf16.mxu1 %vm5453_vm0, %v7496_v0  ;;  %v483_v45 = vld [vmem:[%s5539_s28 + $0x3d0] sm:$0xff]  ;;  %v505_v5 = vld [vmem:[%s5539_s28 + $0x480] sm:$0xff]  ;;  %v506_v6 = vld [vmem:[%s5539_s28 + $0x488] sm:$0xff] }
  0x4a   : > { %4380 = vmatprep.subr.bf16.mxu1 %v7496_v0 }
  0x4b   : > { %4353 = vmatpush3.bf16.msra.mxu0 %v620_v16  ;;  %v247_v16 = vld [vmem:[%s5585_s5 + $0xa8] sm:$0xff] }
  0x4c   : > { %4354 = vmatprep.subr.bf16.mxu0 %v7496_v0  ;;  %v326_v22 = vpack.c.bf16 %v247_v16, %v246_v15  ;;  %v463_v15 = vld [vmem:[%s5539_s28 + $0x330] sm:$0xff]  ;;  %v464_v16 = vld [vmem:[%s5539_s28 + $0x338] sm:$0xff] }
  0x4d   : > { %4381 = vmatpush3.bf16.msra.mxu1 %v628_v29  ;;  %v637_v29 = vpack.c.bf16 %v434_v24, %v433_v23  ;;  %v254_v23 = vld [vmem:[%s5585_s5 + $0xe0] sm:$0xff]  ;;  %v255_v24 = vld [vmem:[%s5585_s5 + $0xe8] sm:$0x1f] }
  0x4e   : > { %4315 = vmatmul.mubr.bf16.gmra.mrb[8].mxu0 %v318_v25  ;;  %4382 = vmatprep.subr.bf16.mxu1 %v7496_v0  ;;  %v643_v25 = vpack.c.bf16 %v446_v18, %v445_v17  ;;  %v258_v18 = vld [vmem:[%s5585_s5 + $0x100] sm:$0xff]  ;;  %v330_v31 = vpack.c.bf16 %v255_v24, %v254_v23  ;;  %v510_v24 = vld [vmem:[%s5539_s28 + $0x4a8] sm:$0xff] }
  0x4f   : > { %4355 = vmatpush3.bf16.msra.mxu0 %v621_v26  ;;  %4362 = vmatprep.mubr.msk.bf16.mxu0 %vm5453_vm0, %v7496_v0  ;;  %v447_v26 = vld [vmem:[%s5539_s28 + $0x2b0] sm:$0xff]  ;;  %v509_v23 = vld [vmem:[%s5539_s28 + $0x4a0] sm:$0xff] }
  0x50   : > { %4356 = vmatprep.subr.bf16.mxu0 %v7496_v0  ;;  %4343 = vmatmul.mubr.bf16.gmra.mrb[8].mxu1 %v321_v35  ;;  %v644_v32 = vpack.c.bf16 %v448_v27, %v447_v26  ;;  %v449_v35 = vld [vmem:[%s5539_s28 + $0x2c0] sm:$0xff]  ;;  %v466_v27 = vld [vmem:[%s5539_s28 + $0x348] sm:$0xff] }
  0x51   : > { %4383 = vmatpush3.bf16.msra.mxu1 %v629_v38  ;;  %4390 = vmatprep.mubr.msk.bf16.mxu1 %vm5453_vm0, %v7496_v0  ;;  %v465_v26 = vld [vmem:[%s5539_s28 + $0x340] sm:$0xff] }
  0x52   : > { %4384 = vmatprep.subr.bf16.mxu1 %v7496_v0 }
  0x53   : > { %4357 = vmatpush3.bf16.msra.mxu0 %v622_v34  ;;  %v249_v34 = vld [vmem:[%s5585_s5 + $0xb8] sm:$0x1f] }
  0x54   : > { %4358 = vmatprep.subr.bf16.mxu0 %v7496_v0  ;;  %v327_v38 = vpack.c.bf16 %v249_v34, %v248_v33  ;;  %v467_v33 = vld [vmem:[%s5539_s28 + $0x350] sm:$0xff]  ;;  %v468_v34 = vld [vmem:[%s5539_s28 + $0x358] sm:$0xff] }
  0x55   : > { %4385 = vmatpush3.bf16.msra.mxu1 %v630_v44  ;;  %v639_v44 = vpack.c.bf16 %v438_v40, %v437_v39  ;;  %v482_v39 = vld [vmem:[%s5539_s28 + $0x3c8] sm:$0xff]  ;;  %v654_v40 = vpack.c.bf16 %v468_v34, %v467_v33  ;;  %v512_v33 = vld [vmem:[%s5539_s28 + $0x4b8] sm:$0xff] }
  0x56   : > { %4386 = vmatprep.subr.bf16.mxu1 %v7496_v0 }
  0x57   : > { %4359 = vmatpush3.bf16.msra.mxu0 %v623_v41  ;;  %v645_v41 = vpack.c.bf16 %v450_v36, %v449_v35  ;;  %v260_v36 = vld [vmem:[%s5585_s5 + $0x110] sm:$0xff] }
  0x58   : > { %4360 = vmatprep.subr.bf16.mxu0 %v7496_v0 }
  0x59   : > { %4387 = vmatpush3.bf16.msra.mxu1 %v631_v52  ;;  %v251_v52 = vld [vmem:[%s5585_s5 + $0xc8] sm:$0xff] }
  0x5a   : > { %4388 = vmatprep.subr.bf16.mxu1 %v7496_v0  ;;  %v328_v58 = vpack.c.bf16 %v251_v52, %v250_v51  ;;  %v485_v51 = vld [vmem:[%s5539_s28 + $0x3e0] sm:$0xff]  ;;  %v486_v52 = vld [vmem:[%s5539_s28 + $0x3e8] sm:$0xff] }
  0x5b   : > { %4361 = vmatpush3.bf16.msra.mxu0 %v624_v47  ;;  %v646_v47 = vpack.c.bf16 %v452_v43, %v451_v42  ;;  %v469_v42 = vld [vmem:[%s5539_s28 + $0x360] sm:$0xff]  ;;  %v470_v43 = vld [vmem:[%s5539_s28 + $0x368] sm:$0xff] }
  0x5c   : > { %4402 = vmatprep.subr.bf16.mxu0 %v7496_v0 }
  0x5d   : > { %4389 = vmatpush3.bf16.msra.mxu1 %v632_v59  ;;  %v649_v59 = vpack.c.bf16 %v458_v54, %v457_v53  ;;  %v262_v54 = vld [vmem:[%s5585_s5 + $0x120] sm:$0xff] }
  0x5e   : > { %4363 = vmatmul.mubr.bf16.vlgmr.msra.gmra.mrb[12].mxu0 %v322_v55  ;;  %4430 = vmatprep.subr.bf16.mxu1 %v7496_v0  ;;  %v647_v55 = vpack.c.bf16 %v454_v49, %v453_v48  ;;  %v471_v48 = vld [vmem:[%s5539_s28 + $0x370] sm:$0xff]  ;;  %v472_v49 = vld [vmem:[%s5539_s28 + $0x378] sm:$0xff] }
  0x5f   : > { %4403 = vmatpush3.bf16.msra.mxu0 %v633_v56  ;;  %4366 = vmatprep.mubr.msk.bf16.mxu0 %vm5453_vm0, %v7496_v0  ;;  %v455_v56 = vld [vmem:[%s5539_s28 + $0x2f0] sm:$0xff]  ;;  %v656_v53 = vpack.c.bf16 %v472_v49, %v471_v48  ;;  %v516_v49 = vld [vmem:[%s5539_s28 + $0x4d8] sm:$0xff] }
  0x60   : > { %4404 = vmatprep.subr.bf16.mxu0 %v7496_v0  ;;  %4391 = vmatmul.mubr.bf16.vlgmr.msra.gmra.mrb[12].mxu1 %v325_v4  ;;  %v648_v62 = vpack.c.bf16 %v456_v57, %v455_v56  ;;  %v650_v4 = vpack.c.bf16 %v460_v61, %v459_v60  ;;  %v489_v56 = vld [vmem:[%s5539_s28 + $0x400] sm:$0xff]  ;;  %v490_v57 = vld [vmem:[%s5539_s28 + $0x408] sm:$0xff]  ;;  %v488_v60 = vld [vmem:[%s5539_s28 + $0x3f8] sm:$0xff] }
  0x61   : > { %4431 = vmatpush3.bf16.msra.mxu1 %v641_v7  ;;  %4394 = vmatprep.mubr.msk.bf16.mxu1 %vm5453_vm0, %v7496_v0  ;;  %v515_v48 = vld [vmem:[%s5539_s28 + $0x4d0] sm:$0xff] }
  0x62   : > { %4432 = vmatprep.subr.bf16.mxu1 %v7496_v0 }
  0x63   : > { %4405 = vmatpush3.bf16.msra.mxu0 %v634_v1  ;;  %v257_v1 = vld [vmem:[%s5585_s5 + $0xf8] sm:$0xff] }
  0x64   : > { %4406 = vmatprep.subr.bf16.mxu0 %v7496_v0  ;;  %v331_v7 = vpack.c.bf16 %v257_v1, %v256_v63  ;;  %v491_v63 = vld [vmem:[%s5539_s28 + $0x410] sm:$0xff]  ;;  %v492_v1 = vld [vmem:[%s5539_s28 + $0x418] sm:$0xff] }
  0x65   : > { %4433 = vmatpush3.bf16.msra.mxu1 %v642_v14  ;;  %v651_v14 = vpack.c.bf16 %v462_v9, %v461_v8  ;;  %v264_v8 = vld [vmem:[%s5585_s5 + $0x130] sm:$0xff]  ;;  %v265_v9 = vld [vmem:[%s5585_s5 + $0x138] sm:$0xff] }
  0x66   : > { %4367 = vmatmul.mubr.bf16.gmra.mrb[16].mxu0 %v323_v10  ;;  %4434 = vmatprep.subr.bf16.mxu1 %v7496_v0  ;;  %v657_v10 = vpack.c.bf16 %v474_v3, %v473_v2  ;;  %v268_v3 = vld [vmem:[%s5585_s5 + $0x150] sm:$0xff] }
  0x67   : > { %4407 = vmatpush3.bf16.msra.mxu0 %v635_v11  ;;  %4370 = vmatprep.mubr.msk.bf16.mxu0 %vm5453_vm0, %v7496_v0  ;;  %v475_v11 = vld [vmem:[%s5539_s28 + $0x390] sm:$0xff] }
  0x68   : > { %4408 = vmatprep.subr.bf16.mxu0 %v7496_v0  ;;  %4395 = vmatmul.mubr.bf16.gmra.mrb[16].mxu1 %v326_v22  ;;  %v658_v17 = vpack.c.bf16 %v476_v12, %v475_v11  ;;  %v652_v22 = vpack.c.bf16 %v464_v16, %v463_v15  ;;  %v493_v11 = vld [vmem:[%s5539_s28 + $0x420] sm:$0xff]  ;;  %v494_v12 = vld [vmem:[%s5539_s28 + $0x428] sm:$0xff]  ;;  %v508_v15 = vld [vmem:[%s5539_s28 + $0x498] sm:$0xff]  ;;  %v335_v16 = vpack.c.bf16 %v265_v9, %v264_v8 }
  0x69   : > { %4435 = vmatpush3.bf16.msra.mxu1 %v643_v25  ;;  %4398 = vmatprep.mubr.msk.bf16.mxu1 %vm5453_vm0, %v7496_v0  ;;  %v537_v8 = vld [vmem:[%s5539_s28 + $0x580] sm:$0xff]  ;;  %v538_v9 = vld [vmem:[%s5539_s28 + $0x588] sm:$0xff] }
  0x6a   : > { %4436 = vmatprep.subr.bf16.mxu1 %v7496_v0 }
  0x6b   : > { %4409 = vmatpush3.bf16.msra.mxu0 %v636_v19  ;;  %v259_v19 = vld [vmem:[%s5585_s5 + $0x108] sm:$0xff] }
  0x6c   : > { %4410 = vmatprep.subr.bf16.mxu0 %v7496_v0  ;;  %v332_v25 = vpack.c.bf16 %v259_v19, %v258_v18  ;;  %v495_v18 = vld [vmem:[%s5539_s28 + $0x430] sm:$0xff]  ;;  %v496_v19 = vld [vmem:[%s5539_s28 + $0x438] sm:$0xff] }
  0x6d   : > { %4437 = vmatpush3.bf16.msra.mxu1 %v644_v32  ;;  %v653_v32 = vpack.c.bf16 %v466_v27, %v465_v26  ;;  %v266_v26 = vld [vmem:[%s5585_s5 + $0x140] sm:$0xff]  ;;  %v267_v27 = vld [vmem:[%s5585_s5 + $0x148] sm:$0x1f] }
  0x6e   : > { %4371 = vmatmul.mubr.bf16.gmra.mrb[20].mxu0 %v324_v28  ;;  %4438 = vmatprep.subr.bf16.mxu1 %v7496_v0  ;;  %v659_v28 = vpack.c.bf16 %v478_v21, %v477_v20  ;;  %v270_v21 = vld [vmem:[%s5585_s5 + $0x160] sm:$0xff]  ;;  %v336_v34 = vpack.c.bf16 %v267_v27, %v266_v26  ;;  %v542_v27 = vld [vmem:[%s5539_s28 + $0x5a8] sm:$0xff] }
  0x6f   : > { %4411 = vmatpush3.bf16.msra.mxu0 %v637_v29  ;;  %4418 = vmatprep.mubr.msk.bf16.mxu0 %vm5453_vm0, %v7496_v0  ;;  %v479_v29 = vld [vmem:[%s5539_s28 + $0x3b0] sm:$0xff]  ;;  %v541_v26 = vld [vmem:[%s5539_s28 + $0x5a0] sm:$0xff] }
  0x70   : > { %4412 = vmatprep.subr.bf16.mxu0 %v7496_v0  ;;  %4399 = vmatmul.mubr.bf16.gmra.mrb[20].mxu1 %v327_v38  ;;  %v660_v35 = vpack.c.bf16 %v480_v30, %v479_v29  ;;  %v481_v38 = vld [vmem:[%s5539_s28 + $0x3c0] sm:$0xff]  ;;  %v498_v30 = vld [vmem:[%s5539_s28 + $0x448] sm:$0xff] }
  0x71   : > { %4439 = vmatpush3.bf16.msra.mxu1 %v645_v41  ;;  %4446 = vmatprep.mubr.msk.bf16.mxu1 %vm5453_vm0, %v7496_v0  ;;  %v497_v29 = vld [vmem:[%s5539_s28 + $0x440] sm:$0xff] }
  0x72   : > { %4440 = vmatprep.subr.bf16.mxu1 %v7496_v0 }
  0x73   : > { %4413 = vmatpush3.bf16.msra.mxu0 %v638_v37  ;;  %v261_v37 = vld [vmem:[%s5585_s5 + $0x118] sm:$0x1f] }
  0x74   : > { %4414 = vmatprep.subr.bf16.mxu0 %v7496_v0  ;;  %v333_v41 = vpack.c.bf16 %v261_v37, %v260_v36  ;;  %v499_v36 = vld [vmem:[%s5539_s28 + $0x450] sm:$0xff]  ;;  %v500_v37 = vld [vmem:[%s5539_s28 + $0x458] sm:$0xff] }
  0x75   : > { %4441 = vmatpush3.bf16.msra.mxu1 %v646_v47  ;;  %v655_v47 = vpack.c.bf16 %v470_v43, %v469_v42  ;;  %v514_v42 = vld [vmem:[%s5539_s28 + $0x4c8] sm:$0xff]  ;;  %v670_v43 = vpack.c.bf16 %v500_v37, %v499_v36  ;;  %v544_v36 = vld [vmem:[%s5539_s28 + $0x5b8] sm:$0xff] }
  0x76   : > { %4442 = vmatprep.subr.bf16.mxu1 %v7496_v0 }
  0x77   : > { %4415 = vmatpush3.bf16.msra.mxu0 %v639_v44  ;;  %v661_v44 = vpack.c.bf16 %v482_v39, %v481_v38  ;;  %v272_v39 = vld [vmem:[%s5585_s5 + $0x170] sm:$0xff] }
  0x78   : > { %4416 = vmatprep.subr.bf16.mxu0 %v7496_v0 }
  0x79   : > { %4443 = vmatpush3.bf16.msra.mxu1 %v647_v55  ;;  %v263_v55 = vld [vmem:[%s5585_s5 + $0x128] sm:$0xff] }
  0x7a   : > { %4444 = vmatprep.subr.bf16.mxu1 %v7496_v0  ;;  %v334_v61 = vpack.c.bf16 %v263_v55, %v262_v54  ;;  %v517_v54 = vld [vmem:[%s5539_s28 + $0x4e0] sm:$0xff]  ;;  %v518_v55 = vld [vmem:[%s5539_s28 + $0x4e8] sm:$0xff] }
  0x7b   : > { %4417 = vmatpush3.bf16.msra.mxu0 %v640_v50  ;;  %v662_v50 = vpack.c.bf16 %v484_v46, %v483_v45  ;;  %v501_v45 = vld [vmem:[%s5539_s28 + $0x460] sm:$0xff]  ;;  %v502_v46 = vld [vmem:[%s5539_s28 + $0x468] sm:$0xff] }
  0x7c   : > { %4458 = vmatprep.subr.bf16.mxu0 %v7496_v0 }
  0x7d   : > { %4445 = vmatpush3.bf16.msra.mxu1 %v648_v62  ;;  %v665_v62 = vpack.c.bf16 %v490_v57, %v489_v56  ;;  %v274_v57 = vld [vmem:[%s5585_s5 + $0x180] sm:$0xff] }
  0x7e   : > { %4419 = vmatmul.mubr.bf16.vlgmr.msra.gmra.mrb[24].mxu0 %v328_v58  ;;  %4486 = vmatprep.subr.bf16.mxu1 %v7496_v0  ;;  %v663_v58 = vpack.c.bf16 %v486_v52, %v485_v51  ;;  %v503_v51 = vld [vmem:[%s5539_s28 + $0x470] sm:$0xff]  ;;  %v504_v52 = vld [vmem:[%s5539_s28 + $0x478] sm:$0xff] }
  0x7f   : > { %4459 = vmatpush3.bf16.msra.mxu0 %v649_v59  ;;  %4422 = vmatprep.mubr.msk.bf16.mxu0 %vm5453_vm0, %v7496_v0  ;;  %v487_v59 = vld [vmem:[%s5539_s28 + $0x3f0] sm:$0xff]  ;;  %v672_v56 = vpack.c.bf16 %v504_v52, %v503_v51  ;;  %v548_v52 = vld [vmem:[%s5539_s28 + $0x5d8] sm:$0xff] }
  0x80   : > { %4460 = vmatprep.subr.bf16.mxu0 %v7496_v0  ;;  %4447 = vmatmul.mubr.bf16.vlgmr.msra.gmra.mrb[24].mxu1 %v331_v7  ;;  %v664_v2 = vpack.c.bf16 %v488_v60, %v487_v59  ;;  %v666_v7 = vpack.c.bf16 %v492_v1, %v491_v63  ;;  %v521_v59 = vld [vmem:[%s5539_s28 + $0x500] sm:$0xff]  ;;  %v522_v60 = vld [vmem:[%s5539_s28 + $0x508] sm:$0xff]  ;;  %v520_v63 = vld [vmem:[%s5539_s28 + $0x4f8] sm:$0xff] }
  0x81   : > { %4487 = vmatpush3.bf16.msra.mxu1 %v657_v10  ;;  %4450 = vmatprep.mubr.msk.bf16.mxu1 %vm5453_vm0, %v7496_v0  ;;  %v547_v51 = vld [vmem:[%s5539_s28 + $0x5d0] sm:$0xff] }
  0x82   : > { %4488 = vmatprep.subr.bf16.mxu1 %v7496_v0 }
  0x83   : > { %4461 = vmatpush3.bf16.msra.mxu0 %v650_v4  ;;  %v269_v4 = vld [vmem:[%s5585_s5 + $0x158] sm:$0xff] }
  0x84   : > { %4462 = vmatprep.subr.bf16.mxu0 %v7496_v0  ;;  %v337_v10 = vpack.c.bf16 %v269_v4, %v268_v3  ;;  %v523_v3 = vld [vmem:[%s5539_s28 + $0x510] sm:$0xff]  ;;  %v524_v4 = vld [vmem:[%s5539_s28 + $0x518] sm:$0xff] }
  0x85   : > { %4489 = vmatpush3.bf16.msra.mxu1 %v658_v17  ;;  %v667_v17 = vpack.c.bf16 %v494_v12, %v493_v11  ;;  %v276_v11 = vld [vmem:[%s5585_s5 + $0x190] sm:$0xff]  ;;  %v277_v12 = vld [vmem:[%s5585_s5 + $0x198] sm:$0xff] }
  0x86   : > { %4423 = vmatmul.mubr.bf16.gmra.mrb[28].mxu0 %v329_v13  ;;  %4490 = vmatprep.subr.bf16.mxu1 %v7496_v0  ;;  %v673_v13 = vpack.c.bf16 %v506_v6, %v505_v5  ;;  %v280_v6 = vld [vmem:[%s5585_s5 + $0x1b0] sm:$0xff] }
  0x87   : > { %4463 = vmatpush3.bf16.msra.mxu0 %v651_v14  ;;  %4426 = vmatprep.mubr.msk.bf16.mxu0 %vm5453_vm0, %v7496_v0  ;;  %v507_v14 = vld [vmem:[%s5539_s28 + $0x490] sm:$0xff] }
  0x88   : > { %4464 = vmatprep.subr.bf16.mxu0 %v7496_v0  ;;  %4451 = vmatmul.mubr.bf16.gmra.mrb[28].mxu1 %v332_v25  ;;  %v674_v20 = vpack.c.bf16 %v508_v15, %v507_v14  ;;  %v668_v25 = vpack.c.bf16 %v496_v19, %v495_v18  ;;  %v525_v14 = vld [vmem:[%s5539_s28 + $0x520] sm:$0xff]  ;;  %v526_v15 = vld [vmem:[%s5539_s28 + $0x528] sm:$0xff]  ;;  %v540_v18 = vld [vmem:[%s5539_s28 + $0x598] sm:$0xff]  ;;  %v341_v19 = vpack.c.bf16 %v277_v12, %v276_v11 }
  0x89   : > { %4491 = vmatpush3.bf16.msra.mxu1 %v659_v28  ;;  %4454 = vmatprep.mubr.msk.bf16.mxu1 %vm5453_vm0, %v7496_v0  ;;  %v569_v11 = vld [vmem:[%s5539_s28 + $0x680] sm:$0xff]  ;;  %v570_v12 = vld [vmem:[%s5539_s28 + $0x688] sm:$0xff] }
  0x8a   : > { %4492 = vmatprep.subr.bf16.mxu1 %v7496_v0 }
  0x8b   : > { %4465 = vmatpush3.bf16.msra.mxu0 %v652_v22  ;;  %v271_v22 = vld [vmem:[%s5585_s5 + $0x168] sm:$0xff] }
  0x8c   : > { %4466 = vmatprep.subr.bf16.mxu0 %v7496_v0  ;;  %v338_v28 = vpack.c.bf16 %v271_v22, %v270_v21  ;;  %v527_v21 = vld [vmem:[%s5539_s28 + $0x530] sm:$0xff]  ;;  %v528_v22 = vld [vmem:[%s5539_s28 + $0x538] sm:$0xff] }
  0x8d   : > { %4493 = vmatpush3.bf16.msra.mxu1 %v660_v35  ;;  %v669_v35 = vpack.c.bf16 %v498_v30, %v497_v29  ;;  %v278_v29 = vld [vmem:[%s5585_s5 + $0x1a0] sm:$0xff]  ;;  %v279_v30 = vld [vmem:[%s5585_s5 + $0x1a8] sm:$0x1f] }
  0x8e   : > { %4427 = vmatmul.mubr.bf16.gmra.mrb[32].mxu0 %v330_v31  ;;  %4494 = vmatprep.subr.bf16.mxu1 %v7496_v0  ;;  %v675_v31 = vpack.c.bf16 %v510_v24, %v509_v23  ;;  %v282_v24 = vld [vmem:[%s5585_s5 + $0x1c0] sm:$0xff]  ;;  %v342_v37 = vpack.c.bf16 %v279_v30, %v278_v29  ;;  %v574_v30 = vld [vmem:[%s5539_s28 + $0x6a8] sm:$0xff] }
  0x8f   : > { %4467 = vmatpush3.bf16.msra.mxu0 %v653_v32  ;;  %4474 = vmatprep.mubr.msk.bf16.mxu0 %vm5453_vm0, %v7496_v0  ;;  %v511_v32 = vld [vmem:[%s5539_s28 + $0x4b0] sm:$0xff]  ;;  %v573_v29 = vld [vmem:[%s5539_s28 + $0x6a0] sm:$0xff] }
  0x90   : > { %4468 = vmatprep.subr.bf16.mxu0 %v7496_v0  ;;  %4455 = vmatmul.mubr.bf16.gmra.mrb[32].mxu1 %v333_v41  ;;  %v676_v38 = vpack.c.bf16 %v512_v33, %v511_v32  ;;  %v513_v41 = vld [vmem:[%s5539_s28 + $0x4c0] sm:$0xff]  ;;  %v530_v33 = vld [vmem:[%s5539_s28 + $0x548] sm:$0xff] }
  0x91   : > { %4495 = vmatpush3.bf16.msra.mxu1 %v661_v44  ;;  %4502 = vmatprep.mubr.msk.bf16.mxu1 %vm5453_vm0, %v7496_v0  ;;  %v529_v32 = vld [vmem:[%s5539_s28 + $0x540] sm:$0xff] }
  0x92   : > { %4496 = vmatprep.subr.bf16.mxu1 %v7496_v0 }
  0x93   : > { %4469 = vmatpush3.bf16.msra.mxu0 %v654_v40  ;;  %v273_v40 = vld [vmem:[%s5585_s5 + $0x178] sm:$0x1f] }
  0x94   : > { %4470 = vmatprep.subr.bf16.mxu0 %v7496_v0  ;;  %v339_v44 = vpack.c.bf16 %v273_v40, %v272_v39  ;;  %v531_v39 = vld [vmem:[%s5539_s28 + $0x550] sm:$0xff]  ;;  %v532_v40 = vld [vmem:[%s5539_s28 + $0x558] sm:$0xff] }
  0x95   : > { %4497 = vmatpush3.bf16.msra.mxu1 %v662_v50  ;;  %v671_v50 = vpack.c.bf16 %v502_v46, %v501_v45  ;;  %v546_v45 = vld [vmem:[%s5539_s28 + $0x5c8] sm:$0xff]  ;;  %v686_v46 = vpack.c.bf16 %v532_v40, %v531_v39  ;;  %v576_v39 = vld [vmem:[%s5539_s28 + $0x6b8] sm:$0xff] }
  0x96   : > { %4498 = vmatprep.subr.bf16.mxu1 %v7496_v0 }
  0x97   : > { %4471 = vmatpush3.bf16.msra.mxu0 %v655_v47  ;;  %v677_v47 = vpack.c.bf16 %v514_v42, %v513_v41  ;;  %v284_v42 = vld [vmem:[%s5585_s5 + $0x1d0] sm:$0xff] }
  0x98   : > { %4472 = vmatprep.subr.bf16.mxu0 %v7496_v0 }
  0x99   : > { %4499 = vmatpush3.bf16.msra.mxu1 %v663_v58  ;;  %v275_v58 = vld [vmem:[%s5585_s5 + $0x188] sm:$0xff] }
  0x9a   : > { %4500 = vmatprep.subr.bf16.mxu1 %v7496_v0  ;;  %v340_v1 = vpack.c.bf16 %v275_v58, %v274_v57  ;;  %v549_v57 = vld [vmem:[%s5539_s28 + $0x5e0] sm:$0xff]  ;;  %v550_v58 = vld [vmem:[%s5539_s28 + $0x5e8] sm:$0xff] }
  0x9b   : > { %4473 = vmatpush3.bf16.msra.mxu0 %v656_v53  ;;  %v678_v53 = vpack.c.bf16 %v516_v49, %v515_v48  ;;  %v533_v48 = vld [vmem:[%s5539_s28 + $0x560] sm:$0xff]  ;;  %v534_v49 = vld [vmem:[%s5539_s28 + $0x568] sm:$0xff] }
  0x9c   : > { %4514 = vmatprep.subr.bf16.mxu0 %v7496_v0 }
  0x9d   : > { %4501 = vmatpush3.bf16.msra.mxu1 %v664_v2  ;;  %v681_v2 = vpack.c.bf16 %v522_v60, %v521_v59  ;;  %v286_v60 = vld [vmem:[%s5585_s5 + $0x1e0] sm:$0xff] }
  0x9e   : > { %4475 = vmatmul.mubr.bf16.vlgmr.msra.gmra.mrb[36].mxu0 %v334_v61  ;;  %4542 = vmatprep.subr.bf16.mxu1 %v7496_v0  ;;  %v679_v61 = vpack.c.bf16 %v518_v55, %v517_v54  ;;  %v535_v54 = vld [vmem:[%s5539_s28 + $0x570] sm:$0xff]  ;;  %v536_v55 = vld [vmem:[%s5539_s28 + $0x578] sm:$0xff] }
  0x9f   : > { %4515 = vmatpush3.bf16.msra.mxu0 %v665_v62  ;;  %4478 = vmatprep.mubr.msk.bf16.mxu0 %vm5453_vm0, %v7496_v0  ;;  %v519_v62 = vld [vmem:[%s5539_s28 + $0x4f0] sm:$0xff]  ;;  %v688_v59 = vpack.c.bf16 %v536_v55, %v535_v54  ;;  %v580_v55 = vld [vmem:[%s5539_s28 + $0x6d8] sm:$0xff] }
  0xa0   : > { %4516 = vmatprep.subr.bf16.mxu0 %v7496_v0  ;;  %4503 = vmatmul.mubr.bf16.vlgmr.msra.gmra.mrb[36].mxu1 %v337_v10  ;;  %v680_v5 = vpack.c.bf16 %v520_v63, %v519_v62  ;;  %v682_v10 = vpack.c.bf16 %v524_v4, %v523_v3  ;;  %v553_v62 = vld [vmem:[%s5539_s28 + $0x600] sm:$0xff]  ;;  %v554_v63 = vld [vmem:[%s5539_s28 + $0x608] sm:$0xff]  ;;  %v552_v3 = vld [vmem:[%s5539_s28 + $0x5f8] sm:$0xff] }
  0xa1   : > { %4543 = vmatpush3.bf16.msra.mxu1 %v673_v13  ;;  %4506 = vmatprep.mubr.msk.bf16.mxu1 %vm5453_vm0, %v7496_v0  ;;  %v579_v54 = vld [vmem:[%s5539_s28 + $0x6d0] sm:$0xff] }
  0xa2   : > { %4544 = vmatprep.subr.bf16.mxu1 %v7496_v0 }
  0xa3   : > { %4517 = vmatpush3.bf16.msra.mxu0 %v666_v7  ;;  %v281_v7 = vld [vmem:[%s5585_s5 + $0x1b8] sm:$0xff] }
  0xa4   : > { %4518 = vmatprep.subr.bf16.mxu0 %v7496_v0  ;;  %v343_v13 = vpack.c.bf16 %v281_v7, %v280_v6  ;;  %v555_v6 = vld [vmem:[%s5539_s28 + $0x610] sm:$0xff]  ;;  %v556_v7 = vld [vmem:[%s5539_s28 + $0x618] sm:$0xff] }
  0xa5   : > { %4545 = vmatpush3.bf16.msra.mxu1 %v674_v20  ;;  %v683_v20 = vpack.c.bf16 %v526_v15, %v525_v14  ;;  %v288_v14 = vld [vmem:[%s5585_s5 + $0x1f0] sm:$0xff]  ;;  %v289_v15 = vld [vmem:[%s5585_s5 + $0x1f8] sm:$0xff] }
  0xa6   : > { %4479 = vmatmul.mubr.bf16.gmra.mrb[40].mxu0 %v335_v16  ;;  %4546 = vmatprep.subr.bf16.mxu1 %v7496_v0  ;;  %v689_v16 = vpack.c.bf16 %v538_v9, %v537_v8  ;;  %v292_v9 = vld [vmem:[%s5585_s5 + $0x210] sm:$0xff] }
  0xa7   : > { %4519 = vmatpush3.bf16.msra.mxu0 %v667_v17  ;;  %4482 = vmatprep.mubr.msk.bf16.mxu0 %vm5453_vm0, %v7496_v0  ;;  %v539_v17 = vld [vmem:[%s5539_s28 + $0x590] sm:$0xff] }
  0xa8   : > { %4520 = vmatprep.subr.bf16.mxu0 %v7496_v0  ;;  %4507 = vmatmul.mubr.bf16.gmra.mrb[40].mxu1 %v338_v28  ;;  %v690_v23 = vpack.c.bf16 %v540_v18, %v539_v17  ;;  %v684_v28 = vpack.c.bf16 %v528_v22, %v527_v21  ;;  %v557_v17 = vld [vmem:[%s5539_s28 + $0x620] sm:$0xff]  ;;  %v558_v18 = vld [vmem:[%s5539_s28 + $0x628] sm:$0xff]  ;;  %v572_v21 = vld [vmem:[%s5539_s28 + $0x698] sm:$0xff]  ;;  %v347_v22 = vpack.c.bf16 %v289_v15, %v288_v14 }
  0xa9   : > { %4547 = vmatpush3.bf16.msra.mxu1 %v675_v31  ;;  %4510 = vmatprep.mubr.msk.bf16.mxu1 %vm5453_vm0, %v7496_v0  ;;  %v300_v15 = vld [vmem:[%s5585_s5 + $0x250] sm:$0xff] }
  0xaa   : > { %4548 = vmatprep.subr.bf16.mxu1 %v7496_v0 }
  0xab   : > { %4521 = vmatpush3.bf16.msra.mxu0 %v668_v25  ;;  %v283_v25 = vld [vmem:[%s5585_s5 + $0x1c8] sm:$0xff] }
  0xac   : > { %4522 = vmatprep.subr.bf16.mxu0 %v7496_v0  ;;  %v344_v31 = vpack.c.bf16 %v283_v25, %v282_v24  ;;  %v559_v24 = vld [vmem:[%s5539_s28 + $0x630] sm:$0xff]  ;;  %v560_v25 = vld [vmem:[%s5539_s28 + $0x638] sm:$0xff] }
  0xad   : > { %4549 = vmatpush3.bf16.msra.mxu1 %v676_v38  ;;  %v685_v38 = vpack.c.bf16 %v530_v33, %v529_v32  ;;  %v290_v32 = vld [vmem:[%s5585_s5 + $0x200] sm:$0xff]  ;;  %v291_v33 = vld [vmem:[%s5585_s5 + $0x208] sm:$0x1f] }
  0xae   : > { %4483 = vmatmul.mubr.bf16.gmra.mrb[44].mxu0 %v336_v34  ;;  %4550 = vmatprep.subr.bf16.mxu1 %v7496_v0  ;;  %v691_v34 = vpack.c.bf16 %v542_v27, %v541_v26  ;;  %v294_v27 = vld [vmem:[%s5585_s5 + $0x220] sm:$0xff]  ;;  %v348_v40 = vpack.c.bf16 %v291_v33, %v290_v32 }
  0xaf   : > { %4523 = vmatpush3.bf16.msra.mxu0 %v669_v35  ;;  %4530 = vmatprep.mubr.msk.bf16.mxu0 %vm5453_vm0, %v7496_v0  ;;  %v543_v35 = vld [vmem:[%s5539_s28 + $0x5b0] sm:$0xff] }
  0xb0   : > { %4524 = vmatprep.subr.bf16.mxu0 %v7496_v0  ;;  %4511 = vmatmul.mubr.bf16.gmra.mrb[44].mxu1 %v339_v44  ;;  %v692_v41 = vpack.c.bf16 %v544_v36, %v543_v35  ;;  %v545_v44 = vld [vmem:[%s5539_s28 + $0x5c0] sm:$0xff]  ;;  %v562_v36 = vld [vmem:[%s5539_s28 + $0x648] sm:$0xff] }
  0xb1   : > { %4551 = vmatpush3.bf16.msra.mxu1 %v677_v47  ;;  %4558 = vmatprep.mubr.msk.bf16.mxu1 %vm5453_vm0, %v7496_v0  ;;  %v561_v35 = vld [vmem:[%s5539_s28 + $0x640] sm:$0xff] }
  0xb2   : > { %4552 = vmatprep.subr.bf16.mxu1 %v7496_v0 }
  0xb3   : > { %4525 = vmatpush3.bf16.msra.mxu0 %v670_v43  ;;  %v285_v43 = vld [vmem:[%s5585_s5 + $0x1d8] sm:$0x1f] }
  0xb4   : > { %4526 = vmatprep.subr.bf16.mxu0 %v7496_v0  ;;  %v345_v47 = vpack.c.bf16 %v285_v43, %v284_v42  ;;  %v563_v42 = vld [vmem:[%s5539_s28 + $0x650] sm:$0xff]  ;;  %v564_v43 = vld [vmem:[%s5539_s28 + $0x658] sm:$0xff] }
  0xb5   : > { %4553 = vmatpush3.bf16.msra.mxu1 %v678_v53  ;;  %v687_v53 = vpack.c.bf16 %v534_v49, %v533_v48  ;;  %v578_v48 = vld [vmem:[%s5539_s28 + $0x6c8] sm:$0xff]  ;;  %v702_v49 = vpack.c.bf16 %v564_v43, %v563_v42 }
  0xb6   : > { %4554 = vmatprep.subr.bf16.mxu1 %v7496_v0 }
  0xb7   : > { %4527 = vmatpush3.bf16.msra.mxu0 %v671_v50  ;;  %v693_v50 = vpack.c.bf16 %v546_v45, %v545_v44  ;;  %v296_v45 = vld [vmem:[%s5585_s5 + $0x230] sm:$0xff] }
  0xb8   : > { %4528 = vmatprep.subr.bf16.mxu0 %v7496_v0 }
  0xb9   : > { %4555 = vmatpush3.bf16.msra.mxu1 %v679_v61  ;;  %v287_v61 = vld [vmem:[%s5585_s5 + $0x1e8] sm:$0xff] }
  0xba   : > { %4556 = vmatprep.subr.bf16.mxu1 %v7496_v0  ;;  %v346_v4 = vpack.c.bf16 %v287_v61, %v286_v60  ;;  %v581_v60 = vld [vmem:[%s5539_s28 + $0x6e0] sm:$0xff]  ;;  %v582_v61 = vld [vmem:[%s5539_s28 + $0x6e8] sm:$0xff] }
  0xbb   : > { %4529 = vmatpush3.bf16.msra.mxu0 %v672_v56  ;;  %v694_v56 = vpack.c.bf16 %v548_v52, %v547_v51  ;;  %v565_v51 = vld [vmem:[%s5539_s28 + $0x660] sm:$0xff]  ;;  %v566_v52 = vld [vmem:[%s5539_s28 + $0x668] sm:$0xff] }
  0xbc   : > { %4570 = vmatprep.subr.bf16.mxu0 %v7496_v0 }
  0xbd   : > { %4557 = vmatpush3.bf16.msra.mxu1 %v680_v5  ;;  %v697_v5 = vpack.c.bf16 %v554_v63, %v553_v62  ;;  %v298_v63 = vld [vmem:[%s5585_s5 + $0x240] sm:$0xff] }
  0xbe   : > { %4531 = vmatmul.mubr.bf16.vlgmr.msra.gmra.mrb[48].mxu0 %v340_v1  ;;  %4598 = vmatprep.subr.bf16.mxu1 %v7496_v0  ;;  %v695_v1 = vpack.c.bf16 %v550_v58, %v549_v57  ;;  %v567_v57 = vld [vmem:[%s5539_s28 + $0x670] sm:$0xff]  ;;  %v568_v58 = vld [vmem:[%s5539_s28 + $0x678] sm:$0xff] }
  0xbf   : > { %4571 = vmatpush3.bf16.msra.mxu0 %v681_v2  ;;  %4534 = vmatprep.mubr.msk.bf16.mxu0 %vm5453_vm0, %v7496_v0  ;;  %v551_v2 = vld [vmem:[%s5539_s28 + $0x5f0] sm:$0xff]  ;;  %v704_v62 = vpack.c.bf16 %v568_v58, %v567_v57 }
  0xc0   : > { %4572 = vmatprep.subr.bf16.mxu0 %v7496_v0  ;;  %4559 = vmatmul.mubr.bf16.vlgmr.msra.gmra.mrb[48].mxu1 %v343_v13  ;;  %v696_v8 = vpack.c.bf16 %v552_v3, %v551_v2  ;;  %v698_v13 = vpack.c.bf16 %v556_v7, %v555_v6  ;;  %v585_v2 = vld [vmem:[%s5539_s28 + $0x700] sm:$0xff]  ;;  %v586_v3 = vld [vmem:[%s5539_s28 + $0x708] sm:$0xff]  ;;  %v584_v6 = vld [vmem:[%s5539_s28 + $0x6f8] sm:$0xff] }
  0xc1   : > { %4599 = vmatpush3.bf16.msra.mxu1 %v689_v16  ;;  %4562 = vmatprep.mubr.msk.bf16.mxu1 %vm5453_vm0, %v7496_v0 }
  0xc2   : > { %4600 = vmatprep.subr.bf16.mxu1 %v7496_v0 }
  0xc3   : > { %4573 = vmatpush3.bf16.msra.mxu0 %v682_v10  ;;  %v293_v10 = vld [vmem:[%s5585_s5 + $0x218] sm:$0xff] }
  0xc4   : > { %4574 = vmatprep.subr.bf16.mxu0 %v7496_v0  ;;  %v349_v16 = vpack.c.bf16 %v293_v10, %v292_v9  ;;  %v587_v9 = vld [vmem:[%s5539_s28 + $0x710] sm:$0xff]  ;;  %v588_v10 = vld [vmem:[%s5539_s28 + $0x718] sm:$0xff] }
  0xc5   : > { %4601 = vmatpush3.bf16.msra.mxu1 %v690_v23  ;;  %v699_v23 = vpack.c.bf16 %v558_v18, %v557_v17  ;;  %v714_v14 = vpack.c.bf16 %v588_v10, %v587_v9  ;;  %v589_v18 = vld [vmem:[%s5539_s28 + $0x720] sm:$0xff] }
  0xc6   : > { %4535 = vmatmul.mubr.bf16.gmra.mrb[52].mxu0 %v341_v19  ;;  %4602 = vmatprep.subr.bf16.mxu1 %v7496_v0  ;;  %v705_v19 = vpack.c.bf16 %v570_v12, %v569_v11  ;;  %v304_v12 = vld [vmem:[%s5585_s5 + $0x270] sm:$0xff] }
  0xc7   : > { %4575 = vmatpush3.bf16.msra.mxu0 %v683_v20  ;;  %4538 = vmatprep.mubr.msk.bf16.mxu0 %vm5453_vm0, %v7496_v0  ;;  %v571_v20 = vld [vmem:[%s5539_s28 + $0x690] sm:$0xff] }
  0xc8   : > { %4576 = vmatprep.subr.bf16.mxu0 %v7496_v0  ;;  %4563 = vmatmul.mubr.bf16.gmra.mrb[52].mxu1 %v344_v31  ;;  %v706_v26 = vpack.c.bf16 %v572_v21, %v571_v20  ;;  %v700_v31 = vpack.c.bf16 %v560_v25, %v559_v24  ;;  %v306_v24 = vld [vmem:[%s5585_s5 + $0x280] sm:$0xff]  ;;  %v307_v25 = vld [vmem:[%s5585_s5 + $0x288] sm:$0xff] }
  0xc9   : > { %4603 = vmatpush3.bf16.msra.mxu1 %v691_v34  ;;  %4566 = vmatprep.mubr.msk.bf16.mxu1 %vm5453_vm0, %v7496_v0 }
  0xca   : > { %4604 = vmatprep.subr.bf16.mxu1 %v7496_v0 }
  0xcb   : > { %4577 = vmatpush3.bf16.msra.mxu0 %v684_v28  ;;  %v295_v28 = vld [vmem:[%s5585_s5 + $0x228] sm:$0xff] }
  0xcc   : > { %4578 = vmatprep.subr.bf16.mxu0 %v7496_v0  ;;  %v350_v34 = vpack.c.bf16 %v295_v28, %v294_v27  ;;  %v302_v27 = vld [vmem:[%s5585_s5 + $0x260] sm:$0xff]  ;;  %v303_v28 = vld [vmem:[%s5585_s5 + $0x268] sm:$0x1f] }
  0xcd   : > { %4605 = vmatpush3.bf16.msra.mxu1 %v692_v41  ;;  %v701_v41 = vpack.c.bf16 %v562_v36, %v561_v35  ;;  %v354_v32 = vpack.c.bf16 %v303_v28, %v302_v27  ;;  %v596_v35 = vld [vmem:[%s5539_s28 + $0x758] sm:$0xff]  ;;  %v308_v36 = vld [vmem:[%s5585_s5 + $0x290] sm:$0xff] }
  0xce   : > { %4539 = vmatmul.mubr.bf16.gmra.mrb[56].mxu0 %v342_v37  ;;  %4606 = vmatprep.subr.bf16.mxu1 %v7496_v0  ;;  %v707_v37 = vpack.c.bf16 %v574_v30, %v573_v29  ;;  %v356_v29 = vpack.c.bf16 %v307_v25, %v306_v24  ;;  %v593_v30 = vld [vmem:[%s5539_s28 + $0x740] sm:$0xff]  ;;  %v723_v27 = vld [vmem:[%s6130_s8 + $0x10] sm:$0xff]  ;;  %v724_v28 = vld [vmem:[%s6130_s8 + $0x18] sm:$0xff] }
  0xcf   : > { %4579 = vmatpush3.bf16.msra.mxu0 %v685_v38  ;;  %4586 = vmatprep.mubr.msk.bf16.mxu0 %vm5453_vm0, %v7496_v0  ;;  %v575_v38 = vld [vmem:[%s5539_s28 + $0x6b0] sm:$0xff] }
  0xd0   : > { %4580 = vmatprep.subr.bf16.mxu0 %v7496_v0  ;;  %4567 = vmatmul.mubr.bf16.gmra.mrb[56].mxu1 %v345_v47  ;;  %v708_v44 = vpack.c.bf16 %v576_v39, %v575_v38  ;;  %v577_v47 = vld [vmem:[%s5539_s28 + $0x6c0] sm:$0xff] }
  0xd1   : > { %4607 = vmatpush3.bf16.msra.mxu1 %v693_v50  ;;  %4614 = vmatprep.mubr.msk.bf16.mxu1 %vm5453_vm0, %v7496_v0  ;;  %v597_v39 = vld [vmem:[%s5539_s28 + $0x760] sm:$0xff] }
  0xd2   : > { %4608 = vmatprep.subr.bf16.mxu1 %v7496_v0 }
  0xd3   : > { %4581 = vmatpush3.bf16.msra.mxu0 %v686_v46  ;;  %v297_v46 = vld [vmem:[%s5585_s5 + $0x238] sm:$0x1f] }
  0xd4   : > { %4582 = vmatprep.subr.bf16.mxu0 %v7496_v0  ;;  %v351_v50 = vpack.c.bf16 %v297_v46, %v296_v45 }
  0xd5   : > { %4609 = vmatpush3.bf16.msra.mxu1 %v694_v56  ;;  %v703_v56 = vpack.c.bf16 %v566_v52, %v565_v51 }
  0xd6   : > { %4610 = vmatprep.subr.bf16.mxu1 %v7496_v0 }
  0xd7   : > { %4583 = vmatpush3.bf16.msra.mxu0 %v687_v53  ;;  %v709_v53 = vpack.c.bf16 %v578_v48, %v577_v47  ;;  %v599_v48 = vld [vmem:[%s5539_s28 + $0x770] sm:$0xff] }
  0xd8   : > { %4584 = vmatprep.subr.bf16.mxu0 %v7496_v0 }
  0xd9   : > { %4611 = vmatpush3.bf16.msra.mxu1 %v695_v1  ;;  %v299_v1 = vld [vmem:[%s5585_s5 + $0x248] sm:$0xff] }
  0xda   : > { %4612 = vmatprep.subr.bf16.mxu1 %v7496_v0  ;;  %v352_v7 = vpack.c.bf16 %v299_v1, %v298_v63 }
  0xdb   : > { %4585 = vmatpush3.bf16.msra.mxu0 %v688_v59  ;;  %v710_v59 = vpack.c.bf16 %v580_v55, %v579_v54  ;;  %v311_v54 = vld [vmem:[%s5585_s5 + $0x2a8] sm:$0xff] }
  0xdc   : > { %4626 = vmatprep.subr.bf16.mxu0 %v7496_v0 }
  0xdd   : > { %4613 = vmatpush3.bf16.msra.mxu1 %v696_v8  ;;  %v713_v8 = vpack.c.bf16 %v586_v3, %v585_v2  ;;  %v312_v3 = vld [vmem:[%s5585_s5 + $0x2b0] sm:$0xff] }
  0xde   : > { %4587 = vmatmul.mubr.bf16.vlgmr.msra.gmra.mrb[60].mxu0 %v346_v4  ;;  %4654 = vmatprep.subr.bf16.mxu1 %v7496_v0  ;;  %v711_v4 = vpack.c.bf16 %v582_v61, %v581_v60 }
  0xdf   : > { %4627 = vmatpush3.bf16.msra.mxu0 %v697_v5  ;;  %4590 = vmatprep.mubr.msk.bf16.mxu0 %vm5453_vm0, %v7496_v0  ;;  %v583_v5 = vld [vmem:[%s5539_s28 + $0x6f0] sm:$0xff] }
  0xe0   : > { %4628 = vmatprep.subr.bf16.mxu0 %v7496_v0  ;;  %4615 = vmatmul.mubr.bf16.vlgmr.msra.gmra.mrb[60].mxu1 %v349_v16  ;;  %v712_v11 = vpack.c.bf16 %v584_v6, %v583_v5  ;;  %v301_v16 = vld [vmem:[%s5585_s5 + $0x258] sm:$0xff] }
  0xe1   : > { %4655 = vmatpush3.bf16.msra.mxu1 %v705_v19  ;;  %4618 = vmatprep.mubr.msk.bf16.mxu1 %vm5453_vm0, %v7496_v0  ;;  %v590_v19 = vld [vmem:[%s5539_s28 + $0x728] sm:$0xff]  ;;  %v353_v20 = vpack.c.bf16 %v301_v16, %v300_v15 }
  0xe2   : > { %4656 = vmatprep.subr.bf16.mxu1 %v7496_v0  ;;  %v715_v21 = vpack.c.bf16 %v590_v19, %v589_v18  ;;  %v314_v18 = vld [vmem:[%s5585_s5 + $0x2c0] sm:$0xff]  ;;  %v315_v19 = vld [vmem:[%s5585_s5 + $0x2c8] sm:$0x1f] }
  0xe3   : > { %4629 = vmatpush3.bf16.msra.mxu0 %v698_v13  ;;  %v305_v13 = vld [vmem:[%s5585_s5 + $0x278] sm:$0xff] }
  0xe4   : > { %4630 = vmatprep.subr.bf16.mxu0 %v7496_v0  ;;  %v355_v17 = vpack.c.bf16 %v305_v13, %v304_v12 }
  0xe5   : > { %4657 = vmatpush3.bf16.msra.mxu1 %v706_v26 }
  0xe6   : > { %4591 = vmatmul.mubr.bf16.gmra.mrb[64].mxu0 %v347_v22  ;;  %4658 = vmatprep.subr.bf16.mxu1 %v7496_v0  ;;  %v591_v22 = vld [vmem:[%s5539_s28 + $0x730] sm:$0xff] }
  0xe7   : > { %4631 = vmatpush3.bf16.msra.mxu0 %v699_v23  ;;  %4594 = vmatprep.mubr.msk.bf16.mxu0 %vm5453_vm0, %v7496_v0  ;;  %v592_v23 = vld [vmem:[%s5539_s28 + $0x738] sm:$0xff] }
  0xe8   : > { %4632 = vmatprep.subr.bf16.mxu0 %v7496_v0  ;;  %4619 = vmatmul.mubr.bf16.gmra.mrb[64].mxu1 %v350_v34  ;;  %v716_v26 = vpack.c.bf16 %v592_v23, %v591_v22  ;;  %v595_v34 = vld [vmem:[%s5539_s28 + $0x750] sm:$0xff]  ;;  %v721_v22 = vld [vmem:[%s6130_s8] sm:$0xff]  ;;  %v722_v23 = vld [vmem:[%s6130_s8 + $0x8] sm:$0xff] }
  0xe9   : > { %4659 = vmatpush3.bf16.msra.mxu1 %v707_v37  ;;  %4622 = vmatprep.mubr.msk.bf16.mxu1 %vm5453_vm0, %v7496_v0  ;;  %v309_v37 = vld [vmem:[%s5585_s5 + $0x298] sm:$0x1f]  ;;  %v718_v38 = vpack.c.bf16 %v596_v35, %v595_v34  ;;  %v811_v25 = vpack.c.bf16 %v722_v23, %v721_v22 }
  0xea   : > { %4660 = vmatprep.subr.bf16.mxu1 %v7496_v0 }
  0xeb   : > { %4633 = vmatpush3.bf16.msra.mxu0 %v700_v31  ;;  %v594_v31 = vld [vmem:[%s5539_s28 + $0x748] sm:$0xff] }
  0xec   : > { %4634 = vmatprep.subr.bf16.mxu0 %v7496_v0  ;;  %v717_v33 = vpack.c.bf16 %v594_v31, %v593_v30  ;;  %v725_v30 = vld [vmem:[%s6130_s8 + $0x20] sm:$0xff]  ;;  %v726_v31 = vld [vmem:[%s6130_s8 + $0x28] sm:$0x1f] }
  0xed   : > { %4661 = vmatpush3.bf16.msra.mxu1 %v708_v44 }
  0xee   : > { %4595 = vmatmul.mubr.bf16.gmra.mrb[68].mxu0 %v348_v40  ;;  %4662 = vmatprep.subr.bf16.mxu1 %v7496_v0  ;;  %v598_v40 = vld [vmem:[%s5539_s28 + $0x768] sm:$0xff] }
  0xef   : > { %4635 = vmatpush3.bf16.msra.mxu0 %v701_v41  ;;  %4642 = vmatprep.mubr.msk.bf16.mxu0 %vm5453_vm0, %v7496_v0  ;;  %v357_v41 = vpack.c.bf16 %v309_v37, %v308_v36  ;;  %v719_v46 = vpack.c.bf16 %v598_v40, %v597_v39 }
  0xf0   : > { %4636 = vmatprep.subr.bf16.mxu0 %v7496_v0  ;;  %4623 = vmatmul.mubr.bf16.gmra.mrb[68].mxu1 %v351_v50 }
  0xf1   : > { %4663 = vmatpush3.bf16.msra.mxu1 %v709_v53  ;;  %4670 = vmatprep.mubr.msk.bf16.mxu1 %vm5453_vm0, %v7496_v0  ;;  %v310_v53 = vld [vmem:[%s5585_s5 + $0x2a0] sm:$0xff] }
  0xf2   : > { %4664 = vmatprep.subr.bf16.mxu1 %v7496_v0  ;;  %v358_v61 = vpack.c.bf16 %v311_v54, %v310_v53 }
  0xf3   : > { %4637 = vmatpush3.bf16.msra.mxu0 %v702_v49  ;;  %v600_v49 = vld [vmem:[%s5539_s28 + $0x778] sm:$0xff]  ;;  %s5392_s28 = sshll.u32 %s5455_s27, 4  ;;  %s5393_s28 = int_to_ptr.vmem [resolvable:$false] %s5392_s28 }
  0xf4   : > { %4638 = vmatprep.subr.bf16.mxu0 %v7496_v0  ;;  %v720_v52 = vpack.c.bf16 %v600_v49, %v599_v48  ;;  %s5394_s29 = scalar_lea.vmem %s5393_s28, 23040  ;;  %p5395_p0 = scmp.lt.s32.totalorder %s7445_s19, %s5393_s28 }
  0xf5   : > { %4665 = vmatpush3.bf16.msra.mxu1 %v710_v59  ;;  %p5396_p1 = scmp.lt.s32.totalorder %s5394_s29, %s5388_s26 }
  0xf6   : > { %4666 = vmatprep.subr.bf16.mxu1 %v7496_v0 }
  0xf7   : > { %4639 = vmatpush3.bf16.msra.mxu0 %v703_v56  ;;  %p5397_p2 = por %p5396_p1, %p5395_p0 }
  0xf8   : > { %4640 = vmatprep.subr.bf16.mxu0 %v7496_v0 }
  0xf9   : > { %4667 = vmatpush3.bf16.msra.mxu1 %v711_v4  ;;  %v313_v4 = vld [vmem:[%s5585_s5 + $0x2b8] sm:$0xff]  ;;  %p5398_p3 = pnand %p5397_p2, %p5391_p13 }
  0xfa   : > { %4668 = vmatprep.subr.bf16.mxu1 %v7496_v0 }
  0xfb   : > { %4641 = vmatpush3.bf16.msra.mxu0 %v704_v62 }
  0xfc   : > { %4682 = vmatprep.subr.bf16.mxu0 %v7496_v0 }
  0xfd   : > { %4669 = vmatpush3.bf16.msra.mxu1 %v712_v11  ;;  %v359_v11 = vpack.c.bf16 %v313_v4, %v312_v3 }
  0xfe   : > { %4643 = vmatmul.mubr.bf16.vlgmr.msra.gmra.mrb[72].mxu0 %v352_v7  ;;  %4710 = vmatprep.subr.bf16.mxu1 %v7496_v0 }
  0xff   : > { %4683 = vmatpush3.bf16.msra.mxu0 %v713_v8  ;;  %4646 = vmatprep.mubr.msk.bf16.mxu0 %vm5453_vm0, %v7496_v0 }
 0x100   : > { %4684 = vmatprep.subr.bf16.mxu0 %v7496_v0  ;;  %4671 = vmatmul.mubr.bf16.vlgmr.msra.gmra.mrb[72].mxu1 %v355_v17 }
 0x101   : > { %4674 = vmatprep.mubr.msk.bf16.mxu1 %vm5453_vm0, %v7496_v0  ;;  %4711 = vmatpush3.bf16.msra.mxu1 %v811_v25  ;;  %v735_v25 = vld [vmem:[%s6130_s8 + $0x70] sm:$0xff] }
 0x102   : > { %4712 = vmatprep.subr.bf16.mxu1 %v7496_v0 }
 0x103   : > { %4685 = vmatpush3.bf16.msra.mxu0 %v714_v14 }
 0x104   : > { %4686 = vmatprep.subr.bf16.mxu0 %v7496_v0 }
 0x106   : > { %4647 = vmatmul.mubr.bf16.gmra.mrb[76].mxu0 %v353_v20 }
 0x107   : > { %4687 = vmatpush3.bf16.msra.mxu0 %v715_v21  ;;  %4650 = vmatprep.mubr.msk.bf16.mxu0 %vm5453_vm0, %v7496_v0 }
 0x108   : > { %4688 = vmatprep.subr.bf16.mxu0 %v7496_v0  ;;  %4675 = vmatmul.mubr.bf16.gmra.mrb[76].mxu1 %v356_v29  ;;  %v812_v29 = vpack.c.bf16 %v724_v28, %v723_v27  ;;  %v737_v28 = vld [vmem:[%s6130_s8 + $0x80] sm:$0xff] }
 0x109   : > { %4678 = vmatprep.mubr.msk.bf16.mxu1 %vm5453_vm0, %v7496_v0 }
 0x10a   : > { %4713 = vmatpush3.bf16.msra.mxu1 %v812_v29  ;;  %v738_v29 = vld [vmem:[%s6130_s8 + $0x88] sm:$0x1f] }
 0x10b   : > { %4689 = vmatpush3.bf16.msra.mxu0 %v716_v26  ;;  %v360_v26 = vpack.c.bf16 %v315_v19, %v314_v18  ;;  %4714 = vmatprep.subr.bf16.mxu1 %v7496_v0  ;;  %v733_v18 = vld [vmem:[%s6130_s8 + $0x60] sm:$0xff]  ;;  %v734_v19 = vld [vmem:[%s6130_s8 + $0x68] sm:$0xff] }
 0x10c   : > { %4690 = vmatprep.subr.bf16.mxu0 %v7496_v0  ;;  %v817_v22 = vpack.c.bf16 %v734_v19, %v733_v18 }
 0x10e   : > { %4651 = vmatmul.mubr.bf16.gmra.mrb[80].mxu0 %v354_v32  ;;  %v813_v32 = vpack.c.bf16 %v726_v31, %v725_v30  ;;  %v819_v30 = vpack.c.bf16 %v738_v29, %v737_v28 }
 0x10f   : > { %4691 = vmatpush3.bf16.msra.mxu0 %v717_v33  ;;  %4698 = vmatprep.mubr.msk.bf16.mxu0 %vm5453_vm0, %v7496_v0  ;;  %v5454_v33 = vmov 65535  }
 0x110   : > { %4692 = vmatprep.subr.bf16.mxu0 %v7496_v0  ;;  %4679 = vmatmul.mubr.bf16.gmra.mrb[80].mxu1 %v357_v41  ;;  %v2579_v34 = vsel %vm2577_vm3, 4294967295, %v5454_v33 }
 0x111   : > { %v6070_v42 = vpop.f32.mrb[0].mxu0  ;;  %4716 = vmatprep.mubr.msk.bf16.mxu1 %vm5453_vm0, %v7496_v0  ;;  %v6144_v35 = vsel %vm2578_vm4, %v2579_v34, 0 }
 0x112   : > { %v4308_v43 = vpop.f32.mrb[1].mxu0  ;;  %v1712_v44 = vsel %vm1711_vm1, %v6070_v42, -inf  ;;  %v2582_v37 = vand.u32 %v6144_v35, %v813_v32  ;;  %v2720_v31 = vand.u32 %v6144_v35, %v819_v30 }
 0x113   : > { %4693 = vmatpush3.bf16.msra.mxu0 %v718_v38  ;;  %1713 = vmax.xlane.f32.xlu0 %v1712_v44  ;;  %v6074_v45 = vpop.f32.mrb[2].mxu0  ;;  %v6083_v51 = vpop.f32.mrb[0].mxu1 }
 0x114   : > { %v4309_v47 = vpop.f32.mrb[3].mxu0  ;;  %4694 = vmatprep.subr.bf16.mxu0 %v7496_v0  ;;  %v1715_v50 = vsel %vm1711_vm1, %v6074_v45, -inf  ;;  %v4336_v55 = vpop.f32.mrb[1].mxu1  ;;  %v1731_v14 = vsel %vm1711_vm1, %v6083_v51, -inf  ;;  %4715 = vmatpush3.bf16.msra.mxu1 %v2582_v37 }
 0x115   : > { %v6088_v56 = vpop.f32.mrb[2].mxu1  ;;  %4728 = vmatprep.subr.bf16.mxu1 %v7496_v0 }
 0x116   : > { %v4337_v58 = vpop.f32.mrb[3].mxu1  ;;  %v1734_v16 = vsel %vm1711_vm1, %v6088_v56, -inf }
 0x117   : > { %4695 = vmatpush3.bf16.msra.mxu0 %v719_v46  ;;  %1716 = vmax.xlane.f32.xlu0 %v1715_v50 }
 0x118   : > { %4696 = vmatprep.subr.bf16.mxu0 %v7496_v0 }
 0x119   : > { %v6090_v57 = vpop.f32.mrb[4].mxu0 }
 0x11a   : > { %v1718_v59 = vsel %vm1711_vm1, %v6090_v57, -inf  ;;  %v4312_v60 = vpop.f32.mrb[5].mxu0 }
 0x11b   : > { %4697 = vmatpush3.bf16.msra.mxu0 %v720_v52  ;;  %1719 = vmax.xlane.f32.xlu1 %v1718_v59  ;;  %v6094_v62 = vpop.f32.mrb[6].mxu0  ;;  %v6099_v2 = vpop.f32.mrb[4].mxu1 }
 0x11c   : > { %v1721_v63 = vsel %vm1711_vm1, %v6094_v62, -inf  ;;  %v4313_v1 = vpop.f32.mrb[7].mxu0  ;;  %4746 = vmatprep.subr.bf16.mxu0 %v7496_v0  ;;  %v4340_v5 = vpop.f32.mrb[5].mxu1  ;;  %v1737_v44 = vsel %vm1711_vm1, %v6099_v2, -inf }
 0x11d   : > { %v6105_v6 = vpop.f32.mrb[6].mxu1 }
 0x11e   : > { %4699 = vmatmul.mubr.bf16.vlgmr.msra.gmra.mrb[84].mxu0 %v358_v61  ;;  %v4341_v8 = vpop.f32.mrb[7].mxu1  ;;  %v1740_v46 = vsel %vm1711_vm1, %v6105_v6, -inf }
 0x11f   : > { %1722 = vmax.xlane.f32.xlu1 %v1721_v63  ;;  %4702 = vmatprep.mubr.msk.bf16.mxu0 %vm5453_vm0, %v7496_v0 }
 0x120   : > { %4747 = vmatpush3.bf16.msra.mxu0 %v817_v22 }
 0x121   : > { %v6107_v7 = vpop.f32.mrb[8].mxu0  ;;  %4748 = vmatprep.subr.bf16.mxu0 %v7496_v0 }
 0x122   : > { %v4316_v9 = vpop.f32.mrb[9].mxu0  ;;  %v1724_v10 = vsel %vm1711_vm1, %v6107_v7, -inf }
 0x123   : > { %1725 = vmax.xlane.f32.xlu0 %v1724_v10  ;;  %v6111_v12 = vpop.f32.mrb[10].mxu0  ;;  %v6119_v17 = vpop.f32.mrb[8].mxu1 }
 0x124   : > { %v1728_v13 = vsel %vm1727_vm2, %v6111_v12, -inf  ;;  %v4317_v15 = vpop.f32.mrb[11].mxu0  ;;  %v4344_v20 = vpop.f32.mrb[9].mxu1  ;;  %v1743_v59 = vsel %vm1711_vm1, %v6119_v17, -inf }
 0x125   : > { %1729 = vmax.xlane.f32.xlu1 %v1728_v13  ;;  %v6132_v21 = vpop.f32.mrb[10].mxu1 }
 0x126   : > { %4703 = vmatmul.mubr.bf16.gmra.mrb[88].mxu0 %v359_v11  ;;  %v4345_v24 = vpop.f32.mrb[11].mxu1  ;;  %v1746_v61 = vsel %vm1727_vm2, %v6132_v21, -inf }
 0x127   : > { %1732 = vmax.xlane.f32.xlu0 %v1731_v14  ;;  %4706 = vmatprep.mubr.msk.bf16.mxu0 %vm5453_vm0, %v7496_v0 }
 0x129   : > { %1735 = vmax.xlane.f32.xlu1 %v1734_v16 }
 0x12e   : > { %4707 = vmatmul.mubr.bf16.gmra.mrb[92].mxu0 %v360_v26  ;;  %v736_v26 = vld [vmem:[%s6130_s8 + $0x78] sm:$0xff] }
 0x12f   : > { %4752 = vmatprep.mubr.msk.bf16.mxu0 %vm5453_vm0, %v7496_v0  ;;  %v818_v27 = vpack.c.bf16 %v736_v26, %v735_v25 }
 0x131   : > { %v6146_v36 = vpop.f32.mrb[12].mxu0  ;;  %4749 = vmatpush3.bf16.msra.mxu0 %v818_v27 }
 0x132   : > { %v4364_v38 = vpop.f32.mrb[13].mxu0  ;;  %v1749_v39 = vsel %vm1711_vm1, %v6146_v36, -inf  ;;  %4750 = vmatprep.subr.bf16.mxu0 %v7496_v0 }
 0x133   : > { %1750 = vmax.xlane.f32.xlu0 %v1749_v39  ;;  %v6151_v40 = vpop.f32.mrb[14].mxu0  ;;  %v6160_v47 = vpop.f32.mrb[12].mxu1 }
 0x134   : > { %v4365_v41 = vpop.f32.mrb[15].mxu0  ;;  %v1752_v43 = vsel %vm1711_vm1, %v6151_v40, -inf  ;;  %v4392_v48 = vpop.f32.mrb[13].mxu1  ;;  %v1767_v13 = vsel %vm1711_vm1, %v6160_v47, -inf }
 0x135   : > { %1753 = vmax.xlane.f32.xlu1 %v1752_v43  ;;  %v6162_v49 = vpop.f32.mrb[14].mxu1  ;;  %4751 = vmatpush3.bf16.msra.mxu0 %v2720_v31 }
 0x136   : > { %v4393_v52 = vpop.f32.mrb[15].mxu1  ;;  %v1770_v15 = vsel %vm1711_vm1, %v6162_v49, -inf  ;;  %4782 = vmatprep.subr.bf16.mxu0 %v7496_v0 }
 0x137   : > { %1738 = vmax.xlane.f32.xlu0 %v1737_v44 }
 0x139   : > { %1741 = vmax.xlane.f32.xlu1 %v1740_v46  ;;  %v6164_v50 = vpop.f32.mrb[16].mxu0 }
 0x13a   : > { %v4368_v53 = vpop.f32.mrb[17].mxu0  ;;  %v1755_v54 = vsel %vm1711_vm1, %v6164_v50, -inf }
 0x13b   : > { %1756 = vmax.xlane.f32.xlu0 %v1755_v54  ;;  %v6168_v55 = vpop.f32.mrb[18].mxu0  ;;  %v6176_v63 = vpop.f32.mrb[16].mxu1 }
 0x13c   : > { %v1758_v58 = vsel %vm1711_vm1, %v6168_v55, -inf  ;;  %v4369_v60 = vpop.f32.mrb[19].mxu0  ;;  %v4396_v1 = vpop.f32.mrb[17].mxu1  ;;  %v1773_v41 = vsel %vm1711_vm1, %v6176_v63, -inf }
 0x13d   : > { %1759 = vmax.xlane.f32.xlu1 %v1758_v58  ;;  %v6178_v3 = vpop.f32.mrb[18].mxu1 }
 0x13e   : > { %v4397_v5 = vpop.f32.mrb[19].mxu1  ;;  %v1776_v43 = vsel %vm1711_vm1, %v6178_v3, -inf }
 0x13f   : > { %1744 = vmax.xlane.f32.xlu0 %v1743_v59 }
 0x141   : > { %1747 = vmax.xlane.f32.xlu1 %v1746_v61  ;;  %v6180_v4 = vpop.f32.mrb[20].mxu0 }
 0x142   : > { %v4372_v8 = vpop.f32.mrb[21].mxu0  ;;  %v1761_v9 = vsel %vm1711_vm1, %v6180_v4, -inf }
 0x143   : > { %1762 = vmax.xlane.f32.xlu0 %v1761_v9  ;;  %v6184_v10 = vpop.f32.mrb[22].mxu0  ;;  %v6192_v16 = vpop.f32.mrb[20].mxu1 }
 0x144   : > { %v1764_v11 = vsel %vm1727_vm2, %v6184_v10, -inf  ;;  %v4373_v14 = vpop.f32.mrb[23].mxu0  ;;  %v4400_v20 = vpop.f32.mrb[21].mxu1  ;;  %v1779_v61 = vsel %vm1711_vm1, %v6192_v16, -inf }
 0x145   : > { %1765 = vmax.xlane.f32.xlu1 %v1764_v11  ;;  %v6196_v23 = vpop.f32.mrb[22].mxu1 }
 0x146   : > { %v4401_v24 = vpop.f32.mrb[23].mxu1  ;;  %v1782_v5 = vsel %vm1727_vm2, %v6196_v23, -inf }
 0x147   : > { %1768 = vmax.xlane.f32.xlu0 %v1767_v13 }
 0x149   : > { %1771 = vmax.xlane.f32.xlu1 %v1770_v15 }
 0x151   : > { %v6205_v32 = vpop.f32.mrb[24].mxu0 }
 0x152   : > { %v4420_v33 = vpop.f32.mrb[25].mxu0  ;;  %v1785_v34 = vsel %vm1711_vm1, %v6205_v32, -inf }
 0x153   : > { %1786 = vmax.xlane.f32.xlu0 %v1785_v34  ;;  %v6210_v37 = vpop.f32.mrb[26].mxu0  ;;  %v6218_v44 = vpop.f32.mrb[24].mxu1 }
 0x154   : > { %v4421_v38 = vpop.f32.mrb[27].mxu0  ;;  %v1788_v39 = vsel %vm1711_vm1, %v6210_v37, -inf  ;;  %v4448_v46 = vpop.f32.mrb[25].mxu1  ;;  %v1803_v22 = vsel %vm1711_vm1, %v6218_v44, -inf }
 0x155   : > { %1789 = vmax.xlane.f32.xlu1 %v1788_v39  ;;  %v6220_v48 = vpop.f32.mrb[26].mxu1 }
 0x156   : > { %v4449_v53 = vpop.f32.mrb[27].mxu1  ;;  %v1806_v25 = vsel %vm1711_vm1, %v6220_v48, -inf }
 0x157   : > { %1774 = vmax.xlane.f32.xlu0 %v1773_v41 }
 0x159   : > { %1777 = vmax.xlane.f32.xlu1 %v1776_v43  ;;  %v6222_v52 = vpop.f32.mrb[28].mxu0 }
 0x15a   : > { %v4424_v54 = vpop.f32.mrb[29].mxu0  ;;  %v1791_v58 = vsel %vm1711_vm1, %v6222_v52, -inf }
 0x15b   : > { %1792 = vmax.xlane.f32.xlu0 %v1791_v58  ;;  %v6226_v59 = vpop.f32.mrb[30].mxu0  ;;  %v6234_v8 = vpop.f32.mrb[28].mxu1 }
 0x15c   : > { %v1794_v60 = vsel %vm1711_vm1, %v6226_v59, -inf  ;;  %v4425_v1 = vpop.f32.mrb[31].mxu0  ;;  %v4452_v9 = vpop.f32.mrb[29].mxu1  ;;  %v1809_v41 = vsel %vm1711_vm1, %v6234_v8, -inf }
 0x15d   : > { %1795 = vmax.xlane.f32.xlu1 %v1794_v60  ;;  %v6236_v11 = vpop.f32.mrb[30].mxu1 }
 0x15e   : > { %v4453_v14 = vpop.f32.mrb[31].mxu1  ;;  %v1812_v43 = vsel %vm1711_vm1, %v6236_v11, -inf }
 0x15f   : > { %1780 = vmax.xlane.f32.xlu0 %v1779_v61 }
 0x161   : > { %1783 = vmax.xlane.f32.xlu1 %v1782_v5  ;;  %v6238_v13 = vpop.f32.mrb[32].mxu0 }
 0x162   : > { %v4428_v15 = vpop.f32.mrb[33].mxu0  ;;  %v1797_v18 = vsel %vm1711_vm1, %v6238_v13, -inf }
 0x163   : > { %1798 = vmax.xlane.f32.xlu0 %v1797_v18  ;;  %v6242_v19 = vpop.f32.mrb[34].mxu0  ;;  %v6250_v26 = vpop.f32.mrb[32].mxu1 }
 0x164   : > { %v1800_v20 = vsel %vm1727_vm2, %v6242_v19, -inf  ;;  %v4429_v24 = vpop.f32.mrb[35].mxu0  ;;  %v4456_v27 = vpop.f32.mrb[33].mxu1  ;;  %v1815_v14 = vsel %vm1711_vm1, %v6250_v26, -inf }
 0x165   : > { %1801 = vmax.xlane.f32.xlu1 %v1800_v20  ;;  %v6252_v28 = vpop.f32.mrb[34].mxu1 }
 0x166   : > { %v4457_v29 = vpop.f32.mrb[35].mxu1  ;;  %v1818_v18 = vsel %vm1727_vm2, %v6252_v28, -inf }
 0x167   : > { %1804 = vmax.xlane.f32.xlu0 %v1803_v22 }
 0x169   : > { %1807 = vmax.xlane.f32.xlu1 %v1806_v25 }
 0x171   : > { %v6254_v30 = vpop.f32.mrb[36].mxu0 }
 0x172   : > { %v4476_v31 = vpop.f32.mrb[37].mxu0  ;;  %v1821_v33 = vsel %vm1711_vm1, %v6254_v30, -inf }
 0x173   : > { %1822 = vmax.xlane.f32.xlu0 %v1821_v33  ;;  %v6258_v34 = vpop.f32.mrb[38].mxu0  ;;  %v6266_v46 = vpop.f32.mrb[36].mxu1 }
 0x174   : > { %v4477_v38 = vpop.f32.mrb[39].mxu0  ;;  %v1824_v39 = vsel %vm1711_vm1, %v6258_v34, -inf  ;;  %7543 = vst [vmem:[#allocation5_spill] sm:$0xff] %v6266_v46  ;;  %v4504_v53 = vpop.f32.mrb[37].mxu1 }
 0x175   : > { %1825 = vmax.xlane.f32.xlu1 %v1824_v39  ;;  %v6268_v54 = vpop.f32.mrb[38].mxu1  ;;  %v1839_v39 = vsel %vm1711_vm1, %v6266_v46, -inf }
 0x176   : > { %7544 = vst [vmem:[#allocation6_spill] sm:$0xff] %v6268_v54  ;;  %v4505_v60 = vpop.f32.mrb[39].mxu1 }
 0x177   : > { %1810 = vmax.xlane.f32.xlu0 %v1809_v41 }
 0x179   : > { %1813 = vmax.xlane.f32.xlu1 %v1812_v43  ;;  %v6270_v58 = vpop.f32.mrb[40].mxu0  ;;  %v1842_v43 = vsel %vm1711_vm1, %v6268_v54, -inf  ;;  %v744_v54 = vld [vmem:[%s6130_s8 + $0xb8] sm:$0x1f] }
 0x17a   : > { %v4480_v61 = vpop.f32.mrb[41].mxu0  ;;  %v1827_v1 = vsel %vm1711_vm1, %v6270_v58, -inf }
 0x17b   : > { %1828 = vmax.xlane.f32.xlu0 %v1827_v1  ;;  %v6274_v5 = vpop.f32.mrb[42].mxu0  ;;  %v6282_v20 = vpop.f32.mrb[40].mxu1 }
 0x17c   : > { %v1830_v9 = vsel %vm1711_vm1, %v6274_v5, -inf  ;;  %v4481_v15 = vpop.f32.mrb[43].mxu0  ;;  %7545 = vst [vmem:[#allocation7_spill] sm:$0xff] %v6282_v20  ;;  %v4508_v22 = vpop.f32.mrb[41].mxu1 }
 0x17d   : > { %1831 = vmax.xlane.f32.xlu1 %v1830_v9  ;;  %v6284_v24 = vpop.f32.mrb[42].mxu1 }
 0x17e   : > { %7546 = vst [vmem:[#allocation8_spill] sm:$0xff] %v6284_v24  ;;  %v4509_v27 = vpop.f32.mrb[43].mxu1 }
 0x17f   : > { %1816 = vmax.xlane.f32.xlu0 %v1815_v14 }
 0x181   : > { %1819 = vmax.xlane.f32.xlu1 %v1818_v18  ;;  %v6286_v25 = vpop.f32.mrb[44].mxu0 }
 0x182   : > { %v4484_v29 = vpop.f32.mrb[45].mxu0  ;;  %v1833_v31 = vsel %vm1711_vm1, %v6286_v25, -inf }
 0x183   : > { %1834 = vmax.xlane.f32.xlu0 %v1833_v31  ;;  %v6290_v33 = vpop.f32.mrb[46].mxu0  ;;  %v6298_v53 = vpop.f32.mrb[44].mxu1  ;;  %v1845_v29 = vsel %vm1711_vm1, %v6282_v20, -inf  ;;  %v1848_v31 = vsel %vm1711_vm1, %v6284_v24, -inf }
 0x184   : > { %v1836_v38 = vsel %vm1727_vm2, %v6290_v33, -inf  ;;  %v4485_v41 = vpop.f32.mrb[47].mxu0  ;;  %7547 = vst [vmem:[#allocation9_spill] sm:$0xff] %v6298_v53  ;;  %v4512_v60 = vpop.f32.mrb[45].mxu1 }
 0x185   : > { %1837 = vmax.xlane.f32.xlu1 %v1836_v38  ;;  %v6300_v61 = vpop.f32.mrb[46].mxu1 }
 0x186   : > { %7548 = vst [vmem:[#allocation10_spill] sm:$0xff] %v6300_v61  ;;  %v4513_v1 = vpop.f32.mrb[47].mxu1 }
 0x187   : > { %1840 = vmax.xlane.f32.xlu0 %v1839_v39 }
 0x189   : > { %1843 = vmax.xlane.f32.xlu1 %v1842_v43 }
 0x191   : > { %v6302_v9 = vpop.f32.mrb[48].mxu0 }
 0x192   : > { %7549 = vst [vmem:[#allocation11_spill] sm:$0xff] %v6302_v9  ;;  %v4532_v14 = vpop.f32.mrb[49].mxu0  ;;  %v1857_v15 = vsel %vm1711_vm1, %v6302_v9, -inf  ;;  %v743_v9 = vld [vmem:[%s6130_s8 + $0xb0] sm:$0xff] }
 0x193   : > { %1858 = vmax.xlane.f32.xlu0 %v1857_v15  ;;  %v6306_v18 = vpop.f32.mrb[50].mxu0  ;;  %v6314_v38 = vpop.f32.mrb[48].mxu1 }
 0x194   : > { %7550 = vst [vmem:[#allocation12_spill] sm:$0xff] %v6306_v18  ;;  %v4533_v22 = vpop.f32.mrb[51].mxu0  ;;  %v1860_v27 = vsel %vm1711_vm1, %v6306_v18, -inf  ;;  %7551 = vst [vmem:[#allocation13_spill] sm:$0xff] %v6314_v38  ;;  %v4560_v39 = vpop.f32.mrb[49].mxu1 }
 0x195   : > { %1861 = vmax.xlane.f32.xlu1 %v1860_v27  ;;  %v6316_v41 = vpop.f32.mrb[50].mxu1  ;;  %v1851_v27 = vsel %vm1711_vm1, %v6298_v53, -inf }
 0x196   : > { %7552 = vst [vmem:[#allocation14_spill] sm:$0xff] %v6316_v41  ;;  %v4561_v60 = vpop.f32.mrb[51].mxu1 }
 0x197   : > { %1846 = vmax.xlane.f32.xlu0 %v1845_v29 }
 0x199   : > { %1849 = vmax.xlane.f32.xlu1 %v1848_v31  ;;  %v6318_v43 = vpop.f32.mrb[52].mxu0  ;;  %v1854_v31 = vsel %vm1727_vm2, %v6300_v61, -inf }
 0x19a   : > { %7553 = vst [vmem:[#allocation15_spill] sm:$0xff] %v6318_v43  ;;  %v4536_v1 = vpop.f32.mrb[53].mxu0  ;;  %v1863_v14 = vsel %vm1711_vm1, %v6318_v43, -inf }
 0x19b   : > { %1864 = vmax.xlane.f32.xlu0 %v1863_v14  ;;  %v6322_v15 = vpop.f32.mrb[54].mxu0  ;;  %v6330_v39 = vpop.f32.mrb[52].mxu1 }
 0x19c   : > { %7554 = vst [vmem:[#allocation16_spill] sm:$0xff] %v6322_v15  ;;  %v1866_v22 = vsel %vm1711_vm1, %v6322_v15, -inf  ;;  %v4537_v29 = vpop.f32.mrb[55].mxu0  ;;  %7555 = vst [vmem:[#allocation17_spill] sm:$0xff] %v6330_v39  ;;  %v4564_v60 = vpop.f32.mrb[53].mxu1 }
 0x19d   : > { %1867 = vmax.xlane.f32.xlu1 %v1866_v22  ;;  %v6332_v0 = vpop.f32.mrb[54].mxu1  ;;  %v1875_v60 = vsel %vm1711_vm1, %v6314_v38, -inf }
 0x19e   : > { %7556 = vst [vmem:[#allocation18_spill] sm:$0xff] %v6332_v0  ;;  %v4565_v15 = vpop.f32.mrb[55].mxu1 }
 0x19f   : > { %1852 = vmax.xlane.f32.xlu0 %v1851_v27 }
 0x1a0   : > { %v1714_v1 = vpop.xlane.xlu0 %1713 }
 0x1a1   : > { %v1983_v14 = vsub.f32 %v6070_v42, %v1714_v1  ;;  %1855 = vmax.xlane.f32.xlu1 %v1854_v31  ;;  %v6335_v43 = vpop.f32.mrb[56].mxu0 }
 0x1a2   : > { %7557 = vst [vmem:[#allocation19_spill] sm:$0xff] %v6335_v43  ;;  %v4540_v24 = vpop.f32.mrb[57].mxu0  ;;  %v1869_v22 = vsel %vm1711_vm1, %v6335_v43, -inf  ;;  %v728_v43 = vld [vmem:[%s6130_s8 + $0x38] sm:$0xff] }
 0x1a3   : > { %1870 = vmax.xlane.f32.xlu0 %v1869_v22  ;;  %v6339_v29 = vpop.f32.mrb[58].mxu0  ;;  %v2073_v61 = vmul.f32 1.442695, %v1983_v14  ;;  %v1878_v24 = vsel %vm1711_vm1, %v6316_v41, -inf  ;;  %v6348_v15 = vpop.f32.mrb[56].mxu1 }
 0x1a4   : > { %7558 = vst [vmem:[#allocation20_spill] sm:$0xff] %v6339_v29  ;;  %v1717_v53 = vpop.xlane.xlu0 %1716  ;;  %v1872_v27 = vsel %vm1727_vm2, %v6339_v29, -inf  ;;  %v4541_v42 = vpop.f32.mrb[59].mxu0  ;;  %7559 = vst [vmem:[#allocation21_spill] sm:$0xff] %v6348_v15 }
 0x1a5   : > { %v1984_v31 = vsub.f32 %v6074_v45, %v1717_v53  ;;  %1873 = vmax.xlane.f32.xlu1 %v1872_v27  ;;  %v4568_v22 = vpop.f32.mrb[57].mxu1  ;;  %5028 = vpow2.f32 %v2073_v61 }
 0x1a6   : > { %v6350_v29 = vpop.f32.mrb[58].mxu1  ;;  %v727_v22 = vld [vmem:[%s6130_s8 + $0x30] sm:$0xff] }
 0x1a7   : > { %v2075_v1 = vmul.f32 1.442695, %v1984_v31  ;;  %1876 = vmax.xlane.f32.xlu0 %v1875_v60  ;;  %7560 = vst [vmem:[#allocation22_spill] sm:$0xff] %v6350_v29  ;;  %v4569_v45 = vpop.f32.mrb[59].mxu1 }
 0x1a8   : > { %v1720_v14 = vpop.xlane.xlu1 %1719 }
 0x1a9   : > { %5030 = vpow2.f32 %v2075_v1  ;;  %v1985_v42 = vsub.f32 %v6090_v57, %v1720_v14  ;;  %1879 = vmax.xlane.f32.xlu1 %v1878_v24 }
 0x1ab   : > { %v2077_v53 = vmul.f32 1.442695, %v1985_v42 }
 0x1ac   : > { %v1723_v27 = vpop.xlane.xlu1 %1722 }
 0x1ad   : > { %v1986_v41 = vsub.f32 %v6094_v62, %v1723_v27  ;;  %5032 = vpow2.f32 %v2077_v53 }
 0x1af   : > { %v2079_v38 = vmul.f32 1.442695, %v1986_v41  ;;  %v6359_v1 = vpop.eup %5028 }
 0x1b0   : > { %v1726_v31 = vpop.xlane.xlu0 %1725 }
 0x1b1   : > { %5034 = vpow2.f32 %v2079_v38  ;;  %v1987_v61 = vsub.f32 %v6107_v7, %v1726_v31  ;;  %v6355_v60 = vpop.f32.mrb[60].mxu0  ;;  %v1881_v31 = vsel %vm1711_vm1, %v6330_v39, -inf }
 0x1b2   : > { %7561 = vst [vmem:[#allocation23_spill] sm:$0xff] %v6355_v60  ;;  %v1730_v57 = vpop.xlane.xlu1 %1729  ;;  %v4588_v24 = vpop.f32.mrb[61].mxu0  ;;  %v1893_v14 = vsel %vm1711_vm1, %v6355_v60, -inf  ;;  %v729_v60 = vld [vmem:[%s6130_s8 + $0x40] sm:$0xff] }
 0x1b3   : > { %v6363_v62 = vpop.eup %5030  ;;  %v2081_v41 = vmul.f32 1.442695, %v1987_v61  ;;  %v1988_v7 = vsub.f32 %v6111_v12, %v1730_v57  ;;  %1894 = vmax.xlane.f32.xlu0 %v1893_v14  ;;  %v6366_v38 = vpop.f32.mrb[62].mxu0  ;;  %v814_v24 = vpack.c.bf16 %v728_v43, %v727_v22  ;;  %v730_v12 = vld [vmem:[%s6130_s8 + $0x48] sm:$0xff]  ;;  %v731_v57 = vld [vmem:[%s6130_s8 + $0x50] sm:$0xff]  ;;  %v7564_v22 = vmov 0.0  }
 0x1b4   : > { %7562 = vst [vmem:[#allocation24_spill] sm:$0xff] %v6366_v38  ;;  %v2523_v42 = vpack.c.bf16 %v6363_v62, %v6359_v1  ;;  %v1733_v45 = vpop.xlane.xlu0 %1732  ;;  %v4589_v53 = vpop.f32.mrb[63].mxu0  ;;  %v1896_v27 = vsel %vm1711_vm1, %v6366_v38, -inf  ;;  %v732_v14 = vld [vmem:[%s6130_s8 + $0x58] sm:$0x1f] }
 0x1b5   : > { %v2083_v61 = vmul.f32 1.442695, %v1988_v7  ;;  %v1989_v20 = vsub.f32 %v6083_v51, %v1733_v45  ;;  %1897 = vmax.xlane.f32.xlu1 %v1896_v27  ;;  %5036 = vpow2.f32 %v2081_v41  ;;  %v1884_v53 = vsel %vm1711_vm1, %v6332_v0, -inf  ;;  %v6382_v38 = vpop.f32.mrb[60].mxu1 }
 0x1b6   : > { %4717 = vmatmul.mubr.msk.bf16.vlgmr.msra.gmra.mrb[84].mxu1 %vm1711_vm1, %v2523_v42  ;;  %v1736_v18 = vpop.xlane.xlu1 %1735  ;;  %7563 = vst [vmem:[#allocation25_spill] sm:$0xff] %v6382_v38  ;;  %v4616_v51 = vpop.f32.mrb[61].mxu1  ;;  %v815_v41 = vpack.c.bf16 %v730_v12, %v729_v60  ;;  %v816_v42 = vpack.c.bf16 %v732_v14, %v731_v57  ;;  %v1887_v57 = vsel %vm1711_vm1, %v6348_v15, -inf }
 0x1b7   : > { %5038 = vpow2.f32 %v2083_v61  ;;  %v2085_v39 = vmul.f32 1.442695, %v1989_v20  ;;  %v1990_v43 = vsub.f32 %v6088_v56, %v1736_v18  ;;  %1882 = vmax.xlane.f32.xlu0 %v1881_v31  ;;  %4720 = vmatprep.mubr.msk.bf16.mxu1 %vm5453_vm0, %v7564_v22  ;;  %v6387_v7 = vpop.f32.mrb[62].mxu1  ;;  %v6392_v20 = vpop.eup %5032 }
 0x1b8   : > { %4729 = vmatpush3.bf16.msra.mxu1 %v814_v24  ;;  %7565 = vst [vmem:[#allocation26_spill] sm:$0xff] %v6387_v7  ;;  %v4617_v61 = vpop.f32.mrb[63].mxu1  ;;  %v2651_v14 = vand.u32 %v6144_v35, %v816_v42 }
 0x1b9   : > { %v2087_v45 = vmul.f32 1.442695, %v1990_v43  ;;  %1885 = vmax.xlane.f32.xlu1 %v1884_v53  ;;  %v6389_v27 = vpop.f32.mrb[64].mxu0  ;;  %4730 = vmatprep.subr.bf16.mxu1 %v7564_v22  ;;  %5040 = vpow2.f32 %v2085_v39  ;;  %v1890_v53 = vsel %vm1727_vm2, %v6350_v29, -inf }
 0x1ba   : > { %7566 = vst [vmem:[#allocation27_spill] sm:$0xff] %v6389_v27  ;;  %v4592_v56 = vpop.f32.mrb[65].mxu0  ;;  %v1899_v18 = vsel %vm1711_vm1, %v6389_v27, -inf  ;;  %v742_v27 = vld [vmem:[%s6130_s8 + $0xa8] sm:$0xff] }
 0x1bb   : > { %v6396_v31 = vpop.eup %5034  ;;  %5042 = vpow2.f32 %v2087_v45  ;;  %1900 = vmax.xlane.f32.xlu0 %v1899_v18  ;;  %v6398_v60 = vpop.f32.mrb[66].mxu0 }
 0x1bc   : > { %7567 = vst [vmem:[#allocation28_spill] sm:$0xff] %v6398_v60  ;;  %v1902_v24 = vsel %vm1711_vm1, %v6398_v60, -inf  ;;  %v2524_v12 = vpack.c.bf16 %v6396_v31, %v6392_v20  ;;  %v4593_v39 = vpop.f32.mrb[67].mxu0  ;;  %4731 = vmatpush3.bf16.msra.mxu1 %v815_v41  ;;  %v6411_v43 = vpop.f32.mrb[64].mxu1 }
 0x1bd   : > { %1903 = vmax.xlane.f32.xlu1 %v1902_v24  ;;  %4732 = vmatprep.subr.bf16.mxu1 %v7564_v22  ;;  %7568 = vst [vmem:[#allocation29_spill] sm:$0xff] %v6411_v43  ;;  %v4620_v51 = vpop.f32.mrb[65].mxu1 }
 0x1be   : > { %4721 = vmatmul.mubr.msk.bf16.gmra.mrb[88].mxu1 %vm1711_vm1, %v2524_v12  ;;  %v6417_v42 = vpop.f32.mrb[66].mxu1 }
 0x1bf   : > { %1888 = vmax.xlane.f32.xlu0 %v1887_v57  ;;  %4724 = vmatprep.mubr.msk.bf16.mxu1 %vm5453_vm0, %v7564_v22  ;;  %v6415_v45 = vpop.eup %5036  ;;  %7569 = vst [vmem:[#allocation30_spill] sm:$0xff] %v6417_v42  ;;  %v4621_v24 = vpop.f32.mrb[67].mxu1 }
 0x1c0   : > { %v1751_v41 = vpop.xlane.xlu0 %1750  ;;  %4733 = vmatpush3.bf16.msra.mxu1 %v2651_v14  ;;  %v1911_v24 = vsel %vm1711_vm1, %v6382_v38, -inf }
 0x1c1   : > { %v6419_v61 = vpop.eup %5038  ;;  %v1995_v56 = vsub.f32 %v6146_v36, %v1751_v41  ;;  %1891 = vmax.xlane.f32.xlu1 %v1890_v53  ;;  %v6422_v18 = vpop.f32.mrb[68].mxu0  ;;  %4764 = vmatprep.subr.bf16.mxu1 %v7564_v22 }
 0x1c2   : > { %7570 = vst [vmem:[#allocation31_spill] sm:$0xff] %v6422_v18  ;;  %v1754_v12 = vpop.xlane.xlu1 %1753  ;;  %v4596_v57 = vpop.f32.mrb[69].mxu0  ;;  %v1905_v39 = vsel %vm1711_vm1, %v6422_v18, -inf  ;;  %v2525_v14 = vpack.c.bf16 %v6419_v61, %v6415_v45 }
 0x1c3   : > { %v2097_v51 = vmul.f32 1.442695, %v1995_v56  ;;  %v1996_v29 = vsub.f32 %v6151_v40, %v1754_v12  ;;  %1906 = vmax.xlane.f32.xlu0 %v1905_v39  ;;  %v6430_v15 = vpop.f32.mrb[70].mxu0  ;;  %v6432_v36 = vpop.eup %5040  ;;  %v1914_v39 = vsel %vm1711_vm1, %v6387_v7, -inf }
 0x1c4   : > { %7571 = vst [vmem:[#allocation32_spill] sm:$0xff] %v6430_v15  ;;  %v1739_v53 = vpop.xlane.xlu0 %1738  ;;  %v1908_v41 = vsel %vm1727_vm2, %v6430_v15, -inf  ;;  %v4597_v57 = vpop.f32.mrb[71].mxu0  ;;  %v741_v15 = vld [vmem:[%s6130_s8 + $0xa0] sm:$0xff] }
 0x1c5   : > { %v6438_v18 = vpop.eup %5042  ;;  %v2099_v60 = vmul.f32 1.442695, %v1996_v29  ;;  %v1991_v56 = vsub.f32 %v6099_v2, %v1739_v53  ;;  %1909 = vmax.xlane.f32.xlu1 %v1908_v41  ;;  %5044 = vpow2.f32 %v2097_v51  ;;  %v6446_v38 = vpop.f32.mrb[68].mxu1  ;;  %v739_v53 = vld [vmem:[%s6130_s8 + $0x90] sm:$0xff] }
 0x1c6   : > { %v2526_v40 = vpack.c.bf16 %v6438_v18, %v6432_v36  ;;  %4725 = vmatmul.mubr.msk.bf16.gmra.mrb[92].mxu1 %vm1711_vm1, %v2525_v14  ;;  %v1742_v12 = vpop.xlane.xlu1 %1741  ;;  %7572 = vst [vmem:[#allocation33_spill] sm:$0xff] %v6446_v38  ;;  %v4624_v2 = vpop.f32.mrb[69].mxu1  ;;  %v740_v14 = vld [vmem:[%s6130_s8 + $0x98] sm:$0xff] }
 0x1c7   : > { %5046 = vpow2.f32 %v2099_v60  ;;  %v2089_v57 = vmul.f32 1.442695, %v1991_v56  ;;  %v1992_v29 = vsub.f32 %v6105_v6, %v1742_v12  ;;  %1912 = vmax.xlane.f32.xlu0 %v1911_v24  ;;  %4734 = vmatprep.mubr.msk.bf16.mxu1 %vm5453_vm0, %v7564_v22  ;;  %v6453_v41 = vpop.f32.mrb[70].mxu1  ;;  %v820_v2 = vpack.c.bf16 %v740_v14, %v739_v53  ;;  %v746_v53 = vld [vmem:[%s6130_s8 + $0xc8] sm:$0xff] }
 0x1c8   : > { %v1757_v51 = vpop.xlane.xlu0 %1756  ;;  %7573 = vst [vmem:[#allocation34_spill] sm:$0xff] %v6453_v41  ;;  %v4625_v56 = vpop.f32.mrb[71].mxu1 }
 0x1c9   : > { %v2091_v7 = vmul.f32 1.442695, %v1992_v29  ;;  %v1997_v60 = vsub.f32 %v6164_v50, %v1757_v51  ;;  %1915 = vmax.xlane.f32.xlu1 %v1914_v39  ;;  %5048 = vpow2.f32 %v2089_v57  ;;  %v821_v39 = vpack.c.bf16 %v742_v27, %v741_v15  ;;  %v745_v51 = vld [vmem:[%s6130_s8 + $0xc0] sm:$0xff]  ;;  %v747_v56 = vld [vmem:[%s6130_s8 + $0xd0] sm:$0xff] }
 0x1ca   : > { %v1760_v6 = vpop.xlane.xlu1 %1759  ;;  %v822_v57 = vpack.c.bf16 %v744_v54, %v743_v9 }
 0x1cb   : > { %5050 = vpow2.f32 %v2091_v7  ;;  %v2101_v24 = vmul.f32 1.442695, %v1997_v60  ;;  %v1998_v12 = vsub.f32 %v6168_v55, %v1760_v6  ;;  %v823_v60 = vpack.c.bf16 %v746_v53, %v745_v51  ;;  %v748_v6 = vld [vmem:[%s6130_s8 + $0xd8] sm:$0xff] }
 0x1cc   : > { %v1745_v0 = vpop.xlane.xlu0 %1744 }
 0x1cd   : > { %v2103_v46 = vmul.f32 1.442695, %v1998_v12  ;;  %v1993_v29 = vsub.f32 %v6119_v17, %v1745_v0  ;;  %5052 = vpow2.f32 %v2101_v24 }
 0x1ce   : > { %4735 = vmatmul.mubr.msk.bf16.vlgmr.msra.gmra.mrb[96].mxu1 %vm1711_vm1, %v2526_v40  ;;  %v1748_v50 = vpop.xlane.xlu1 %1747 }
 0x1cf   : > { %5054 = vpow2.f32 %v2103_v46  ;;  %v2093_v7 = vmul.f32 1.442695, %v1993_v29  ;;  %v1994_v55 = vsub.f32 %v6132_v21, %v1748_v50  ;;  %4738 = vmatprep.mubr.msk.bf16.mxu1 %vm5453_vm0, %v7564_v22  ;;  %4765 = vmatpush3.bf16.msra.mxu1 %v820_v2  ;;  %v6468_v14 = vpop.eup %5044  ;;  %v2789_v2 = vand.u32 %v6144_v35, %v822_v57  ;;  %v749_v29 = vld [vmem:[%s6130_s8 + $0xe0] sm:$0xff]  ;;  %v750_v50 = vld [vmem:[%s6130_s8 + $0xe8] sm:$0x1f] }
 0x1d0   : > { %v1763_v0 = vpop.xlane.xlu0 %1762  ;;  %4766 = vmatprep.subr.bf16.mxu1 %v7564_v22 }
 0x1d1   : > { %v6471_v17 = vpop.eup %5046  ;;  %v2095_v46 = vmul.f32 1.442695, %v1994_v55  ;;  %v1999_v15 = vsub.f32 %v6180_v4, %v1763_v0  ;;  %v6474_v21 = vpop.f32.mrb[72].mxu0  ;;  %5056 = vpow2.f32 %v2093_v7 }
 0x1d2   : > { %7574 = vst [vmem:[#allocation35_spill] sm:$0xff] %v6474_v21  ;;  %v2529_v54 = vpack.c.bf16 %v6471_v17, %v6468_v14  ;;  %v1766_v9 = vpop.xlane.xlu1 %1765  ;;  %v4644_v27 = vpop.f32.mrb[73].mxu0  ;;  %v1929_v40 = vsel %vm1711_vm1, %v6474_v21, -inf }
 0x1d3   : > { %5058 = vpow2.f32 %v2095_v46  ;;  %v2105_v24 = vmul.f32 1.442695, %v1999_v15  ;;  %v2000_v4 = vsub.f32 %v6184_v10, %v1766_v9  ;;  %1930 = vmax.xlane.f32.xlu0 %v1929_v40  ;;  %v6483_v12 = vpop.f32.mrb[74].mxu0  ;;  %4767 = vmatpush3.bf16.msra.mxu1 %v821_v39  ;;  %v6488_v7 = vpop.eup %5048  ;;  %v1917_v10 = vsel %vm1711_vm1, %v6411_v43, -inf }
 0x1d4   : > { %7575 = vst [vmem:[#allocation36_spill] sm:$0xff] %v6483_v12  ;;  %4753 = vmatmul.mubr.msk.bf16.vlgmr.msra.gmra.mrb[96].mxu0 %vm1711_vm1, %v2529_v54  ;;  %v1769_v55 = vpop.xlane.xlu0 %1768  ;;  %v4645_v51 = vpop.f32.mrb[75].mxu0  ;;  %v1932_v53 = vsel %vm1711_vm1, %v6483_v12, -inf  ;;  %4768 = vmatprep.subr.bf16.mxu1 %v7564_v22  ;;  %v824_v46 = vpack.c.bf16 %v748_v6, %v747_v56  ;;  %v1920_v9 = vsel %vm1711_vm1, %v6417_v42, -inf  ;;  %v825_v40 = vpack.c.bf16 %v750_v50, %v749_v29  ;;  %v756_v42 = vld [vmem:[%s6130_s8 + $0x118] sm:$0x1f] }
 0x1d5   : > { %v6496_v0 = vpop.eup %5050  ;;  %v2107_v39 = vmul.f32 1.442695, %v2000_v4  ;;  %v2001_v57 = vsub.f32 %v6160_v47, %v1769_v55  ;;  %1933 = vmax.xlane.f32.xlu1 %v1932_v53  ;;  %4756 = vmatprep.mubr.msk.bf16.mxu0 %vm5453_vm0, %v7564_v22  ;;  %5060 = vpow2.f32 %v2105_v24  ;;  %v6505_v27 = vpop.f32.mrb[72].mxu1 }
 0x1d6   : > { %v1772_v15 = vpop.xlane.xlu1 %1771  ;;  %v2527_v54 = vpack.c.bf16 %v6496_v0, %v6488_v7  ;;  %7576 = vst [vmem:[#allocation37_spill] sm:$0xff] %v6505_v27  ;;  %4783 = vmatpush3.bf16.msra.mxu0 %v823_v60  ;;  %v4672_v55 = vpop.f32.mrb[73].mxu1  ;;  %v2858_v53 = vand.u32 %v6144_v35, %v825_v40  ;;  %v1926_v40 = vsel %vm1727_vm2, %v6453_v41, -inf }
 0x1d7   : > { %5062 = vpow2.f32 %v2107_v39  ;;  %v2109_v4 = vmul.f32 1.442695, %v2001_v57  ;;  %v2002_v47 = vsub.f32 %v6162_v49, %v1772_v15  ;;  %1918 = vmax.xlane.f32.xlu0 %v1917_v10  ;;  %4769 = vmatpush3.bf16.msra.mxu1 %v2789_v2  ;;  %v6508_v56 = vpop.eup %5052  ;;  %v6511_v6 = vpop.f32.mrb[74].mxu1 }
 0x1d8   : > { %4739 = vmatmul.mubr.msk.bf16.gmra.mrb[100].mxu1 %vm1711_vm1, %v2527_v54  ;;  %4784 = vmatprep.subr.bf16.mxu0 %v7564_v22  ;;  %v4673_v49 = vpop.f32.mrb[75].mxu1 }
 0x1d9   : > { %v6514_v24 = vpop.eup %5054  ;;  %v2111_v51 = vmul.f32 1.442695, %v2002_v47  ;;  %1921 = vmax.xlane.f32.xlu1 %v1920_v9  ;;  %v6516_v60 = vpop.f32.mrb[76].mxu0  ;;  %4742 = vmatprep.mubr.msk.bf16.mxu1 %vm5453_vm0, %v7564_v22  ;;  %5064 = vpow2.f32 %v2109_v4 }
 0x1da   : > { %7577 = vst [vmem:[#allocation38_spill] sm:$0xff] %v6516_v60  ;;  %v4648_v2 = vpop.f32.mrb[77].mxu0  ;;  %v1935_v29 = vsel %vm1711_vm1, %v6516_v60, -inf  ;;  %v2530_v50 = vpack.c.bf16 %v6514_v24, %v6508_v56  ;;  %4785 = vmatpush3.bf16.msra.mxu0 %v824_v46  ;;  %4800 = vmatprep.subr.bf16.mxu1 %v7564_v22  ;;  %v1923_v46 = vsel %vm1711_vm1, %v6446_v38, -inf  ;;  %v754_v60 = vld [vmem:[%s6130_s8 + $0x108] sm:$0xff] }
 0x1db   : > { %5066 = vpow2.f32 %v2111_v51  ;;  %1936 = vmax.xlane.f32.xlu0 %v1935_v29  ;;  %v6526_v10 = vpop.f32.mrb[78].mxu0  ;;  %4786 = vmatprep.subr.bf16.mxu0 %v7564_v22  ;;  %v6529_v39 = vpop.eup %5056 }
 0x1dc   : > { %7578 = vst [vmem:[#allocation39_spill] sm:$0xff] %v6526_v10  ;;  %4757 = vmatmul.mubr.msk.bf16.gmra.mrb[100].mxu0 %vm1711_vm1, %v2530_v50  ;;  %v1938_v57 = vsel %vm1711_vm1, %v6526_v10, -inf  ;;  %v4649_v15 = vpop.f32.mrb[79].mxu0  ;;  %v6544_v4 = vpop.f32.mrb[76].mxu1  ;;  %v753_v10 = vld [vmem:[%s6130_s8 + $0x100] sm:$0xff] }
 0x1dd   : > { %v6536_v54 = vpop.eup %5058  ;;  %1939 = vmax.xlane.f32.xlu1 %v1938_v57  ;;  %4760 = vmatprep.mubr.msk.bf16.mxu0 %vm5453_vm0, %v7564_v22  ;;  %v4676_v47 = vpop.f32.mrb[77].mxu1 }
 0x1de   : > { %v2528_v9 = vpack.c.bf16 %v6536_v54, %v6529_v39  ;;  %4787 = vmatpush3.bf16.msra.mxu0 %v2858_v53  ;;  %v6550_v49 = vpop.f32.mrb[78].mxu1 }
 0x1df   : > { %1924 = vmax.xlane.f32.xlu0 %v1923_v46  ;;  %4818 = vmatprep.subr.bf16.mxu0 %v7564_v22  ;;  %v6547_v55 = vpop.eup %5060  ;;  %v4677_v53 = vpop.f32.mrb[79].mxu1 }
 0x1e0   : > { %4743 = vmatmul.mubr.msk.bf16.gmra.mrb[104].mxu1 %vm1711_vm1, %v2528_v9  ;;  %v1787_v51 = vpop.xlane.xlu0 %1786 }
 0x1e1   : > { %v6552_v2 = vpop.eup %5062  ;;  %v2007_v29 = vsub.f32 %v6205_v32, %v1787_v51  ;;  %1927 = vmax.xlane.f32.xlu1 %v1926_v40  ;;  %v6555_v50 = vpop.f32.mrb[80].mxu0  ;;  %4770 = vmatprep.mubr.msk.bf16.mxu1 %vm5453_vm0, %v7564_v22  ;;  %v751_v40 = vld [vmem:[%s6130_s8 + $0xf0] sm:$0xff]  ;;  %v752_v51 = vld [vmem:[%s6130_s8 + $0xf8] sm:$0xff] }
 0x1e2   : > { %7579 = vst [vmem:[#allocation40_spill] sm:$0xff] %v6555_v50  ;;  %v1790_v57 = vpop.xlane.xlu1 %1789  ;;  %v4652_v46 = vpop.f32.mrb[81].mxu0  ;;  %v1941_v15 = vsel %vm1711_vm1, %v6555_v50, -inf  ;;  %v2531_v9 = vpack.c.bf16 %v6552_v2, %v6547_v55 }
 0x1e3   : > { %v2121_v47 = vmul.f32 1.442695, %v2007_v29  ;;  %v2008_v41 = vsub.f32 %v6210_v37, %v1790_v57  ;;  %1942 = vmax.xlane.f32.xlu0 %v1941_v15  ;;  %v6564_v32 = vpop.f32.mrb[82].mxu0  ;;  %v6568_v38 = vpop.eup %5064  ;;  %v1947_v29 = vsel %vm1711_vm1, %v6505_v27, -inf  ;;  %v1950_v27 = vsel %vm1711_vm1, %v6511_v6, -inf }
 0x1e4   : > { %7580 = vst [vmem:[#allocation41_spill] sm:$0xff] %v6564_v32  ;;  %4761 = vmatmul.mubr.msk.bf16.gmra.mrb[104].mxu0 %vm1711_vm1, %v2531_v9  ;;  %v1775_v53 = vpop.xlane.xlu0 %1774  ;;  %v1944_v46 = vsel %vm1727_vm2, %v6564_v32, -inf  ;;  %v4653_v50 = vpop.f32.mrb[83].mxu0 }
 0x1e5   : > { %v6575_v37 = vpop.eup %5066  ;;  %v2123_v57 = vmul.f32 1.442695, %v2008_v41  ;;  %v2003_v15 = vsub.f32 %v6176_v63, %v1775_v53  ;;  %1945 = vmax.xlane.f32.xlu1 %v1944_v46  ;;  %4788 = vmatprep.mubr.msk.bf16.mxu0 %vm5453_vm0, %v7564_v22  ;;  %5068 = vpow2.f32 %v2121_v47  ;;  %v826_v50 = vpack.c.bf16 %v752_v51, %v751_v40  ;;  %v6587_v53 = vpop.f32.mrb[80].mxu1  ;;  %v755_v46 = vld [vmem:[%s6130_s8 + $0x110] sm:$0xff] }
 0x1e6   : > { %v2532_v9 = vpack.c.bf16 %v6575_v37, %v6568_v38  ;;  %v1778_v32 = vpop.xlane.xlu1 %1777  ;;  %7581 = vst [vmem:[#allocation42_spill] sm:$0xff] %v6587_v53  ;;  %v4680_v47 = vpop.f32.mrb[81].mxu1  ;;  %v827_v51 = vpack.c.bf16 %v754_v60, %v753_v10 }
 0x1e7   : > { %5070 = vpow2.f32 %v2123_v57  ;;  %v2113_v41 = vmul.f32 1.442695, %v2003_v15  ;;  %v2004_v63 = vsub.f32 %v6178_v3, %v1778_v32  ;;  %1948 = vmax.xlane.f32.xlu0 %v1947_v29  ;;  %v6595_v40 = vpop.f32.mrb[82].mxu1  ;;  %v828_v29 = vpack.c.bf16 %v756_v42, %v755_v46 }
 0x1e8   : > { %4771 = vmatmul.mubr.msk.bf16.vlgmr.msra.gmra.mrb[108].mxu1 %vm1711_vm1, %v2532_v9  ;;  %v1793_v43 = vpop.xlane.xlu0 %1792  ;;  %7582 = vst [vmem:[#allocation43_spill] sm:$0xff] %v6595_v40  ;;  %v4681_v32 = vpop.f32.mrb[83].mxu1 }
 0x1e9   : > { %v2115_v12 = vmul.f32 1.442695, %v2004_v63  ;;  %v2009_v21 = vsub.f32 %v6222_v52, %v1793_v43  ;;  %1951 = vmax.xlane.f32.xlu1 %v1950_v27  ;;  %4774 = vmatprep.mubr.msk.bf16.mxu1 %vm5453_vm0, %v7564_v22  ;;  %5072 = vpow2.f32 %v2113_v41  ;;  %v2927_v41 = vand.u32 %v6144_v35, %v828_v29  ;;  %v759_v29 = vld [vmem:[%s6130_s8 + $0x130] sm:$0xff] }
 0x1ea   : > { %v1796_v3 = vpop.xlane.xlu1 %1795  ;;  %4801 = vmatpush3.bf16.msra.mxu1 %v826_v50 }
 0x1eb   : > { %5074 = vpow2.f32 %v2115_v12  ;;  %v2125_v57 = vmul.f32 1.442695, %v2009_v21  ;;  %v2010_v15 = vsub.f32 %v6226_v59, %v1796_v3  ;;  %4802 = vmatprep.subr.bf16.mxu1 %v7564_v22  ;;  %v757_v21 = vld [vmem:[%s6130_s8 + $0x120] sm:$0xff]  ;;  %v758_v59 = vld [vmem:[%s6130_s8 + $0x128] sm:$0xff] }
 0x1ec   : > { %v1781_v52 = vpop.xlane.xlu0 %1780 }
 0x1ed   : > { %v2127_v43 = vmul.f32 1.442695, %v2010_v15  ;;  %v2005_v27 = vsub.f32 %v6192_v16, %v1781_v52  ;;  %5076 = vpow2.f32 %v2125_v57  ;;  %v760_v57 = vld [vmem:[%s6130_s8 + $0x138] sm:$0xff] }
 0x1ee   : > { %v1784_v9 = vpop.xlane.xlu1 %1783  ;;  %4803 = vmatpush3.bf16.msra.mxu1 %v827_v51  ;;  %v829_v51 = vpack.c.bf16 %v758_v59, %v757_v21  ;;  %v1953_v21 = vsel %vm1711_vm1, %v6544_v4, -inf }
 0x1ef   : > { %5078 = vpow2.f32 %v2127_v43  ;;  %v2117_v60 = vmul.f32 1.442695, %v2005_v27  ;;  %v2006_v42 = vsub.f32 %v6196_v23, %v1784_v9  ;;  %4804 = vmatprep.subr.bf16.mxu1 %v7564_v22  ;;  %v6605_v12 = vpop.eup %5068  ;;  %v761_v43 = vld [vmem:[%s6130_s8 + $0x140] sm:$0xff]  ;;  %v762_v27 = vld [vmem:[%s6130_s8 + $0x148] sm:$0x1f] }
 0x1f0   : > { %v1799_v10 = vpop.xlane.xlu0 %1798 }
 0x1f1   : > { %v6607_v50 = vpop.eup %5070  ;;  %v2119_v16 = vmul.f32 1.442695, %v2006_v42  ;;  %v2011_v63 = vsub.f32 %v6238_v13, %v1799_v10  ;;  %v6610_v46 = vpop.f32.mrb[84].mxu0  ;;  %5080 = vpow2.f32 %v2117_v60 }
 0x1f2   : > { %v2535_v23 = vpack.c.bf16 %v6607_v50, %v6605_v12  ;;  %v1802_v47 = vpop.xlane.xlu1 %1801  ;;  %v4700_v3 = vpop.f32.mrb[85].mxu0  ;;  %v1965_v32 = vsel %vm1711_vm1, %v6610_v46, -inf  ;;  %4805 = vmatpush3.bf16.msra.mxu1 %v2927_v41 }
 0x1f3   : > { %5082 = vpow2.f32 %v2119_v16  ;;  %v2129_v15 = vmul.f32 1.442695, %v2011_v63  ;;  %v2012_v13 = vsub.f32 %v6242_v19, %v1802_v47  ;;  %1966 = vmax.xlane.f32.xlu0 %v1965_v32  ;;  %v6619_v52 = vpop.f32.mrb[86].mxu0  ;;  %4836 = vmatprep.subr.bf16.mxu1 %v7564_v22  ;;  %v6624_v9 = vpop.eup %5072  ;;  %v831_v47 = vpack.c.bf16 %v762_v27, %v761_v43 }
 0x1f4   : > { %4789 = vmatmul.mubr.msk.bf16.vlgmr.msra.gmra.mrb[108].mxu0 %vm1711_vm1, %v2535_v23  ;;  %v1805_v60 = vpop.xlane.xlu0 %1804  ;;  %v4701_v41 = vpop.f32.mrb[87].mxu0  ;;  %v1968_v42 = vsel %vm1711_vm1, %v6619_v52, -inf  ;;  %v830_v23 = vpack.c.bf16 %v760_v57, %v759_v29 }
 0x1f5   : > { %v6631_v19 = vpop.eup %5074  ;;  %v2131_v59 = vmul.f32 1.442695, %v2012_v13  ;;  %v2013_v10 = vsub.f32 %v6218_v44, %v1805_v60  ;;  %1969 = vmax.xlane.f32.xlu1 %v1968_v42  ;;  %4792 = vmatprep.mubr.msk.bf16.mxu0 %vm5453_vm0, %v7564_v22  ;;  %5084 = vpow2.f32 %v2129_v15  ;;  %v1956_v15 = vsel %vm1711_vm1, %v6550_v49, -inf }
 0x1f6   : > { %v1808_v16 = vpop.xlane.xlu1 %1807  ;;  %v2533_v63 = vpack.c.bf16 %v6631_v19, %v6624_v9  ;;  %4819 = vmatpush3.bf16.msra.mxu0 %v829_v51  ;;  %v2996_v43 = vand.u32 %v6144_v35, %v831_v47  ;;  %v1962_v47 = vsel %vm1727_vm2, %v6595_v40, -inf }
 0x1f7   : > { %5086 = vpow2.f32 %v2131_v59  ;;  %v2133_v3 = vmul.f32 1.442695, %v2013_v10  ;;  %v2014_v32 = vsub.f32 %v6220_v48, %v1808_v16  ;;  %1954 = vmax.xlane.f32.xlu0 %v1953_v21  ;;  %4820 = vmatprep.subr.bf16.mxu0 %v7564_v22  ;;  %v6640_v44 = vpop.eup %5076  ;;  %v1959_v59 = vsel %vm1711_vm1, %v6587_v53, -inf }
 0x1f8   : > { %4775 = vmatmul.mubr.msk.bf16.gmra.mrb[112].mxu1 %vm1711_vm1, %v2533_v63 }
 0x1f9   : > { %v6645_v13 = vpop.eup %5078  ;;  %v2135_v60 = vmul.f32 1.442695, %v2014_v32  ;;  %1957 = vmax.xlane.f32.xlu1 %v1956_v15  ;;  %v6647_v51 = vpop.f32.mrb[88].mxu0  ;;  %4778 = vmatprep.mubr.msk.bf16.mxu1 %vm5453_vm0, %v7564_v22  ;;  %5088 = vpow2.f32 %v2133_v3 }
 0x1fa   : > { %7583 = vst [vmem:[#allocation44_spill] sm:$0xff] %v6647_v51  ;;  %v4704_v48 = vpop.f32.mrb[89].mxu0  ;;  %v1971_v29 = vsel %vm1711_vm1, %v6647_v51, -inf  ;;  %v2536_v57 = vpack.c.bf16 %v6645_v13, %v6640_v44  ;;  %4821 = vmatpush3.bf16.msra.mxu0 %v830_v23 }
 0x1fb   : > { %5090 = vpow2.f32 %v2135_v60  ;;  %1972 = vmax.xlane.f32.xlu0 %v1971_v29  ;;  %v6656_v27 = vpop.f32.mrb[90].mxu0  ;;  %4822 = vmatprep.subr.bf16.mxu0 %v7564_v22  ;;  %v6659_v41 = vpop.eup %5080 }
 0x1fc   : > { %7584 = vst [vmem:[#allocation45_spill] sm:$0xff] %v6656_v27  ;;  %v4705_v42 = vpop.f32.mrb[91].mxu0  ;;  %4793 = vmatmul.mubr.msk.bf16.gmra.mrb[112].mxu0 %vm1711_vm1, %v2536_v57  ;;  %v1974_v21 = vsel %vm1711_vm1, %v6656_v27, -inf }
 0x1fd   : > { %v6666_v10 = vpop.eup %5082  ;;  %1975 = vmax.xlane.f32.xlu1 %v1974_v21  ;;  %4796 = vmatprep.mubr.msk.bf16.mxu0 %vm5453_vm0, %v7564_v22 }
 0x1fe   : > { %v2534_v16 = vpack.c.bf16 %v6666_v10, %v6659_v41  ;;  %4823 = vmatpush3.bf16.msra.mxu0 %v2996_v43 }
 0x1ff   : > { %1960 = vmax.xlane.f32.xlu0 %v1959_v59  ;;  %4854 = vmatprep.subr.bf16.mxu0 %v7564_v22  ;;  %v6673_v63 = vpop.eup %5084  ;;  %v764_v59 = vld [vmem:[%s6130_s8 + $0x158] sm:$0xff] }
 0x200   : > { %4779 = vmatmul.mubr.msk.bf16.gmra.mrb[116].mxu1 %vm1711_vm1, %v2534_v16  ;;  %v1823_v23 = vpop.xlane.xlu0 %1822 }
 0x201   : > { %v6678_v3 = vpop.eup %5086  ;;  %v2019_v32 = vsub.f32 %v6254_v30, %v1823_v23  ;;  %1963 = vmax.xlane.f32.xlu1 %v1962_v47  ;;  %v6681_v15 = vpop.f32.mrb[92].mxu0  ;;  %4806 = vmatprep.mubr.msk.bf16.mxu1 %vm5453_vm0, %v7564_v22  ;;  %v763_v30 = vld [vmem:[%s6130_s8 + $0x150] sm:$0xff] }
 0x202   : > { %7585 = vst [vmem:[#allocation46_spill] sm:$0xff] %v6681_v15  ;;  %v1826_v60 = vpop.xlane.xlu1 %1825  ;;  %v4708_v48 = vpop.f32.mrb[93].mxu0  ;;  %v1977_v29 = vsel %vm1711_vm1, %v6681_v15, -inf  ;;  %v2537_v57 = vpack.c.bf16 %v6678_v3, %v6673_v63 }
 0x203   : > { %v2145_v43 = vmul.f32 1.442695, %v2019_v32  ;;  %v2020_v42 = vsub.f32 %v6258_v34, %v1826_v60  ;;  %1978 = vmax.xlane.f32.xlu0 %v1977_v29  ;;  %v6690_v21 = vpop.f32.mrb[94].mxu0  ;;  %v6694_v16 = vpop.eup %5088 }
 0x204   : > { %7586 = vst [vmem:[#allocation47_spill] sm:$0xff] %v6690_v21  ;;  %4797 = vmatmul.mubr.msk.bf16.gmra.mrb[116].mxu0 %vm1711_vm1, %v2537_v57  ;;  %v1811_v23 = vpop.xlane.xlu0 %1810  ;;  %v4709_v47 = vpop.f32.mrb[95].mxu0  ;;  %v1980_v48 = vsel %vm1727_vm2, %v6690_v21, -inf  ;;  %v2253_v57 = vsel %vm1711_vm1, %v6359_v1, 0.0  ;;  %v765_v21 = vld [vmem:[%s6130_s8 + $0x160] sm:$0xff] }
 0x205   : > { %v6699_v15 = vpop.eup %5090  ;;  %v2147_v34 = vmul.f32 1.442695, %v2020_v42  ;;  %v2015_v32 = vsub.f32 %v6234_v8, %v1811_v23  ;;  %1981 = vmax.xlane.f32.xlu1 %v1980_v48  ;;  %4824 = vmatprep.mubr.msk.bf16.mxu0 %vm5453_vm0, %v7564_v22  ;;  %5092 = vpow2.f32 %v2145_v43  ;;  %v832_v47 = vpack.c.bf16 %v764_v59, %v763_v30  ;;  %v766_v8 = vld [vmem:[%s6130_s8 + $0x168] sm:$0xff]  ;;  %v767_v23 = vld [vmem:[%s6130_s8 + $0x170] sm:$0xff]  ;;  %v768_v48 = vld [vmem:[%s6130_s8 + $0x178] sm:$0x1f] }
 0x206   : > { %v2538_v60 = vpack.c.bf16 %v6699_v15, %v6694_v16  ;;  %v1814_v29 = vpop.xlane.xlu1 %1813  ;;  %v2256_v43 = vsel %vm1711_vm1, %v6363_v62, 0.0  ;;  %v833_v30 = vpack.c.bf16 %v766_v8, %v765_v21  ;;  %v834_v59 = vpack.c.bf16 %v768_v48, %v767_v23 }
 0x207   : > { %5094 = vpow2.f32 %v2147_v34  ;;  %v2137_v40 = vmul.f32 1.442695, %v2015_v32  ;;  %v2016_v42 = vsub.f32 %v6236_v11, %v1814_v29  ;;  %2254 = vadd.xlane.f32.xlu0 %v2253_v57  ;;  %v2259_v11 = vsel %vm1711_vm1, %v6392_v20, 0.0 }
 0x208   : > { %4807 = vmatmul.mubr.msk.bf16.vlgmr.msra.gmra.mrb[120].mxu1 %vm1711_vm1, %v2538_v60  ;;  %v1829_v53 = vpop.xlane.xlu0 %1828  ;;  %v2262_v62 = vsel %vm1711_vm1, %v6396_v31, 0.0  ;;  %v769_v31 = vld [vmem:[%s6130_s8 + $0x180] sm:$0xff]  ;;  %v2271_v23 = vsel %vm1711_vm1, %v6432_v36, 0.0  ;;  %v2274_v36 = vsel %vm1711_vm1, %v6438_v18, 0.0 }
 0x209   : > { %v2139_v27 = vmul.f32 1.442695, %v2016_v42  ;;  %v2021_v51 = vsub.f32 %v6270_v58, %v1829_v53  ;;  %2257 = vadd.xlane.f32.xlu1 %v2256_v43  ;;  %4810 = vmatprep.mubr.msk.bf16.mxu1 %vm5453_vm0, %v7564_v22  ;;  %5096 = vpow2.f32 %v2137_v40  ;;  %v771_v43 = vld [vmem:[%s6130_s8 + $0x190] sm:$0xff] }
 0x20a   : > { %v1832_v1 = vpop.xlane.xlu1 %1831  ;;  %4837 = vmatpush3.bf16.msra.mxu1 %v832_v47 }
 0x20b   : > { %5098 = vpow2.f32 %v2139_v27  ;;  %v2149_v34 = vmul.f32 1.442695, %v2021_v51  ;;  %v2022_v32 = vsub.f32 %v6274_v5, %v1832_v1  ;;  %2260 = vadd.xlane.f32.xlu0 %v2259_v11  ;;  %4838 = vmatprep.subr.bf16.mxu1 %v7564_v22  ;;  %v2265_v51 = vsel %vm1711_vm1, %v6415_v45, 0.0 }
 0x20c   : > { %v1817_v58 = vpop.xlane.xlu0 %1816  ;;  %v3065_v5 = vand.u32 %v6144_v35, %v834_v59  ;;  %v2268_v45 = vsel %vm1727_vm2, %v6419_v61, 0.0  ;;  %v772_v61 = vld [vmem:[%s6130_s8 + $0x198] sm:$0xff] }
 0x20d   : > { %v2151_v53 = vmul.f32 1.442695, %v2022_v32  ;;  %v2017_v40 = vsub.f32 %v6250_v26, %v1817_v58  ;;  %2263 = vadd.xlane.f32.xlu1 %v2262_v62  ;;  %5100 = vpow2.f32 %v2149_v34  ;;  %v770_v26 = vld [vmem:[%s6130_s8 + $0x188] sm:$0xff]  ;;  %v7587_v62 = vld [vmem:[#allocation5_spill] sm:$0xff] }
 0x20e   : > { %v1820_v20 = vpop.xlane.xlu1 %1819  ;;  %4839 = vmatpush3.bf16.msra.mxu1 %v833_v30  ;;  %v835_v48 = vpack.c.bf16 %v770_v26, %v769_v31  ;;  %v773_v30 = vld [vmem:[%s6130_s8 + $0x1a0] sm:$0xff]  ;;  %v2280_v26 = vsel %vm1711_vm1, %v6496_v0, 0.0 }
 0x20f   : > { %5102 = vpow2.f32 %v2151_v53  ;;  %v2141_v27 = vmul.f32 1.442695, %v2017_v40  ;;  %v2018_v21 = vsub.f32 %v6252_v28, %v1820_v20  ;;  %2266 = vadd.xlane.f32.xlu0 %v2265_v51  ;;  %4840 = vmatprep.subr.bf16.mxu1 %v7564_v22  ;;  %v6733_v60 = vpop.eup %5092  ;;  %v2277_v20 = vsel %vm1711_vm1, %v6488_v7, 0.0 }
 0x210   : > { %v1835_v29 = vpop.xlane.xlu0 %1834 }
 0x211   : > { %v6737_v57 = vpop.eup %5094  ;;  %v2143_v47 = vmul.f32 1.442695, %v2018_v21  ;;  %v2023_v28 = vsub.f32 %v6286_v25, %v1835_v29  ;;  %2269 = vadd.xlane.f32.xlu1 %v2268_v45  ;;  %5104 = vpow2.f32 %v2141_v27  ;;  %v774_v25 = vld [vmem:[%s6130_s8 + $0x1a8] sm:$0x1f]  ;;  %v2283_v45 = vsel %vm1711_vm1, %v6529_v39, 0.0 }
 0x212   : > { %v2541_v42 = vpack.c.bf16 %v6737_v57, %v6733_v60  ;;  %v1838_v8 = vpop.xlane.xlu1 %1837  ;;  %4841 = vmatpush3.bf16.msra.mxu1 %v3065_v5  ;;  %v837_v18 = vpack.c.bf16 %v774_v25, %v773_v30  ;;  %v7588_v27 = vld [vmem:[#allocation6_spill] sm:$0xff]  ;;  %v2289_v39 = vsel %vm1711_vm1, %v6468_v14, 0.0  ;;  %v7589_v14 = vld [vmem:[#allocation11_spill] sm:$0xff]  ;;  %v2295_v30 = vsel %vm1711_vm1, %v6508_v56, 0.0 }
 0x213   : > { %5106 = vpow2.f32 %v2143_v47  ;;  %v2153_v1 = vmul.f32 1.442695, %v2023_v28  ;;  %v2024_v11 = vsub.f32 %v6290_v33, %v1838_v8  ;;  %2272 = vadd.xlane.f32.xlu0 %v2271_v23  ;;  %4872 = vmatprep.subr.bf16.mxu1 %v7564_v22  ;;  %v6750_v59 = vpop.eup %5096  ;;  %v836_v33 = vpack.c.bf16 %v772_v61, %v771_v43 }
 0x214   : > { %4825 = vmatmul.mubr.msk.bf16.vlgmr.msra.gmra.mrb[120].mxu0 %vm1711_vm1, %v2541_v42  ;;  %v1841_v34 = vpop.xlane.xlu0 %1840  ;;  %v3134_v28 = vand.u32 %v6144_v35, %v837_v18  ;;  %v2286_v42 = vsel %vm1727_vm2, %v6536_v54, 0.0  ;;  %v2292_v43 = vsel %vm1711_vm1, %v6471_v17, 0.0  ;;  %v775_v17 = vld [vmem:[%s6130_s8 + $0x1b0] sm:$0xff] }
 0x215   : > { %v6755_v32 = vpop.eup %5098  ;;  %v2155_v58 = vmul.f32 1.442695, %v2024_v11  ;;  %v2025_v53 = vsub.f32 %v7587_v62, %v1841_v34  ;;  %2275 = vadd.xlane.f32.xlu1 %v2274_v36  ;;  %4828 = vmatprep.mubr.msk.bf16.mxu0 %vm5453_vm0, %v7564_v22  ;;  %5108 = vpow2.f32 %v2153_v1  ;;  %v7590_v36 = vld [vmem:[#allocation12_spill] sm:$0xff] }
 0x216   : > { %v1844_v40 = vpop.xlane.xlu1 %1843  ;;  %v2539_v51 = vpack.c.bf16 %v6755_v32, %v6750_v59  ;;  %4855 = vmatpush3.bf16.msra.mxu0 %v835_v48  ;;  %v776_v62 = vld [vmem:[%s6130_s8 + $0x1b8] sm:$0xff] }
 0x217   : > { %5110 = vpow2.f32 %v2155_v58  ;;  %v2157_v5 = vmul.f32 1.442695, %v2025_v53  ;;  %v2026_v21 = vsub.f32 %v7588_v27, %v1844_v40  ;;  %2278 = vadd.xlane.f32.xlu0 %v2277_v20  ;;  %4856 = vmatprep.subr.bf16.mxu0 %v7564_v22  ;;  %v6766_v31 = vpop.eup %5100  ;;  %v2298_v40 = vsel %vm1711_vm1, %v6514_v24, 0.0 }
 0x218   : > { %4811 = vmatmul.mubr.msk.bf16.gmra.mrb[124].mxu1 %vm1711_vm1, %v2539_v51  ;;  %v7591_v51 = vld [vmem:[#allocation7_spill] sm:$0xff]  ;;  %v2301_v24 = vsel %vm1711_vm1, %v6547_v55, 0.0 }
 0x219   : > { %v6771_v7 = vpop.eup %5102  ;;  %v2159_v29 = vmul.f32 1.442695, %v2026_v21  ;;  %2281 = vadd.xlane.f32.xlu1 %v2280_v26  ;;  %4814 = vmatprep.mubr.msk.bf16.mxu1 %vm5453_vm0, %v7564_v22  ;;  %5112 = vpow2.f32 %v2157_v5  ;;  %v838_v21 = vpack.c.bf16 %v776_v62, %v775_v17  ;;  %v777_v26 = vld [vmem:[%s6130_s8 + $0x1c0] sm:$0xff]  ;;  %v2310_v17 = vsel %vm1711_vm1, %v6575_v37, 0.0 }
 0x21a   : > { %v2542_v47 = vpack.c.bf16 %v6771_v7, %v6766_v31  ;;  %4857 = vmatpush3.bf16.msra.mxu0 %v836_v33  ;;  %v781_v37 = vld [vmem:[%s6130_s8 + $0x1e0] sm:$0xff] }
 0x21b   : > { %5114 = vpow2.f32 %v2159_v29  ;;  %2284 = vadd.xlane.f32.xlu0 %v2283_v45  ;;  %4858 = vmatprep.subr.bf16.mxu0 %v7564_v22  ;;  %v6781_v0 = vpop.eup %5104  ;;  %v7592_v45 = vld [vmem:[#allocation8_spill] sm:$0xff] }
 0x21c   : > { %4829 = vmatmul.mubr.msk.bf16.gmra.mrb[124].mxu0 %vm1711_vm1, %v2542_v47 }
 0x21d   : > { %v6786_v8 = vpop.eup %5106  ;;  %2287 = vadd.xlane.f32.xlu1 %v2286_v42  ;;  %4832 = vmatprep.mubr.msk.bf16.mxu0 %vm5453_vm0, %v7564_v22  ;;  %v779_v42 = vld [vmem:[%s6130_s8 + $0x1d0] sm:$0xff] }
 0x21e   : > { %v2540_v23 = vpack.c.bf16 %v6786_v8, %v6781_v0  ;;  %4859 = vmatpush3.bf16.msra.mxu0 %v3134_v28  ;;  %v778_v28 = vld [vmem:[%s6130_s8 + $0x1c8] sm:$0xff] }
 0x21f   : > { %2290 = vadd.xlane.f32.xlu0 %v2289_v39  ;;  %4890 = vmatprep.subr.bf16.mxu0 %v7564_v22  ;;  %v6795_v48 = vpop.eup %5108  ;;  %v780_v39 = vld [vmem:[%s6130_s8 + $0x1d8] sm:$0x1f] }
 0x220   : > { %4815 = vmatmul.mubr.msk.bf16.gmra.mrb[128].mxu1 %vm1711_vm1, %v2540_v23  ;;  %v1859_v54 = vpop.xlane.xlu0 %1858 }
 0x221   : > { %v6800_v61 = vpop.eup %5110  ;;  %v2031_v1 = vsub.f32 %v7589_v14, %v1859_v54  ;;  %2293 = vadd.xlane.f32.xlu1 %v2292_v43  ;;  %4842 = vmatprep.mubr.msk.bf16.mxu1 %vm5453_vm0, %v7564_v22  ;;  %v2304_v54 = vsel %vm1727_vm2, %v6552_v2, 0.0  ;;  %v7593_v14 = vld [vmem:[#allocation15_spill] sm:$0xff] }
 0x222   : > { %v1862_v11 = vpop.xlane.xlu1 %1861  ;;  %v2543_v25 = vpack.c.bf16 %v6800_v61, %v6795_v48 }
 0x223   : > { %v2169_v34 = vmul.f32 1.442695, %v2031_v1  ;;  %v2032_v58 = vsub.f32 %v7590_v36, %v1862_v11  ;;  %2296 = vadd.xlane.f32.xlu0 %v2295_v30  ;;  %v6812_v53 = vpop.eup %5112  ;;  %v2307_v11 = vsel %vm1711_vm1, %v6568_v38, 0.0  ;;  %v839_v30 = vpack.c.bf16 %v778_v28, %v777_v26  ;;  %v7594_v36 = vld [vmem:[#allocation16_spill] sm:$0xff] }
 0x224   : > { %4833 = vmatmul.mubr.msk.bf16.gmra.mrb[128].mxu0 %vm1711_vm1, %v2543_v25  ;;  %v1847_v33 = vpop.xlane.xlu0 %1846  ;;  %v840_v25 = vpack.c.bf16 %v780_v39, %v779_v42 }
 0x225   : > { %v6817_v56 = vpop.eup %5114  ;;  %v2171_v20 = vmul.f32 1.442695, %v2032_v58  ;;  %v2027_v18 = vsub.f32 %v7591_v51, %v1847_v33  ;;  %2299 = vadd.xlane.f32.xlu1 %v2298_v40  ;;  %4860 = vmatprep.mubr.msk.bf16.mxu0 %vm5453_vm0, %v7564_v22  ;;  %5116 = vpow2.f32 %v2169_v34  ;;  %v7595_v33 = vld [vmem:[#allocation9_spill] sm:$0xff] }
 0x226   : > { %v2544_v5 = vpack.c.bf16 %v6817_v56, %v6812_v53  ;;  %v1850_v27 = vpop.xlane.xlu1 %1849  ;;  %v3203_v51 = vand.u32 %v6144_v35, %v840_v25 }
 0x227   : > { %5118 = vpow2.f32 %v2171_v20  ;;  %v2161_v29 = vmul.f32 1.442695, %v2027_v18  ;;  %v2028_v47 = vsub.f32 %v7592_v45, %v1850_v27  ;;  %2302 = vadd.xlane.f32.xlu0 %v2301_v24  ;;  %v2313_v20 = vsel %vm1711_vm1, %v6624_v9, 0.0  ;;  %v782_v24 = vld [vmem:[%s6130_s8 + $0x1e8] sm:$0xff] }
 0x228   : > { %4843 = vmatmul.mubr.msk.bf16.vlgmr.msra.gmra.mrb[132].mxu1 %vm1711_vm1, %v2544_v5  ;;  %v1865_v23 = vpop.xlane.xlu0 %1864  ;;  %v7596_v5 = vld [vmem:[#allocation10_spill] sm:$0xff]  ;;  %v2316_v9 = vsel %vm1711_vm1, %v6631_v19, 0.0  ;;  %v784_v19 = vld [vmem:[%s6130_s8 + $0x1f8] sm:$0xff] }
 0x229   : > { %v2163_v43 = vmul.f32 1.442695, %v2028_v47  ;;  %v2033_v1 = vsub.f32 %v7593_v14, %v1865_v23  ;;  %2305 = vadd.xlane.f32.xlu1 %v2304_v54  ;;  %4846 = vmatprep.mubr.msk.bf16.mxu1 %vm5453_vm0, %v7564_v22  ;;  %5120 = vpow2.f32 %v2161_v29  ;;  %v7597_v47 = vld [vmem:[#allocation19_spill] sm:$0xff]  ;;  %v2319_v23 = vsel %vm1711_vm1, %v6659_v41, 0.0 }
 0x22a   : > { %v1868_v55 = vpop.xlane.xlu1 %1867  ;;  %4873 = vmatpush3.bf16.msra.mxu1 %v838_v21  ;;  %v841_v54 = vpack.c.bf16 %v782_v24, %v781_v37  ;;  %v2322_v41 = vsel %vm1727_vm2, %v6666_v10, 0.0  ;;  %v2331_v24 = vsel %vm1711_vm1, %v6640_v44, 0.0  ;;  %v2337_v44 = vsel %vm1711_vm1, %v6673_v63, 0.0  ;;  %v7601_v63 = vld [vmem:[#allocation23_spill] sm:$0xff] }
 0x22b   : > { %5122 = vpow2.f32 %v2163_v43  ;;  %v2173_v34 = vmul.f32 1.442695, %v2033_v1  ;;  %v2034_v58 = vsub.f32 %v7594_v36, %v1868_v55  ;;  %2308 = vadd.xlane.f32.xlu0 %v2307_v11  ;;  %4874 = vmatprep.subr.bf16.mxu1 %v7564_v22  ;;  %v783_v43 = vld [vmem:[%s6130_s8 + $0x1f0] sm:$0xff]  ;;  %v7598_v1 = vld [vmem:[#allocation20_spill] sm:$0xff]  ;;  %v785_v11 = vld [vmem:[%s6130_s8 + $0x200] sm:$0xff] }
 0x22c   : > { %v1853_v2 = vpop.xlane.xlu0 %1852 }
 0x22d   : > { %v2175_v62 = vmul.f32 1.442695, %v2034_v58  ;;  %v2029_v40 = vsub.f32 %v7595_v33, %v1853_v2  ;;  %2311 = vadd.xlane.f32.xlu1 %v2310_v17  ;;  %5124 = vpow2.f32 %v2173_v34  ;;  %v7599_v2 = vld [vmem:[#allocation13_spill] sm:$0xff] }
 0x22e   : > { %v1856_v38 = vpop.xlane.xlu1 %1855  ;;  %4875 = vmatpush3.bf16.msra.mxu1 %v839_v30  ;;  %v786_v30 = vld [vmem:[%s6130_s8 + $0x208] sm:$0x1f] }
 0x22f   : > { %5126 = vpow2.f32 %v2175_v62  ;;  %v2165_v18 = vmul.f32 1.442695, %v2029_v40  ;;  %v2030_v27 = vsub.f32 %v7596_v5, %v1856_v38  ;;  %2314 = vadd.xlane.f32.xlu0 %v2313_v20  ;;  %4876 = vmatprep.subr.bf16.mxu1 %v7564_v22  ;;  %v6851_v21 = vpop.eup %5116  ;;  %v842_v62 = vpack.c.bf16 %v784_v19, %v783_v43 }
 0x230   : > { %v1871_v26 = vpop.xlane.xlu0 %1870  ;;  %v2325_v40 = vsel %vm1711_vm1, %v6605_v12, 0.0  ;;  %v843_v10 = vpack.c.bf16 %v786_v30, %v785_v11  ;;  %v2343_v19 = vsel %vm1711_vm1, %v6694_v16, 0.0  ;;  %v788_v30 = vld [vmem:[%s6130_s8 + $0x218] sm:$0xff] }
 0x231   : > { %v6855_v29 = vpop.eup %5118  ;;  %v2167_v45 = vmul.f32 1.442695, %v2030_v27  ;;  %v2035_v28 = vsub.f32 %v7597_v47, %v1871_v26  ;;  %2317 = vadd.xlane.f32.xlu1 %v2316_v9  ;;  %5128 = vpow2.f32 %v2165_v18  ;;  %v2328_v27 = vsel %vm1711_vm1, %v6607_v50, 0.0 }
 0x232   : > { %v2547_v42 = vpack.c.bf16 %v6855_v29, %v6851_v21  ;;  %v1874_v39 = vpop.xlane.xlu1 %1873  ;;  %4877 = vmatpush3.bf16.msra.mxu1 %v3203_v51  ;;  %v7600_v51 = vld [vmem:[#allocation14_spill] sm:$0xff]  ;;  %v3272_v9 = vand.u32 %v6144_v35, %v843_v10  ;;  %v789_v10 = vld [vmem:[%s6130_s8 + $0x220] sm:$0xff] }
 0x233   : > { %5130 = vpow2.f32 %v2167_v45  ;;  %v2177_v14 = vmul.f32 1.442695, %v2035_v28  ;;  %v2036_v55 = vsub.f32 %v7598_v1, %v1874_v39  ;;  %2320 = vadd.xlane.f32.xlu0 %v2319_v23  ;;  %4908 = vmatprep.subr.bf16.mxu1 %v7564_v22  ;;  %v6868_v25 = vpop.eup %5120  ;;  %v2334_v45 = vsel %vm1711_vm1, %v6645_v13, 0.0 }
 0x234   : > { %4861 = vmatmul.mubr.msk.bf16.vlgmr.msra.gmra.mrb[132].mxu0 %vm1711_vm1, %v2547_v42  ;;  %v1877_v34 = vpop.xlane.xlu0 %1876  ;;  %v2340_v39 = vsel %vm1727_vm2, %v6678_v3, 0.0  ;;  %v787_v3 = vld [vmem:[%s6130_s8 + $0x210] sm:$0xff] }
 0x235   : > { %v6873_v36 = vpop.eup %5122  ;;  %v2179_v58 = vmul.f32 1.442695, %v2036_v55  ;;  %v2037_v17 = vsub.f32 %v7599_v2, %v1877_v34  ;;  %2323 = vadd.xlane.f32.xlu1 %v2322_v41  ;;  %4864 = vmatprep.mubr.msk.bf16.mxu0 %vm5453_vm0, %v7564_v22  ;;  %5132 = vpow2.f32 %v2177_v14  ;;  %v7602_v55 = vld [vmem:[#allocation24_spill] sm:$0xff] }
 0x236   : > { %v1880_v33 = vpop.xlane.xlu1 %1879  ;;  %v2545_v38 = vpack.c.bf16 %v6873_v36, %v6868_v25  ;;  %4891 = vmatpush3.bf16.msra.mxu0 %v841_v54 }
 0x237   : > { %5134 = vpow2.f32 %v2179_v58  ;;  %v2181_v20 = vmul.f32 1.442695, %v2037_v17  ;;  %v2038_v18 = vsub.f32 %v7600_v51, %v1880_v33  ;;  %2326 = vadd.xlane.f32.xlu0 %v2325_v40  ;;  %4892 = vmatprep.subr.bf16.mxu0 %v7564_v22  ;;  %v6884_v5 = vpop.eup %5124  ;;  %v2346_v58 = vsel %vm1711_vm1, %v6699_v15, 0.0  ;;  %v7603_v17 = vld [vmem:[#allocation17_spill] sm:$0xff]  ;;  %v7604_v51 = vld [vmem:[#allocation18_spill] sm:$0xff] }
 0x238   : > { %4847 = vmatmul.mubr.msk.bf16.gmra.mrb[136].mxu1 %vm1711_vm1, %v2545_v38  ;;  %v2349_v15 = vsel %vm1711_vm1, %v6750_v59, 0.0  ;;  %v844_v38 = vpack.c.bf16 %v788_v30, %v787_v3  ;;  %v2361_v3 = vsel %vm1711_vm1, %v6733_v60, 0.0  ;;  %v2364_v60 = vsel %vm1711_vm1, %v6737_v57, 0.0  ;;  %v796_v57 = vld [vmem:[%s6130_s8 + $0x258] sm:$0xff] }
 0x239   : > { %v6889_v12 = vpop.eup %5126  ;;  %v2183_v37 = vmul.f32 1.442695, %v2038_v18  ;;  %2329 = vadd.xlane.f32.xlu1 %v2328_v27  ;;  %4850 = vmatprep.mubr.msk.bf16.mxu1 %vm5453_vm0, %v7564_v22  ;;  %5136 = vpow2.f32 %v2181_v20  ;;  %v790_v27 = vld [vmem:[%s6130_s8 + $0x228] sm:$0xff] }
 0x23a   : > { %v2548_v26 = vpack.c.bf16 %v6889_v12, %v6884_v5  ;;  %4893 = vmatpush3.bf16.msra.mxu0 %v842_v62 }
 0x23b   : > { %5138 = vpow2.f32 %v2183_v37  ;;  %2332 = vadd.xlane.f32.xlu0 %v2331_v24  ;;  %4894 = vmatprep.subr.bf16.mxu0 %v7564_v22  ;;  %v6899_v50 = vpop.eup %5128  ;;  %v791_v37 = vld [vmem:[%s6130_s8 + $0x230] sm:$0xff]  ;;  %v792_v24 = vld [vmem:[%s6130_s8 + $0x238] sm:$0x1f] }
 0x23c   : > { %4865 = vmatmul.mubr.msk.bf16.gmra.mrb[136].mxu0 %vm1711_vm1, %v2548_v26 }
 0x23d   : > { %v6904_v47 = vpop.eup %5130  ;;  %2335 = vadd.xlane.f32.xlu1 %v2334_v45  ;;  %4868 = vmatprep.mubr.msk.bf16.mxu0 %vm5453_vm0, %v7564_v22 }
 0x23e   : > { %v2546_v28 = vpack.c.bf16 %v6904_v47, %v6899_v50  ;;  %4895 = vmatpush3.bf16.msra.mxu0 %v3272_v9  ;;  %v2352_v9 = vsel %vm1711_vm1, %v6755_v32, 0.0 }
 0x23f   : > { %2338 = vadd.xlane.f32.xlu0 %v2337_v44  ;;  %4926 = vmatprep.subr.bf16.mxu0 %v7564_v22  ;;  %v6913_v42 = vpop.eup %5132  ;;  %v7605_v44 = vld [vmem:[#allocation27_spill] sm:$0xff] }
 0x240   : > { %4851 = vmatmul.mubr.msk.bf16.gmra.mrb[140].mxu1 %vm1711_vm1, %v2546_v28  ;;  %v1895_v13 = vpop.xlane.xlu0 %1894 }
 0x241   : > { %v6918_v23 = vpop.eup %5134  ;;  %v2043_v54 = vsub.f32 %v7601_v63, %v1895_v13  ;;  %2341 = vadd.xlane.f32.xlu1 %v2340_v39  ;;  %4878 = vmatprep.mubr.msk.bf16.mxu1 %vm5453_vm0, %v7564_v22  ;;  %v2355_v13 = vsel %vm1711_vm1, %v6781_v0, 0.0  ;;  %v845_v39 = vpack.c.bf16 %v790_v27, %v789_v10  ;;  %v846_v63 = vpack.c.bf16 %v792_v24, %v791_v37  ;;  %v795_v37 = vld [vmem:[%s6130_s8 + $0x250] sm:$0xff] }
 0x242   : > { %v1898_v43 = vpop.xlane.xlu1 %1897  ;;  %v2549_v14 = vpack.c.bf16 %v6918_v23, %v6913_v42 }
 0x243   : > { %v2193_v1 = vmul.f32 1.442695, %v2043_v54  ;;  %v2044_v11 = vsub.f32 %v7602_v55, %v1898_v43  ;;  %2344 = vadd.xlane.f32.xlu0 %v2343_v19  ;;  %v6930_v34 = vpop.eup %5136  ;;  %v7606_v43 = vld [vmem:[#allocation28_spill] sm:$0xff]  ;;  %v7607_v55 = vld [vmem:[#allocation21_spill] sm:$0xff]  ;;  %v3341_v30 = vand.u32 %v6144_v35, %v846_v63 }
 0x244   : > { %4869 = vmatmul.mubr.msk.bf16.gmra.mrb[140].mxu0 %vm1711_vm1, %v2549_v14  ;;  %v1883_v41 = vpop.xlane.xlu0 %1882  ;;  %v2358_v14 = vsel %vm1727_vm2, %v6786_v8, 0.0  ;;  %v793_v8 = vld [vmem:[%s6130_s8 + $0x240] sm:$0xff] }
 0x245   : > { %v6935_v16 = vpop.eup %5138  ;;  %v2195_v2 = vmul.f32 1.442695, %v2044_v11  ;;  %v2039_v62 = vsub.f32 %v7603_v17, %v1883_v41  ;;  %2347 = vadd.xlane.f32.xlu1 %v2346_v58  ;;  %4896 = vmatprep.mubr.msk.bf16.mxu0 %vm5453_vm0, %v7564_v22  ;;  %5140 = vpow2.f32 %v2193_v1  ;;  %v7608_v58 = vld [vmem:[#allocation22_spill] sm:$0xff]  ;;  %v7611_v63 = vld [vmem:[#allocation25_spill] sm:$0xff] }
 0x246   : > { %v2550_v33 = vpack.c.bf16 %v6935_v16, %v6930_v34  ;;  %v1886_v40 = vpop.xlane.xlu1 %1885  ;;  %v794_v17 = vld [vmem:[%s6130_s8 + $0x248] sm:$0xff] }
 0x247   : > { %5142 = vpow2.f32 %v2195_v2  ;;  %v2185_v20 = vmul.f32 1.442695, %v2039_v62  ;;  %v2040_v18 = vsub.f32 %v7604_v51, %v1886_v40  ;;  %2350 = vadd.xlane.f32.xlu0 %v2349_v15  ;;  %v847_v27 = vpack.c.bf16 %v794_v17, %v793_v8 }
 0x248   : > { %4879 = vmatmul.mubr.msk.bf16.vlgmr.msra.gmra.mrb[144].mxu1 %vm1711_vm1, %v2550_v33  ;;  %v1901_v26 = vpop.xlane.xlu0 %1900  ;;  %v2388_v8 = vsel %vm1711_vm1, %v6873_v36, 0.0 }
 0x249   : > { %v2187_v45 = vmul.f32 1.442695, %v2040_v18  ;;  %v2045_v28 = vsub.f32 %v7605_v44, %v1901_v26  ;;  %2353 = vadd.xlane.f32.xlu1 %v2352_v9  ;;  %4882 = vmatprep.mubr.msk.bf16.mxu1 %vm5453_vm0, %v7564_v22  ;;  %5144 = vpow2.f32 %v2185_v20  ;;  %v2379_v18 = vsel %vm1711_vm1, %v6812_v53, 0.0  ;;  %v7610_v26 = vld [vmem:[#allocation32_spill] sm:$0xff]  ;;  %v798_v44 = vld [vmem:[%s6130_s8 + $0x268] sm:$0x1f] }
 0x24a   : > { %v1904_v59 = vpop.xlane.xlu1 %1903  ;;  %4909 = vmatpush3.bf16.msra.mxu1 %v844_v38  ;;  %v7609_v38 = vld [vmem:[#allocation31_spill] sm:$0xff]  ;;  %v2382_v53 = vsel %vm1711_vm1, %v6817_v56, 0.0 }
 0x24b   : > { %5146 = vpow2.f32 %v2187_v45  ;;  %v2197_v54 = vmul.f32 1.442695, %v2045_v28  ;;  %v2046_v19 = vsub.f32 %v7606_v43, %v1904_v59  ;;  %2356 = vadd.xlane.f32.xlu0 %v2355_v13  ;;  %4910 = vmatprep.subr.bf16.mxu1 %v7564_v22  ;;  %v797_v45 = vld [vmem:[%s6130_s8 + $0x260] sm:$0xff]  ;;  %v848_v43 = vpack.c.bf16 %v796_v57, %v795_v37  ;;  %v7614_v37 = vld [vmem:[#allocation36_spill] sm:$0xff] }
 0x24c   : > { %v1889_v32 = vpop.xlane.xlu0 %1888  ;;  %v849_v56 = vpack.c.bf16 %v798_v44, %v797_v45  ;;  %v2394_v45 = vsel %vm1727_vm2, %v6904_v47, 0.0  ;;  %v2397_v47 = vsel %vm1711_vm1, %v6851_v21, 0.0 }
 0x24d   : > { %v2199_v1 = vmul.f32 1.442695, %v2046_v19  ;;  %v2041_v11 = vsub.f32 %v7607_v55, %v1889_v32  ;;  %2359 = vadd.xlane.f32.xlu1 %v2358_v14  ;;  %5148 = vpow2.f32 %v2197_v54  ;;  %v2367_v32 = vsel %vm1711_vm1, %v6766_v31, 0.0  ;;  %v7612_v55 = vld [vmem:[#allocation26_spill] sm:$0xff] }
 0x24e   : > { %v1892_v0 = vpop.xlane.xlu1 %1891  ;;  %4911 = vmatpush3.bf16.msra.mxu1 %v845_v39 }
 0x24f   : > { %5150 = vpow2.f32 %v2199_v1  ;;  %v2189_v41 = vmul.f32 1.442695, %v2041_v11  ;;  %v2042_v2 = vsub.f32 %v7608_v58, %v1892_v0  ;;  %2362 = vadd.xlane.f32.xlu0 %v2361_v3  ;;  %4912 = vmatprep.subr.bf16.mxu1 %v7564_v22  ;;  %v6969_v62 = vpop.eup %5140  ;;  %v2370_v3 = vsel %vm1711_vm1, %v6771_v7, 0.0 }
 0x250   : > { %v1907_v33 = vpop.xlane.xlu0 %1906 }
 0x251   : > { %v6973_v40 = vpop.eup %5142  ;;  %v2191_v15 = vmul.f32 1.442695, %v2042_v2  ;;  %v2047_v10 = vsub.f32 %v7609_v38, %v1907_v33  ;;  %2365 = vadd.xlane.f32.xlu1 %v2364_v60  ;;  %5152 = vpow2.f32 %v2189_v41  ;;  %v2385_v41 = vsel %vm1711_vm1, %v6868_v25, 0.0 }
 0x252   : > { %v2553_v20 = vpack.c.bf16 %v6973_v40, %v6969_v62  ;;  %v1910_v51 = vpop.xlane.xlu1 %1909  ;;  %4913 = vmatpush3.bf16.msra.mxu1 %v3341_v30  ;;  %v3410_v2 = vand.u32 %v6144_v35, %v849_v56  ;;  %v2373_v25 = vsel %vm1711_vm1, %v6795_v48, 0.0  ;;  %v7613_v48 = vld [vmem:[#allocation35_spill] sm:$0xff]  ;;  %v802_v56 = vld [vmem:[%s6130_s8 + $0x288] sm:$0xff] }
 0x253   : > { %5154 = vpow2.f32 %v2191_v15  ;;  %v2201_v24 = vmul.f32 1.442695, %v2047_v10  ;;  %v2048_v9 = vsub.f32 %v7610_v26, %v1910_v51  ;;  %2380 = vadd.xlane.f32.xlu0 %v2379_v18  ;;  %4944 = vmatprep.subr.bf16.mxu1 %v7564_v22  ;;  %v6986_v28 = vpop.eup %5144  ;;  %v2376_v15 = vsel %vm1727_vm2, %v6800_v61, 0.0  ;;  %v799_v61 = vld [vmem:[%s6130_s8 + $0x270] sm:$0xff] }
 0x254   : > { %4897 = vmatmul.mubr.msk.bf16.vlgmr.msra.gmra.mrb[144].mxu0 %vm1711_vm1, %v2553_v20  ;;  %v1913_v59 = vpop.xlane.xlu0 %1912  ;;  %v2391_v51 = vsel %vm1711_vm1, %v6899_v50, 0.0 }
 0x255   : > { %v6991_v13 = vpop.eup %5146  ;;  %v2203_v39 = vmul.f32 1.442695, %v2048_v9  ;;  %v2049_v54 = vsub.f32 %v7611_v63, %v1913_v59  ;;  %2383 = vadd.xlane.f32.xlu1 %v2382_v53  ;;  %4900 = vmatprep.mubr.msk.bf16.mxu0 %vm5453_vm0, %v7564_v22  ;;  %5156 = vpow2.f32 %v2201_v24  ;;  %v800_v24 = vld [vmem:[%s6130_s8 + $0x278] sm:$0xff]  ;;  %v7615_v59 = vld [vmem:[#allocation29_spill] sm:$0xff] }
 0x256   : > { %v1916_v19 = vpop.xlane.xlu1 %1915  ;;  %v2551_v14 = vpack.c.bf16 %v6991_v13, %v6986_v28  ;;  %4927 = vmatpush3.bf16.msra.mxu0 %v847_v27 }
 0x257   : > { %5158 = vpow2.f32 %v2203_v39  ;;  %v2205_v1 = vmul.f32 1.442695, %v2049_v54  ;;  %v2050_v11 = vsub.f32 %v7612_v55, %v1916_v19  ;;  %2368 = vadd.xlane.f32.xlu0 %v2367_v32  ;;  %4928 = vmatprep.subr.bf16.mxu0 %v7564_v22  ;;  %v7002_v0 = vpop.eup %5148  ;;  %v850_v54 = vpack.c.bf16 %v800_v24, %v799_v61  ;;  %v7616_v32 = vld [vmem:[#allocation30_spill] sm:$0xff]  ;;  %v804_v55 = vld [vmem:[%s6130_s8 + $0x298] sm:$0x1f]  ;;  %v805_v24 = vld [vmem:[%s6130_s8 + $0x2a0] sm:$0xff] }
 0x258   : > { %4883 = vmatmul.mubr.msk.bf16.gmra.mrb[148].mxu1 %vm1711_vm1, %v2551_v14 }
 0x259   : > { %v7007_v31 = vpop.eup %5150  ;;  %v2207_v30 = vmul.f32 1.442695, %v2050_v11  ;;  %2371 = vadd.xlane.f32.xlu1 %v2370_v3  ;;  %4886 = vmatprep.mubr.msk.bf16.mxu1 %vm5453_vm0, %v7564_v22  ;;  %5160 = vpow2.f32 %v2205_v1  ;;  %v803_v1 = vld [vmem:[%s6130_s8 + $0x290] sm:$0xff]  ;;  %v2400_v3 = vsel %vm1711_vm1, %v6855_v29, 0.0 }
 0x25a   : > { %v2554_v58 = vpack.c.bf16 %v7007_v31, %v7002_v0  ;;  %4929 = vmatpush3.bf16.msra.mxu0 %v848_v43  ;;  %v801_v43 = vld [vmem:[%s6130_s8 + $0x280] sm:$0xff] }
 0x25b   : > { %5162 = vpow2.f32 %v2207_v30  ;;  %2386 = vadd.xlane.f32.xlu0 %v2385_v41  ;;  %4930 = vmatprep.subr.bf16.mxu0 %v7564_v22  ;;  %v7017_v7 = vpop.eup %5152  ;;  %v7617_v41 = vld [vmem:[#allocation38_spill] sm:$0xff] }
 0x25c   : > { %4901 = vmatmul.mubr.msk.bf16.gmra.mrb[148].mxu0 %vm1711_vm1, %v2554_v58 }
 0x25d   : > { %v7022_v17 = vpop.eup %5154  ;;  %2389 = vadd.xlane.f32.xlu1 %v2388_v8  ;;  %4904 = vmatprep.mubr.msk.bf16.mxu0 %vm5453_vm0, %v7564_v22  ;;  %v851_v8 = vpack.c.bf16 %v802_v56, %v801_v43 }
 0x25e   : > { %v2552_v33 = vpack.c.bf16 %v7022_v17, %v7017_v7  ;;  %4931 = vmatpush3.bf16.msra.mxu0 %v3410_v2  ;;  %v2415_v2 = vsel %vm1711_vm1, %v6930_v34, 0.0 }
 0x25f   : > { %2374 = vadd.xlane.f32.xlu0 %v2373_v25  ;;  %4962 = vmatprep.subr.bf16.mxu0 %v7564_v22  ;;  %v7031_v60 = vpop.eup %5156  ;;  %v852_v25 = vpack.c.bf16 %v804_v55, %v803_v1  ;;  %v809_v1 = vld [vmem:[%s6130_s8 + $0x2c0] sm:$0xff]  ;;  %v810_v55 = vld [vmem:[%s6130_s8 + $0x2c8] sm:$0x1f] }
 0x260   : > { %4887 = vmatmul.mubr.msk.bf16.gmra.mrb[152].mxu1 %vm1711_vm1, %v2552_v33  ;;  %v1931_v36 = vpop.xlane.xlu0 %1930 }
 0x261   : > { %v7036_v38 = vpop.eup %5158  ;;  %v2055_v10 = vsub.f32 %v7613_v48, %v1931_v36  ;;  %2377 = vadd.xlane.f32.xlu1 %v2376_v15  ;;  %4914 = vmatprep.mubr.msk.bf16.mxu1 %vm5453_vm0, %v7564_v22  ;;  %v7618_v36 = vld [vmem:[#allocation39_spill] sm:$0xff]  ;;  %v2418_v48 = vsel %vm1711_vm1, %v6935_v16, 0.0  ;;  %v806_v16 = vld [vmem:[%s6130_s8 + $0x2a8] sm:$0xff] }
 0x262   : > { %v1934_v20 = vpop.xlane.xlu1 %1933  ;;  %v2555_v18 = vpack.c.bf16 %v7036_v38, %v7031_v60  ;;  %v853_v43 = vpack.c.bf16 %v806_v16, %v805_v24 }
 0x263   : > { %v2217_v27 = vmul.f32 1.442695, %v2055_v10  ;;  %v2056_v57 = vsub.f32 %v7614_v37, %v1934_v20  ;;  %2392 = vadd.xlane.f32.xlu0 %v2391_v51  ;;  %v7048_v26 = vpop.eup %5160  ;;  %v7619_v20 = vld [vmem:[#allocation33_spill] sm:$0xff] }
 0x264   : > { %4905 = vmatmul.mubr.msk.bf16.gmra.mrb[152].mxu0 %vm1711_vm1, %v2555_v18  ;;  %v1919_v9 = vpop.xlane.xlu0 %1918  ;;  %v2403_v18 = vsel %vm1711_vm1, %v6884_v5, 0.0  ;;  %v2406_v5 = vsel %vm1711_vm1, %v6889_v12, 0.0  ;;  %v2451_v24 = vsel %vm1711_vm1, %v7048_v26, 0.0 }
 0x265   : > { %v7053_v50 = vpop.eup %5162  ;;  %v2219_v44 = vmul.f32 1.442695, %v2056_v57  ;;  %v2051_v53 = vsub.f32 %v7615_v59, %v1919_v9  ;;  %2395 = vadd.xlane.f32.xlu1 %v2394_v45  ;;  %4932 = vmatprep.mubr.msk.bf16.mxu0 %vm5453_vm0, %v7564_v22  ;;  %5164 = vpow2.f32 %v2217_v27  ;;  %v3479_v27 = vand.u32 %v6144_v35, %v852_v25  ;;  %v7620_v57 = vld [vmem:[#allocation34_spill] sm:$0xff] }
 0x266   : > { %v2556_v39 = vpack.c.bf16 %v7053_v50, %v7048_v26  ;;  %v1922_v63 = vpop.xlane.xlu1 %1921  ;;  %v2409_v25 = vsel %vm1711_vm1, %v6913_v42, 0.0 }
 0x267   : > { %5166 = vpow2.f32 %v2219_v44  ;;  %v2209_v19 = vmul.f32 1.442695, %v2051_v53  ;;  %v2052_v14 = vsub.f32 %v7616_v32, %v1922_v63  ;;  %2398 = vadd.xlane.f32.xlu0 %v2397_v47  ;;  %v7621_v53 = vld [vmem:[#allocation40_spill] sm:$0xff] }
 0x268   : > { %4915 = vmatmul.mubr.msk.bf16.vlgmr.msra.gmra.mrb[156].mxu1 %vm1711_vm1, %v2556_v39  ;;  %v1937_v11 = vpop.xlane.xlu0 %1936  ;;  %v808_v32 = vld [vmem:[%s6130_s8 + $0x2b8] sm:$0xff] }
 0x269   : > { %v2211_v30 = vmul.f32 1.442695, %v2052_v14  ;;  %v2057_v58 = vsub.f32 %v7617_v41, %v1937_v11  ;;  %2401 = vadd.xlane.f32.xlu1 %v2400_v3  ;;  %4918 = vmatprep.mubr.msk.bf16.mxu1 %vm5453_vm0, %v7564_v22  ;;  %5168 = vpow2.f32 %v2209_v19  ;;  %v807_v19 = vld [vmem:[%s6130_s8 + $0x2b0] sm:$0xff]  ;;  %v7622_v14 = vld [vmem:[#allocation41_spill] sm:$0xff] }
 0x26a   : > { %v1940_v21 = vpop.xlane.xlu1 %1939  ;;  %4945 = vmatpush3.bf16.msra.mxu1 %v850_v54  ;;  %v2421_v54 = vsel %vm1711_vm1, %v6986_v28, 0.0 }
 0x26b   : > { %5170 = vpow2.f32 %v2211_v30  ;;  %v2221_v33 = vmul.f32 1.442695, %v2057_v58  ;;  %v2058_v15 = vsub.f32 %v7618_v36, %v1940_v21  ;;  %2416 = vadd.xlane.f32.xlu0 %v2415_v2  ;;  %4946 = vmatprep.subr.bf16.mxu1 %v7564_v22  ;;  %v2424_v30 = vsel %vm1711_vm1, %v6991_v13, 0.0  ;;  %v7623_v58 = vld [vmem:[#allocation37_spill] sm:$0xff] }
 0x26c   : > { %v1925_v29 = vpop.xlane.xlu0 %1924  ;;  %v854_v2 = vpack.c.bf16 %v808_v32, %v807_v19  ;;  %v855_v13 = vpack.c.bf16 %v810_v55, %v809_v1  ;;  %v7624_v32 = vld [vmem:[#allocation44_spill] sm:$0xff]  ;;  %v7625_v55 = vld [vmem:[#allocation45_spill] sm:$0xff] }
 0x26d   : > { %v2223_v10 = vmul.f32 1.442695, %v2058_v15  ;;  %v2053_v51 = vsub.f32 %v7619_v20, %v1925_v29  ;;  %2419 = vadd.xlane.f32.xlu1 %v2418_v48  ;;  %5172 = vpow2.f32 %v2221_v33  ;;  %v2412_v48 = vsel %vm1727_vm2, %v6918_v23, 0.0 }
 0x26e   : > { %v1928_v34 = vpop.xlane.xlu1 %1927  ;;  %4947 = vmatpush3.bf16.msra.mxu1 %v851_v8 }
 0x26f   : > { %5174 = vpow2.f32 %v2223_v10  ;;  %v2213_v37 = vmul.f32 1.442695, %v2053_v51  ;;  %v2054_v61 = vsub.f32 %v7620_v57, %v1928_v34  ;;  %2404 = vadd.xlane.f32.xlu0 %v2403_v18  ;;  %4948 = vmatprep.subr.bf16.mxu1 %v7564_v22  ;;  %v7087_v9 = vpop.eup %5164  ;;  %v3548_v51 = vand.u32 %v6144_v35, %v855_v13  ;;  %v7627_v13 = vld [vmem:[#allocation43_spill] sm:$0xff] }
 0x270   : > { %v1943_v45 = vpop.xlane.xlu0 %1942  ;;  %v2430_v34 = vsel %vm1727_vm2, %v7022_v17, 0.0  ;;  %v2433_v35 = vsel %vm1711_vm1, %v6969_v62, 0.0  ;;  %v2436_v17 = vsel %vm1711_vm1, %v6973_v40, 0.0 }
 0x271   : > { %v7091_v44 = vpop.eup %5166  ;;  %v2215_v59 = vmul.f32 1.442695, %v2054_v61  ;;  %v2059_v39 = vsub.f32 %v7621_v53, %v1943_v45  ;;  %2407 = vadd.xlane.f32.xlu1 %v2406_v5  ;;  %5176 = vpow2.f32 %v2213_v37 }
 0x272   : > { %v2559_v63 = vpack.c.bf16 %v7091_v44, %v7087_v9  ;;  %v1946_v47 = vpop.xlane.xlu1 %1945  ;;  %4949 = vmatpush3.bf16.msra.mxu1 %v3479_v27 }
 0x273   : > { %5178 = vpow2.f32 %v2215_v59  ;;  %v2225_v12 = vmul.f32 1.442695, %v2059_v39  ;;  %v2060_v56 = vsub.f32 %v7622_v14, %v1946_v47  ;;  %2422 = vadd.xlane.f32.xlu0 %v2421_v54  ;;  %v7103_v11 = vpop.eup %5168  ;;  %v2454_v59 = vsel %vm1711_vm1, %v7053_v50, 0.0 }
 0x274   : > { %4933 = vmatmul.mubr.msk.bf16.vlgmr.msra.gmra.mrb[156].mxu0 %vm1711_vm1, %v2559_v63  ;;  %v1949_v3 = vpop.xlane.xlu0 %1948  ;;  %v2439_v47 = vsel %vm1711_vm1, %v7002_v0, 0.0 }
 0x275   : > { %v7108_v28 = vpop.eup %5170  ;;  %v2227_v41 = vmul.f32 1.442695, %v2060_v56  ;;  %v2061_v21 = vsub.f32 %v7623_v58, %v1949_v3  ;;  %2425 = vadd.xlane.f32.xlu1 %v2424_v30  ;;  %4936 = vmatprep.mubr.msk.bf16.mxu0 %vm5453_vm0, %v7564_v22  ;;  %5180 = vpow2.f32 %v2225_v12 }
 0x276   : > { %v1952_v8 = vpop.xlane.xlu1 %1951  ;;  %v2557_v33 = vpack.c.bf16 %v7108_v28, %v7103_v11  ;;  %4963 = vmatpush3.bf16.msra.mxu0 %v853_v43  ;;  %v2442_v43 = vsel %vm1711_vm1, %v7007_v31, 0.0  ;;  %v2460_v58 = vsel %vm1711_vm1, %v7108_v28, 0.0  ;;  %v2448_v28 = vsel %vm1727_vm2, %v7036_v38, 0.0  ;;  %v7629_v38 = vld [vmem:[#allocation47_spill] sm:$0xff] }
 0x277   : > { %5182 = vpow2.f32 %v2227_v41  ;;  %v2229_v36 = vmul.f32 1.442695, %v2061_v21  ;;  %v2062_v15 = vsub.f32 %v6511_v6, %v1952_v8  ;;  %2410 = vadd.xlane.f32.xlu0 %v2409_v25  ;;  %4964 = vmatprep.subr.bf16.mxu0 %v7564_v22  ;;  %v7119_v29 = vpop.eup %5172  ;;  %v2427_v6 = vsel %vm1711_vm1, %v7017_v7, 0.0 }
 0x278   : > { %4919 = vmatmul.mubr.msk.bf16.gmra.mrb[160].mxu1 %vm1711_vm1, %v2557_v33 }
 0x279   : > { %v7124_v42 = vpop.eup %5174  ;;  %v2231_v10 = vmul.f32 1.442695, %v2062_v15  ;;  %2413 = vadd.xlane.f32.xlu1 %v2412_v48  ;;  %4922 = vmatprep.mubr.msk.bf16.mxu1 %vm5453_vm0, %v7564_v22  ;;  %5184 = vpow2.f32 %v2229_v36 }
 0x27a   : > { %v2560_v20 = vpack.c.bf16 %v7124_v42, %v7119_v29  ;;  %4965 = vmatpush3.bf16.msra.mxu0 %v854_v2  ;;  %v7626_v2 = vld [vmem:[#allocation42_spill] sm:$0xff] }
 0x27b   : > { %5186 = vpow2.f32 %v2231_v10  ;;  %2428 = vadd.xlane.f32.xlu0 %v2427_v6  ;;  %4966 = vmatprep.subr.bf16.mxu0 %v7564_v22  ;;  %v7134_v23 = vpop.eup %5176 }
 0x27c   : > { %4937 = vmatmul.mubr.msk.bf16.gmra.mrb[160].mxu0 %vm1711_vm1, %v2560_v20  ;;  %v7628_v20 = vld [vmem:[#allocation46_spill] sm:$0xff] }
 0x27d   : > { %v7139_v18 = vpop.eup %5178  ;;  %2431 = vadd.xlane.f32.xlu1 %v2430_v34  ;;  %4940 = vmatprep.mubr.msk.bf16.mxu0 %vm5453_vm0, %v7564_v22 }
 0x27e   : > { %v2558_v7 = vpack.c.bf16 %v7139_v18, %v7134_v23  ;;  %4967 = vmatpush3.bf16.msra.mxu0 %v3548_v51 }
 0x27f   : > { %2434 = vadd.xlane.f32.xlu0 %v2433_v35  ;;  %v7147_v27 = vpop.eup %5180 }
 0x280   : > { %4923 = vmatmul.mubr.msk.bf16.gmra.mrb[164].mxu1 %vm1711_vm1, %v2558_v7  ;;  %v1967_v37 = vpop.xlane.xlu0 %1966 }
 0x281   : > { %v7152_v57 = vpop.eup %5182  ;;  %v2067_v61 = vsub.f32 %v6610_v46, %v1967_v37  ;;  %2437 = vadd.xlane.f32.xlu1 %v2436_v17  ;;  %4950 = vmatprep.mubr.msk.bf16.mxu1 %vm5453_vm0, %v7564_v22  ;;  %v2463_v37 = vsel %vm1711_vm1, %v7134_v23, 0.0 }
 0x282   : > { %v1970_v62 = vpop.xlane.xlu1 %1969  ;;  %v2561_v16 = vpack.c.bf16 %v7152_v57, %v7147_v27 }
 0x283   : > { %v2241_v45 = vmul.f32 1.442695, %v2067_v61  ;;  %v2068_v5 = vsub.f32 %v6619_v52, %v1970_v62  ;;  %2452 = vadd.xlane.f32.xlu0 %v2451_v24  ;;  %v7162_v40 = vpop.eup %5184 }
 0x284   : > { %4941 = vmatmul.mubr.msk.bf16.gmra.mrb[164].mxu0 %vm1711_vm1, %v2561_v16  ;;  %v1955_v46 = vpop.xlane.xlu0 %1954 }
 0x285   : > { %v7167_v53 = vpop.eup %5186  ;;  %v2243_v39 = vmul.f32 1.442695, %v2068_v5  ;;  %v2063_v26 = vsub.f32 %v6544_v4, %v1955_v46  ;;  %2455 = vadd.xlane.f32.xlu1 %v2454_v59  ;;  %4968 = vmatprep.mubr.msk.bf16.mxu0 %vm5453_vm0, %v7564_v22  ;;  %5188 = vpow2.f32 %v2241_v45  ;;  %v2466_v5 = vsel %vm1727_vm2, %v7139_v18, 0.0 }
 0x286   : > { %v2562_v52 = vpack.c.bf16 %v7167_v53, %v7162_v40  ;;  %v1958_v63 = vpop.xlane.xlu1 %1957 }
 0x287   : > { %5190 = vpow2.f32 %v2243_v39  ;;  %v2233_v54 = vmul.f32 1.442695, %v2063_v26  ;;  %v2064_v50 = vsub.f32 %v6550_v49, %v1958_v63  ;;  %2440 = vadd.xlane.f32.xlu0 %v2439_v47  ;;  %v2457_v49 = vsel %vm1711_vm1, %v7103_v11, 0.0 }
 0x288   : > { %4951 = vmatmul.mubr.msk.bf16.vlgmr.msra.gmra.mrb[168].mxu1 %vm1711_vm1, %v2562_v52  ;;  %v1973_v4 = vpop.xlane.xlu0 %1972  ;;  %v2445_v11 = vsel %vm1711_vm1, %v7031_v60, 0.0  ;;  %v2469_v39 = vsel %vm1711_vm1, %v7087_v9, 0.0  ;;  %v2472_v63 = vsel %vm1711_vm1, %v7091_v44, 0.0 }
 0x289   : > { %v2235_v19 = vmul.f32 1.442695, %v2064_v50  ;;  %v2069_v12 = vsub.f32 %v7624_v32, %v1973_v4  ;;  %v7181_v14 = vpop.f32.mrb[84].mxu1  ;;  %2443 = vadd.xlane.f32.xlu1 %v2442_v43  ;;  %4954 = vmatprep.mubr.msk.bf16.mxu1 %vm5453_vm0, %v7564_v22  ;;  %5192 = vpow2.f32 %v2233_v54  ;;  %v2487_v4 = vsel %vm1711_vm1, %v7162_v40, 0.0 }
 0x28a   : > { %v4718_v0 = vpop.f32.mrb[85].mxu1  ;;  %v1976_v56 = vpop.xlane.xlu1 %1975 }
 0x28b   : > { %5194 = vpow2.f32 %v2235_v19  ;;  %v2245_v1 = vmul.f32 1.442695, %v2069_v12  ;;  %v2070_v3 = vsub.f32 %v7625_v55, %v1976_v56  ;;  %v7188_v31 = vpop.f32.mrb[86].mxu1  ;;  %2458 = vadd.xlane.f32.xlu0 %v2457_v49  ;;  %v2490_v0 = vsel %vm1711_vm1, %v7167_v53, 0.0 }
 0x28c   : > { %v4719_v30 = vpop.f32.mrb[87].mxu1  ;;  %v1961_v41 = vpop.xlane.xlu0 %1960  ;;  %v2475_v49 = vsel %vm1711_vm1, %v7119_v29, 0.0 }
 0x28d   : > { %v2247_v21 = vmul.f32 1.442695, %v2070_v3  ;;  %v2065_v8 = vsub.f32 %v7626_v2, %v1961_v41  ;;  %2461 = vadd.xlane.f32.xlu1 %v2460_v58  ;;  %5196 = vpow2.f32 %v2245_v1  ;;  %v2478_v30 = vsel %vm1711_vm1, %v7124_v42, 0.0 }
 0x28e   : > { %v1964_v25 = vpop.xlane.xlu1 %1963 }
 0x28f   : > { %5198 = vpow2.f32 %v2247_v21  ;;  %v2237_v33 = vmul.f32 1.442695, %v2065_v8  ;;  %v2066_v36 = vsub.f32 %v7627_v13, %v1964_v25  ;;  %2446 = vadd.xlane.f32.xlu0 %v2445_v11  ;;  %v7196_v15 = vpop.eup %5188 }
 0x290   : > { %v1979_v48 = vpop.xlane.xlu0 %1978 }
 0x291   : > { %v7200_v10 = vpop.eup %5190  ;;  %v2239_v6 = vmul.f32 1.442695, %v2066_v36  ;;  %v2071_v51 = vsub.f32 %v7628_v20, %v1979_v48  ;;  %v7203_v34 = vpop.f32.mrb[88].mxu1  ;;  %2449 = vadd.xlane.f32.xlu1 %v2448_v28  ;;  %5200 = vpow2.f32 %v2237_v33  ;;  %v2481_v20 = vsel %vm1711_vm1, %v7147_v27, 0.0 }
 0x292   : > { %v2565_v60 = vpack.c.bf16 %v7200_v10, %v7196_v15  ;;  %v4722_v35 = vpop.f32.mrb[89].mxu1  ;;  %v1982_v7 = vpop.xlane.xlu1 %1981 }
 0x293   : > { %5202 = vpow2.f32 %v2239_v6  ;;  %v2249_v17 = vmul.f32 1.442695, %v2071_v51  ;;  %v2072_v61 = vsub.f32 %v7629_v38, %v1982_v7  ;;  %v7210_v62 = vpop.f32.mrb[90].mxu1  ;;  %2464 = vadd.xlane.f32.xlu0 %v2463_v37  ;;  %v5193_v24 = vpop.eup %5192  ;;  %v2484_v37 = vsel %vm1727_vm2, %v7152_v57, 0.0 }
 0x294   : > { %v4723_v16 = vpop.f32.mrb[91].mxu1  ;;  %4969 = vmatmul.mubr.msk.bf16.vlgmr.msra.gmra.mrb[168].mxu0 %vm1711_vm1, %v2565_v60  ;;  %v2255_v45 = vpop.xlane.xlu0 %2254  ;;  %v2493_v8 = vsel %vm1711_vm1, %v5193_v24, 0.0 }
 0x295   : > { %v7215_v46 = vpop.eup %5194  ;;  %5204 = vpow2.f32 %v2249_v17  ;;  %v2251_v23 = vmul.f32 1.442695, %v2072_v61  ;;  %2467 = vadd.xlane.f32.xlu1 %v2466_v5  ;;  %4972 = vmatprep.mubr.msk.bf16.mxu0 %vm5453_vm0, %v7564_v22 }
 0x296   : > { %5206 = vrcp.f32 %v2255_v45  ;;  %v2258_v59 = vpop.xlane.xlu1 %2257  ;;  %v2563_v26 = vpack.c.bf16 %v7215_v46, %v5193_v24  ;;  %v2496_v48 = vsel %vm1711_vm1, %v7215_v46, 0.0 }
 0x297   : > { %5208 = vpow2.f32 %v2251_v23  ;;  %2470 = vadd.xlane.f32.xlu0 %v2469_v39  ;;  %v7222_v52 = vpop.eup %5196 }
 0x298   : > { %5210 = vrcp.f32 %v2258_v59  ;;  %4955 = vmatmul.mubr.msk.bf16.gmra.mrb[172].mxu1 %vm1711_vm1, %v2563_v26  ;;  %v2261_v18 = vpop.xlane.xlu0 %2260 }
 0x299   : > { %v7227_v47 = vpop.eup %5198  ;;  %5212 = vrcp.f32 %v2261_v18  ;;  %v7230_v54 = vpop.f32.mrb[92].mxu1  ;;  %2473 = vadd.xlane.f32.xlu1 %v2472_v63  ;;  %4958 = vmatprep.mubr.msk.bf16.mxu1 %vm5453_vm0, %v7564_v22 }
 0x29a   : > { %v4726_v9 = vpop.f32.mrb[93].mxu1  ;;  %v2264_v50 = vpop.xlane.xlu1 %2263  ;;  %v2566_v43 = vpack.c.bf16 %v7227_v47, %v7222_v52 }
 0x29b   : > { %5214 = vrcp.f32 %v2264_v50  ;;  %v7238_v44 = vpop.f32.mrb[94].mxu1  ;;  %2488 = vadd.xlane.f32.xlu0 %v2487_v4  ;;  %v7240_v19 = vpop.eup %5200 }
 0x29c   : > { %v4727_v32 = vpop.f32.mrb[95].mxu1  ;;  %4973 = vmatmul.mubr.msk.bf16.gmra.mrb[172].mxu0 %vm1711_vm1, %v2566_v43  ;;  %v2267_v12 = vpop.xlane.xlu0 %2266  ;;  %v2499_v24 = vsel %vm1711_vm1, %v7240_v19, 0.0 }
 0x29d   : > { %v7247_v56 = vpop.eup %5202  ;;  %5216 = vrcp.f32 %v2267_v12  ;;  %2491 = vadd.xlane.f32.xlu1 %v2490_v0  ;;  %4976 = vmatprep.mubr.msk.bf16.mxu0 %vm5453_vm0, %v7564_v22 }
 0x29e   : > { %v2270_v40 = vpop.xlane.xlu1 %2269  ;;  %v2564_v1 = vpack.c.bf16 %v7247_v56, %v7240_v19  ;;  %v2502_v23 = vsel %vm1727_vm2, %v7247_v56, 0.0  ;;  %v2508_v19 = vsel %vm1711_vm1, %v7200_v10, 0.0 }
 0x29f   : > { %v7255_v55 = vpop.eup %5204  ;;  %5218 = vrcp.f32 %v2270_v40  ;;  %2476 = vadd.xlane.f32.xlu0 %v2475_v49  ;;  %v2511_v40 = vsel %vm1711_vm1, %v7222_v52, 0.0 }
 0x2a0   : > { %v5207_v3 = vpop.eup %5206  ;;  %4959 = vmatmul.mubr.msk.bf16.gmra.mrb[176].mxu1 %vm1711_vm1, %v2564_v1  ;;  %v2273_v53 = vpop.xlane.xlu0 %2272 }
 0x2a1   : > { %v7260_v41 = vpop.eup %5208  ;;  %v3697_v22 = vmul.f32 %v5207_v3, %v7181_v14  ;;  %5220 = vrcp.f32 %v2273_v53  ;;  %v2687_v29 = vpop.f32.mrb[96].mxu1  ;;  %2479 = vadd.xlane.f32.xlu1 %v2478_v30  ;;  %v2514_v30 = vsel %vm1711_vm1, %v7227_v47, 0.0 }
 0x2a2   : > { %v5211_v58 = vpop.eup %5210  ;;  %v4736_v21 = vpop.f32.mrb[97].mxu1  ;;  %v2567_v25 = vpack.c.bf16 %v7260_v41, %v7255_v55 }
 0x2a3   : > { %v2276_v2 = vpop.xlane.xlu1 %2275  ;;  %v5213_v11 = vpop.eup %5212  ;;  %3787 = vst [vmem:[%s7266_s11] sm:$0xff] %v3697_v22  ;;  %v3698_v42 = vmul.f32 %v5211_v58, %v7188_v31  ;;  %2494 = vadd.xlane.f32.xlu0 %v2493_v8 }
 0x2a4   : > { %5222 = vrcp.f32 %v2276_v2  ;;  %v2690_v14 = vpop.f32.mrb[98].mxu1  ;;  %v3699_v33 = vmul.f32 %v5213_v11, %v7203_v34  ;;  %v2279_v36 = vpop.xlane.xlu0 %2278  ;;  %4977 = vmatmul.mubr.msk.bf16.gmra.mrb[176].mxu0 %vm1711_vm1, %v2567_v25  ;;  %v2517_v2 = vsel %vm1711_vm1, %v7255_v55, 0.0 }
 0x2a5   : > { %v4737_v13 = vpop.f32.mrb[99].mxu1  ;;  %v5215_v28 = vpop.eup %5214  ;;  %3788 = vst [vmem:[%s7266_s11 + $0x8] sm:$0xff] %v3698_v42  ;;  %5224 = vrcp.f32 %v2279_v36  ;;  %2497 = vadd.xlane.f32.xlu1 %v2496_v48 }
 0x2a6   : > { %3789 = vst [vmem:[%s7266_s11 + $0x10] sm:$0xff] %v3699_v33  ;;  %v3700_v31 = vmul.f32 %v5215_v28, %v7210_v62 }
 0x2a7   : > { %v2282_v6 = vpop.xlane.xlu1 %2281  ;;  %v5217_v51 = vpop.eup %5216  ;;  %2482 = vadd.xlane.f32.xlu0 %v2481_v20 }
 0x2a8   : > { %5226 = vrcp.f32 %v2282_v6  ;;  %v7279_v34 = vpop.f32.mrb[96].mxu0  ;;  %3790 = vst [vmem:[%s7266_s11 + $0x18] sm:$0xff] %v3700_v31  ;;  %v3701_v60 = vmul.f32 %v5217_v51, %v7230_v54  ;;  %v2285_v35 = vpop.xlane.xlu0 %2284  ;;  %v2505_v54 = vsel %vm1711_vm1, %v7196_v15, 0.0 }
 0x2a9   : > { %v4754_v7 = vpop.f32.mrb[97].mxu0  ;;  %v5219_v17 = vpop.eup %5218  ;;  %5228 = vrcp.f32 %v2285_v35  ;;  %2485 = vadd.xlane.f32.xlu1 %v2484_v37 }
 0x2aa   : > { %v7285_v38 = vpop.f32.mrb[98].mxu0  ;;  %3791 = vst [vmem:[%s7266_s11 + $0x20] sm:$0xff] %v3701_v60  ;;  %v3702_v27 = vmul.f32 %v5219_v17, %v7238_v44 }
 0x2ab   : > { %v2288_v61 = vpop.xlane.xlu1 %2287  ;;  %v4755_v62 = vpop.f32.mrb[99].mxu0  ;;  %2500 = vadd.xlane.f32.xlu0 %v2499_v24 }
 0x2ac   : > { %v5221_v16 = vpop.eup %5220  ;;  %5230 = vrcp.f32 %v2288_v61  ;;  %v2695_v45 = vpop.f32.mrb[100].mxu1  ;;  %3792 = vst [vmem:[%s7266_s11 + $0x28] sm:$0x1f] %v3702_v27 }
 0x2ad   : > { %v3703_v57 = vmul.f32 %v5221_v16, %v2687_v29  ;;  %v4740_v5 = vpop.f32.mrb[101].mxu1  ;;  %v2291_v46 = vpop.xlane.xlu0 %2290  ;;  %2503 = vadd.xlane.f32.xlu1 %v2502_v23 }
 0x2ae   : > { %v5223_v59 = vpop.eup %5222  ;;  %5232 = vrcp.f32 %v2291_v46  ;;  %v2698_v39 = vpop.f32.mrb[102].mxu1 }
 0x2af   : > { %3793 = vst [vmem:[%s7266_s11 + $0x30] sm:$0xff] %v3703_v57  ;;  %v3704_v26 = vmul.f32 %v5223_v59, %v2690_v14  ;;  %v4741_v18 = vpop.f32.mrb[103].mxu1  ;;  %v2294_v63 = vpop.xlane.xlu1 %2293  ;;  %2506 = vadd.xlane.f32.xlu0 %v2505_v54  ;;  %v2520_v14 = vsel %vm1727_vm2, %v7260_v41, 0.0 }
 0x2b0   : > { %v5225_v9 = vpop.eup %5224  ;;  %5234 = vrcp.f32 %v2294_v63  ;;  %v2764_v50 = vpop.f32.mrb[100].mxu0 }
 0x2b1   : > { %3794 = vst [vmem:[%s7266_s11 + $0x38] sm:$0xff] %v3704_v26  ;;  %v3705_v4 = vmul.f32 %v5225_v9, %v2695_v45  ;;  %v2297_v43 = vpop.xlane.xlu0 %2296  ;;  %v4758_v44 = vpop.f32.mrb[101].mxu0  ;;  %2509 = vadd.xlane.f32.xlu1 %v2508_v19 }
 0x2b2   : > { %v5227_v32 = vpop.eup %5226  ;;  %5236 = vrcp.f32 %v2297_v43  ;;  %v2767_v12 = vpop.f32.mrb[102].mxu0 }
 0x2b3   : > { %3795 = vst [vmem:[%s7266_s11 + $0x40] sm:$0xff] %v3705_v4  ;;  %v3706_v0 = vmul.f32 %v5227_v32, %v2698_v39  ;;  %v2300_v56 = vpop.xlane.xlu1 %2299  ;;  %v4759_v15 = vpop.f32.mrb[103].mxu0  ;;  %2512 = vadd.xlane.f32.xlu0 %v2511_v40 }
 0x2b4   : > { %v5229_v49 = vpop.eup %5228  ;;  %5238 = vrcp.f32 %v2300_v56  ;;  %v2703_v1 = vpop.f32.mrb[104].mxu1 }
 0x2b5   : > { %3796 = vst [vmem:[%s7266_s11 + $0x48] sm:$0xff] %v3706_v0  ;;  %v3707_v3 = vmul.f32 %v5229_v49, %v2703_v1  ;;  %v4744_v53 = vpop.f32.mrb[105].mxu1  ;;  %v2303_v10 = vpop.xlane.xlu0 %2302  ;;  %2515 = vadd.xlane.f32.xlu1 %v2514_v30 }
 0x2b6   : > { %v5231_v22 = vpop.eup %5230  ;;  %5240 = vrcp.f32 %v2303_v10  ;;  %v2706_v29 = vpop.f32.mrb[106].mxu1 }
 0x2b7   : > { %3797 = vst [vmem:[%s7266_s11 + $0x50] sm:$0xff] %v3707_v3  ;;  %v3708_v58 = vmul.f32 %v5231_v22, %v2706_v29  ;;  %v4745_v21 = vpop.f32.mrb[107].mxu1  ;;  %v2306_v52 = vpop.xlane.xlu1 %2305  ;;  %2518 = vadd.xlane.f32.xlu0 %v2517_v2 }
 0x2b8   : > { %v5233_v8 = vpop.eup %5232  ;;  %5242 = vrcp.f32 %v2306_v52  ;;  %v2772_v25 = vpop.f32.mrb[104].mxu0 }
 0x2b9   : > { %v3709_v11 = vmul.f32 %v5233_v8, %v7279_v34  ;;  %3798 = vst [vmem:[%s7266_s11 + $0x58] sm:$0x1f] %v3708_v58  ;;  %v2309_v47 = vpop.xlane.xlu0 %2308  ;;  %v4762_v42 = vpop.f32.mrb[105].mxu0  ;;  %2521 = vadd.xlane.f32.xlu1 %v2520_v14 }
 0x2ba   : > { %v5235_v33 = vpop.eup %5234  ;;  %5244 = vrcp.f32 %v2309_v47  ;;  %v2775_v13 = vpop.f32.mrb[106].mxu0 }
 0x2bb   : > { %3799 = vst [vmem:[%s7266_s11 + $0x60] sm:$0xff] %v3709_v11  ;;  %v3710_v55 = vmul.f32 %v5235_v33, %v7285_v38  ;;  %v2312_v36 = vpop.xlane.xlu1 %2311  ;;  %v4763_v48 = vpop.f32.mrb[107].mxu0 }
 0x2bc   : > { %v5237_v28 = vpop.eup %5236  ;;  %5246 = vrcp.f32 %v2312_v36  ;;  %v2825_v31 = vpop.f32.mrb[108].mxu1 }
 0x2bd   : > { %3800 = vst [vmem:[%s7266_s11 + $0x68] sm:$0xff] %v3710_v55  ;;  %v3711_v6 = vmul.f32 %v5237_v28, %v2764_v50  ;;  %v4772_v20 = vpop.f32.mrb[109].mxu1  ;;  %v2315_v51 = vpop.xlane.xlu0 %2314 }
 0x2be   : > { %v5239_v41 = vpop.eup %5238  ;;  %v2828_v34 = vpop.f32.mrb[110].mxu1  ;;  %5248 = vrcp.f32 %v2315_v51 }
 0x2bf   : > { %3801 = vst [vmem:[%s7266_s11 + $0x70] sm:$0xff] %v3711_v6  ;;  %v3712_v60 = vmul.f32 %v5239_v41, %v2767_v12  ;;  %v4773_v35 = vpop.f32.mrb[111].mxu1  ;;  %v2318_v7 = vpop.xlane.xlu1 %2317 }
 0x2c0   : > { %v5241_v37 = vpop.eup %5240  ;;  %5250 = vrcp.f32 %v2318_v7 }
 0x2c1   : > { %3802 = vst [vmem:[%s7266_s11 + $0x78] sm:$0xff] %v3712_v60  ;;  %v3713_v17 = vmul.f32 %v5241_v37, %v2772_v25  ;;  %v2321_v38 = vpop.xlane.xlu0 %2320 }
 0x2c2   : > { %v5243_v27 = vpop.eup %5242 }
 0x2c3   : > { %3803 = vst [vmem:[%s7266_s11 + $0x80] sm:$0xff] %v3713_v17  ;;  %v3714_v61 = vmul.f32 %v5243_v27, %v2775_v13  ;;  %v2324_v62 = vpop.xlane.xlu1 %2323 }
 0x2c4   : > { %v5245_v24 = vpop.eup %5244 }
 0x2c5   : > { %3804 = vst [vmem:[%s7266_s11 + $0x88] sm:$0x1f] %v3714_v61  ;;  %v3715_v16 = vmul.f32 %v5245_v24, %v2825_v31  ;;  %v2327_v45 = vpop.xlane.xlu0 %2326 }
 0x2c6   : > { %v5247_v57 = vpop.eup %5246  ;;  %5252 = vrcp.f32 %v2327_v45 }
 0x2c7   : > { %3805 = vst [vmem:[%s7266_s11 + $0x90] sm:$0xff] %v3715_v16  ;;  %v3716_v5 = vmul.f32 %v5247_v57, %v2828_v34  ;;  %v2330_v46 = vpop.xlane.xlu1 %2329  ;;  %v2894_v23 = vpop.f32.mrb[108].mxu0 }
 0x2c8   : > { %5254 = vrcp.f32 %v2330_v46  ;;  %v4790_v39 = vpop.f32.mrb[109].mxu0  ;;  %v5249_v54 = vpop.eup %5248 }
 0x2c9   : > { %3806 = vst [vmem:[%s7266_s11 + $0x98] sm:$0xff] %v3716_v5  ;;  %5256 = vrcp.f32 %v2321_v38  ;;  %v2333_v59 = vpop.xlane.xlu0 %2332  ;;  %v2897_v26 = vpop.f32.mrb[110].mxu0 }
 0x2ca   : > { %5258 = vrcp.f32 %v2333_v59  ;;  %v4791_v63 = vpop.f32.mrb[111].mxu0  ;;  %v5251_v44 = vpop.eup %5250 }
 0x2cb   : > { %5260 = vrcp.f32 %v2324_v62  ;;  %v2336_v18 = vpop.xlane.xlu1 %2335  ;;  %v2833_v9 = vpop.f32.mrb[112].mxu1 }
 0x2cc   : > { %5262 = vrcp.f32 %v2336_v18  ;;  %v3717_v50 = vmul.f32 %v5249_v54, %v2833_v9  ;;  %v4776_v4 = vpop.f32.mrb[113].mxu1 }
 0x2cd   : > { %v2339_v43 = vpop.xlane.xlu0 %2338  ;;  %v2836_v19 = vpop.f32.mrb[114].mxu1 }
 0x2ce   : > { %5264 = vrcp.f32 %v2339_v43  ;;  %3807 = vst [vmem:[%s7266_s11 + $0xa0] sm:$0xff] %v3717_v50  ;;  %v3718_v32 = vmul.f32 %v5251_v44, %v2836_v19  ;;  %v4777_v12 = vpop.f32.mrb[115].mxu1 }
 0x2cf   : > { %v2342_v0 = vpop.xlane.xlu1 %2341  ;;  %v2902_v15 = vpop.f32.mrb[112].mxu0 }
 0x2d0   : > { %v5253_v56 = vpop.eup %5252  ;;  %5266 = vrcp.f32 %v2342_v0  ;;  %3808 = vst [vmem:[%s7266_s11 + $0xa8] sm:$0xff] %v3718_v32  ;;  %v4794_v1 = vpop.f32.mrb[113].mxu0 }
 0x2d1   : > { %v3721_v40 = vmul.f32 %v5253_v56, %v2894_v23  ;;  %v2345_v49 = vpop.xlane.xlu0 %2344  ;;  %v2905_v53 = vpop.f32.mrb[114].mxu0 }
 0x2d2   : > { %v5255_v3 = vpop.eup %5254  ;;  %5268 = vrcp.f32 %v2345_v49  ;;  %v4795_v29 = vpop.f32.mrb[115].mxu0 }
 0x2d3   : > { %v5257_v10 = vpop.eup %5256  ;;  %3811 = vst [vmem:[%s7266_s11 + $0xc0] sm:$0xff] %v3721_v40  ;;  %v3722_v30 = vmul.f32 %v5255_v3, %v2897_v26  ;;  %v2348_v22 = vpop.xlane.xlu1 %2347 }
 0x2d4   : > { %v5259_v58 = vpop.eup %5258  ;;  %5270 = vrcp.f32 %v2348_v22  ;;  %v2841_v21 = vpop.f32.mrb[116].mxu1 }
 0x2d5   : > { %v5261_v52 = vpop.eup %5260  ;;  %3812 = vst [vmem:[%s7266_s11 + $0xc8] sm:$0xff] %v3722_v30  ;;  %v3723_v2 = vmul.f32 %v5259_v58, %v2902_v15  ;;  %v3719_v8 = vmul.f32 %v5257_v10, %v2841_v21  ;;  %v4780_v25 = vpop.f32.mrb[117].mxu1 }
 0x2d6   : > { %v2351_v11 = vpop.xlane.xlu0 %2350  ;;  %v5263_v47 = vpop.eup %5262 }
 0x2d7   : > { %v2844_v42 = vpop.f32.mrb[118].mxu1  ;;  %3813 = vst [vmem:[%s7266_s11 + $0xd0] sm:$0xff] %v3723_v2  ;;  %v3724_v14 = vmul.f32 %v5263_v47, %v2905_v53  ;;  %3809 = vst [vmem:[%s7266_s11 + $0xb0] sm:$0xff] %v3719_v8  ;;  %v2354_v55 = vpop.xlane.xlu1 %2353 }
 0x2d8   : > { %v3720_v33 = vmul.f32 %v5261_v52, %v2844_v42  ;;  %v4781_v13 = vpop.f32.mrb[119].mxu1  ;;  %v5265_v36 = vpop.eup %5264 }
 0x2d9   : > { %v2910_v48 = vpop.f32.mrb[116].mxu0  ;;  %3814 = vst [vmem:[%s7266_s11 + $0xd8] sm:$0xff] %v3724_v14 }
 0x2da   : > { %3810 = vst [vmem:[%s7266_s11 + $0xb8] sm:$0x1f] %v3720_v33  ;;  %v3725_v28 = vmul.f32 %v5265_v36, %v2910_v48  ;;  %v2357_v31 = vpop.xlane.xlu0 %2356  ;;  %v4798_v6 = vpop.f32.mrb[117].mxu0 }
 0x2db   : > { %v5267_v20 = vpop.eup %5266  ;;  %v2913_v51 = vpop.f32.mrb[118].mxu0 }
 0x2dc   : > { %3815 = vst [vmem:[%s7266_s11 + $0xe0] sm:$0xff] %v3725_v28  ;;  %v3726_v41 = vmul.f32 %v5267_v20, %v2913_v51  ;;  %v2360_v34 = vpop.xlane.xlu1 %2359  ;;  %v4799_v60 = vpop.f32.mrb[119].mxu0 }
 0x2dd   : > { %v5269_v35 = vpop.eup %5268  ;;  %v2963_v7 = vpop.f32.mrb[120].mxu1 }
 0x2de   : > { %3816 = vst [vmem:[%s7266_s11 + $0xe8] sm:$0x1f] %v3726_v41  ;;  %v3727_v37 = vmul.f32 %v5269_v35, %v2963_v7  ;;  %v4808_v17 = vpop.f32.mrb[121].mxu1  ;;  %v2363_v38 = vpop.xlane.xlu0 %2362 }
 0x2df   : > { %v5271_v27 = vpop.eup %5270  ;;  %5272 = vrcp.f32 %v2363_v38  ;;  %v2966_v61 = vpop.f32.mrb[122].mxu1 }
 0x2e0   : > { %3817 = vst [vmem:[%s7266_s11 + $0xf0] sm:$0xff] %v3727_v37  ;;  %v3728_v62 = vmul.f32 %v5271_v27, %v2966_v61  ;;  %v4809_v24 = vpop.f32.mrb[123].mxu1  ;;  %v2366_v16 = vpop.xlane.xlu1 %2365 }
 0x2e1   : > { %5274 = vrcp.f32 %v2366_v16 }
 0x2e2   : > { %3818 = vst [vmem:[%s7266_s11 + $0xf8] sm:$0xff] %v3728_v62  ;;  %v2381_v45 = vpop.xlane.xlu0 %2380  ;;  %5276 = vrcp.f32 %v2351_v11 }
 0x2e3   : > { %5278 = vrcp.f32 %v2354_v55 }
 0x2e4   : > { %v2384_v57 = vpop.xlane.xlu1 %2383 }
 0x2e6   : > { %v2369_v5 = vpop.xlane.xlu0 %2368 }
 0x2e7   : > { %5280 = vrcp.f32 %v2369_v5  ;;  %v3032_v59 = vpop.f32.mrb[120].mxu0 }
 0x2e8   : > { %v2372_v46 = vpop.xlane.xlu1 %2371  ;;  %v4826_v18 = vpop.f32.mrb[121].mxu0 }
 0x2e9   : > { %v5273_v23 = vpop.eup %5272  ;;  %5282 = vrcp.f32 %v2372_v46  ;;  %v3035_v54 = vpop.f32.mrb[122].mxu0 }
 0x2ea   : > { %v3733_v39 = vmul.f32 %v5273_v23, %v3032_v59  ;;  %v7334_v26 = vpop.xlane.xlu0 %2386  ;;  %5284 = vrcp.f32 %v2357_v31  ;;  %v4827_v4 = vpop.f32.mrb[123].mxu0 }
 0x2eb   : > { %v5275_v63 = vpop.eup %5274  ;;  %5286 = vrcp.f32 %v2360_v34  ;;  %v2971_v44 = vpop.f32.mrb[124].mxu1 }
 0x2ec   : > { %3823 = vst [vmem:[%s7266_s11 + $0x120] sm:$0xff] %v3733_v39  ;;  %v3734_v9 = vmul.f32 %v5275_v63, %v3035_v54  ;;  %v7337_v50 = vpop.xlane.xlu1 %2389  ;;  %v5277_v43 = vpop.eup %5276 }
 0x2ed   : > { %v3729_v19 = vmul.f32 %v5277_v43, %v2971_v44  ;;  %v4812_v32 = vpop.f32.mrb[125].mxu1  ;;  %v5279_v0 = vpop.eup %5278 }
 0x2ee   : > { %3824 = vst [vmem:[%s7266_s11 + $0x128] sm:$0xff] %v3734_v9  ;;  %v2375_v12 = vpop.xlane.xlu0 %2374  ;;  %v2974_v56 = vpop.f32.mrb[126].mxu1 }
 0x2ef   : > { %5288 = vrcp.f32 %v2375_v12  ;;  %3819 = vst [vmem:[%s7266_s11 + $0x100] sm:$0xff] %v3729_v19  ;;  %v3730_v15 = vmul.f32 %v5279_v0, %v2974_v56  ;;  %v4813_v40 = vpop.f32.mrb[127].mxu1  ;;  %v3040_v3 = vpop.f32.mrb[124].mxu0 }
 0x2f0   : > { %v2378_v49 = vpop.xlane.xlu1 %2377  ;;  %v4830_v30 = vpop.f32.mrb[125].mxu0 }
 0x2f1   : > { %v5281_v1 = vpop.eup %5280  ;;  %5290 = vrcp.f32 %v2378_v49  ;;  %3820 = vst [vmem:[%s7266_s11 + $0x108] sm:$0xff] %v3730_v15  ;;  %v3043_v29 = vpop.f32.mrb[126].mxu0 }
 0x2f2   : > { %v3735_v53 = vmul.f32 %v5281_v1, %v3040_v3  ;;  %v2393_v10 = vpop.xlane.xlu0 %2392  ;;  %5292 = vrcp.f32 %v2381_v45  ;;  %v4831_v52 = vpop.f32.mrb[127].mxu0 }
 0x2f3   : > { %v5283_v22 = vpop.eup %5282  ;;  %5294 = vrcp.f32 %v2384_v57  ;;  %v2979_v8 = vpop.f32.mrb[128].mxu1 }
 0x2f4   : > { %3825 = vst [vmem:[%s7266_s11 + $0x130] sm:$0xff] %v3735_v53  ;;  %v3736_v58 = vmul.f32 %v5283_v22, %v3043_v29  ;;  %v2396_v21 = vpop.xlane.xlu1 %2395  ;;  %v5285_v2 = vpop.eup %5284 }
 0x2f5   : > { %v3731_v25 = vmul.f32 %v5285_v2, %v2979_v8  ;;  %v4816_v11 = vpop.f32.mrb[129].mxu1  ;;  %v5287_v42 = vpop.eup %5286 }
 0x2f6   : > { %3826 = vst [vmem:[%s7266_s11 + $0x138] sm:$0xff] %v3736_v58  ;;  %v2399_v47 = vpop.xlane.xlu0 %2398  ;;  %v2982_v14 = vpop.f32.mrb[130].mxu1 }
 0x2f7   : > { %3821 = vst [vmem:[%s7266_s11 + $0x110] sm:$0xff] %v3731_v25  ;;  %v3732_v33 = vmul.f32 %v5287_v42, %v2982_v14  ;;  %v4817_v13 = vpop.f32.mrb[131].mxu1  ;;  %v3048_v48 = vpop.f32.mrb[128].mxu0  ;;  %5296 = vrcp.f32 %v2399_v47 }
 0x2f8   : > { %v2402_v55 = vpop.xlane.xlu1 %2401  ;;  %v4834_v6 = vpop.f32.mrb[129].mxu0 }
 0x2f9   : > { %v5289_v36 = vpop.eup %5288  ;;  %3822 = vst [vmem:[%s7266_s11 + $0x118] sm:$0x1f] %v3732_v33  ;;  %v3051_v51 = vpop.f32.mrb[130].mxu0  ;;  %5298 = vrcp.f32 %v2402_v55 }
 0x2fa   : > { %v3737_v28 = vmul.f32 %v5289_v36, %v3048_v48  ;;  %v7346_v31 = vpop.xlane.xlu0 %2416  ;;  %v4835_v60 = vpop.f32.mrb[131].mxu0  ;;  %5300 = vrcp.f32 %v7334_v26 }
 0x2fb   : > { %v5291_v20 = vpop.eup %5290  ;;  %v3101_v7 = vpop.f32.mrb[132].mxu1  ;;  %5302 = vrcp.f32 %v7337_v50 }
 0x2fc   : > { %3827 = vst [vmem:[%s7266_s11 + $0x140] sm:$0xff] %v3737_v28  ;;  %v3738_v41 = vmul.f32 %v5291_v20, %v3051_v51  ;;  %v7349_v34 = vpop.xlane.xlu1 %2419  ;;  %v5293_v35 = vpop.eup %5292 }
 0x2fd   : > { %v3739_v37 = vmul.f32 %v5293_v35, %v3101_v7  ;;  %v4844_v17 = vpop.f32.mrb[133].mxu1  ;;  %v5295_v27 = vpop.eup %5294 }
 0x2fe   : > { %3828 = vst [vmem:[%s7266_s11 + $0x148] sm:$0x1f] %v3738_v41  ;;  %v2405_v38 = vpop.xlane.xlu0 %2404  ;;  %v3104_v61 = vpop.f32.mrb[134].mxu1 }
 0x2ff   : > { %3829 = vst [vmem:[%s7266_s11 + $0x150] sm:$0xff] %v3739_v37  ;;  %v3740_v62 = vmul.f32 %v5295_v27, %v3104_v61  ;;  %v4845_v24 = vpop.f32.mrb[135].mxu1  ;;  %5304 = vrcp.f32 %v2405_v38 }
 0x300   : > { %v2408_v16 = vpop.xlane.xlu1 %2407 }
 0x301   : > { %3830 = vst [vmem:[%s7266_s11 + $0x158] sm:$0xff] %v3740_v62  ;;  %v5297_v23 = vpop.eup %5296  ;;  %5306 = vrcp.f32 %v2408_v16 }
 0x302   : > { %v7354_v45 = vpop.xlane.xlu0 %2422  ;;  %5308 = vrcp.f32 %v2393_v10 }
 0x303   : > { %v5299_v54 = vpop.eup %5298  ;;  %5310 = vrcp.f32 %v2396_v21 }
 0x304   : > { %v7357_v57 = vpop.xlane.xlu1 %2425  ;;  %v5301_v43 = vpop.eup %5300 }
 0x305   : > { %v5303_v12 = vpop.eup %5302 }
 0x306   : > { %v2411_v5 = vpop.xlane.xlu0 %2410 }
 0x307   : > { %v3170_v59 = vpop.f32.mrb[132].mxu0  ;;  %5312 = vrcp.f32 %v2411_v5 }
 0x308   : > { %v2414_v46 = vpop.xlane.xlu1 %2413  ;;  %v3745_v39 = vmul.f32 %v5297_v23, %v3170_v59  ;;  %v4862_v63 = vpop.f32.mrb[133].mxu0 }
 0x309   : > { %v3173_v9 = vpop.f32.mrb[134].mxu0  ;;  %v5305_v49 = vpop.eup %5304  ;;  %5314 = vrcp.f32 %v2414_v46 }
 0x30a   : > { %v7360_v18 = vpop.xlane.xlu0 %2428  ;;  %3835 = vst [vmem:[%s7266_s11 + $0x180] sm:$0xff] %v3745_v39  ;;  %v3746_v26 = vmul.f32 %v5299_v54, %v3173_v9  ;;  %v4863_v50 = vpop.f32.mrb[135].mxu0  ;;  %5316 = vrcp.f32 %v7346_v31 }
 0x30b   : > { %v3109_v44 = vpop.f32.mrb[136].mxu1  ;;  %v5307_v30 = vpop.eup %5306  ;;  %5318 = vrcp.f32 %v7349_v34 }
 0x30c   : > { %v7363_v4 = vpop.xlane.xlu1 %2431  ;;  %3836 = vst [vmem:[%s7266_s11 + $0x188] sm:$0xff] %v3746_v26  ;;  %v3741_v19 = vmul.f32 %v5301_v43, %v3109_v44  ;;  %v4848_v32 = vpop.f32.mrb[137].mxu1 }
 0x30d   : > { %v3112_v0 = vpop.f32.mrb[138].mxu1  ;;  %v5309_v21 = vpop.eup %5308 }
 0x30e   : > { %3831 = vst [vmem:[%s7266_s11 + $0x160] sm:$0xff] %v3741_v19  ;;  %v2435_v56 = vpop.xlane.xlu0 %2434  ;;  %v3742_v15 = vmul.f32 %v5303_v12, %v3112_v0  ;;  %v4849_v40 = vpop.f32.mrb[139].mxu1 }
 0x30f   : > { %v3178_v1 = vpop.f32.mrb[136].mxu0  ;;  %v5311_v11 = vpop.eup %5310  ;;  %5320 = vrcp.f32 %v2435_v56 }
 0x310   : > { %3832 = vst [vmem:[%s7266_s11 + $0x168] sm:$0xff] %v3742_v15  ;;  %v2438_v3 = vpop.xlane.xlu1 %2437  ;;  %v3747_v53 = vmul.f32 %v5305_v49, %v3178_v1  ;;  %v4866_v10 = vpop.f32.mrb[137].mxu0 }
 0x311   : > { %v3181_v22 = vpop.f32.mrb[138].mxu0  ;;  %v5313_v13 = vpop.eup %5312  ;;  %5322 = vrcp.f32 %v2438_v3 }
 0x312   : > { %3837 = vst [vmem:[%s7266_s11 + $0x190] sm:$0xff] %v3747_v53  ;;  %v3748_v29 = vmul.f32 %v5307_v30, %v3181_v22  ;;  %v4867_v58 = vpop.f32.mrb[139].mxu0  ;;  %v7371_v2 = vpop.xlane.xlu0 %2452  ;;  %5324 = vrcp.f32 %v7354_v45 }
 0x313   : > { %v3117_v52 = vpop.f32.mrb[140].mxu1  ;;  %v5315_v28 = vpop.eup %5314  ;;  %5326 = vrcp.f32 %v7357_v57 }
 0x314   : > { %3838 = vst [vmem:[%s7266_s11 + $0x198] sm:$0xff] %v3748_v29  ;;  %v3743_v8 = vmul.f32 %v5309_v21, %v3117_v52  ;;  %v4852_v25 = vpop.f32.mrb[141].mxu1  ;;  %v7374_v42 = vpop.xlane.xlu1 %2455 }
 0x315   : > { %v3120_v47 = vpop.f32.mrb[142].mxu1  ;;  %v5317_v41 = vpop.eup %5316 }
 0x316   : > { %3833 = vst [vmem:[%s7266_s11 + $0x170] sm:$0xff] %v3743_v8  ;;  %v3744_v14 = vmul.f32 %v5311_v11, %v3120_v47  ;;  %v4853_v33 = vpop.f32.mrb[143].mxu1  ;;  %v2441_v6 = vpop.xlane.xlu0 %2440 }
 0x317   : > { %v3186_v55 = vpop.f32.mrb[140].mxu0  ;;  %v5319_v37 = vpop.eup %5318  ;;  %5328 = vrcp.f32 %v2441_v6 }
 0x318   : > { %3834 = vst [vmem:[%s7266_s11 + $0x178] sm:$0x1f] %v3744_v14  ;;  %v3749_v36 = vmul.f32 %v5313_v13, %v3186_v55  ;;  %v4870_v48 = vpop.f32.mrb[141].mxu0  ;;  %v2444_v60 = vpop.xlane.xlu1 %2443 }
 0x319   : > { %v3189_v31 = vpop.f32.mrb[142].mxu0  ;;  %v5321_v16 = vpop.eup %5320  ;;  %5330 = vrcp.f32 %v2444_v60 }
 0x31a   : > { %3839 = vst [vmem:[%s7266_s11 + $0x1a0] sm:$0xff] %v3749_v36  ;;  %v3750_v20 = vmul.f32 %v5315_v28, %v3189_v31  ;;  %v4871_v51 = vpop.f32.mrb[143].mxu0  ;;  %v7381_v61 = vpop.xlane.xlu0 %2458  ;;  %5332 = vrcp.f32 %v7360_v18 }
 0x31b   : > { %v3239_v34 = vpop.f32.mrb[144].mxu1  ;;  %v5323_v39 = vpop.eup %5322  ;;  %5334 = vrcp.f32 %v7363_v4 }
 0x31c   : > { %3840 = vst [vmem:[%s7266_s11 + $0x1a8] sm:$0x1f] %v3750_v20  ;;  %v3751_v35 = vmul.f32 %v5317_v41, %v3239_v34  ;;  %v4880_v7 = vpop.f32.mrb[145].mxu1  ;;  %v7385_v62 = vpop.xlane.xlu1 %2461 }
 0x31d   : > { %v3242_v17 = vpop.f32.mrb[146].mxu1  ;;  %v5325_v9 = vpop.eup %5324 }
 0x31e   : > { %3841 = vst [vmem:[%s7266_s11 + $0x1b0] sm:$0xff] %v3751_v35  ;;  %v3752_v38 = vmul.f32 %v5319_v37, %v3242_v17  ;;  %v4881_v27 = vpop.f32.mrb[147].mxu1  ;;  %v2447_v24 = vpop.xlane.xlu0 %2446 }
 0x31f   : > { %v5327_v44 = vpop.eup %5326  ;;  %5336 = vrcp.f32 %v2447_v24 }
 0x320   : > { %3842 = vst [vmem:[%s7266_s11 + $0x1b8] sm:$0xff] %v3752_v38  ;;  %v2450_v46 = vpop.xlane.xlu1 %2449 }
 0x321   : > { %v5329_v0 = vpop.eup %5328  ;;  %5338 = vrcp.f32 %v2450_v46 }
 0x322   : > { %v7391_v26 = vpop.xlane.xlu0 %2464  ;;  %5340 = vrcp.f32 %v7371_v2 }
 0x323   : > { %v5331_v40 = vpop.eup %5330  ;;  %5342 = vrcp.f32 %v7374_v42 }
 0x324   : > { %v7394_v18 = vpop.xlane.xlu1 %2467  ;;  %v5333_v10 = vpop.eup %5332 }
 0x325   : > { %v5335_v21 = vpop.eup %5334 }
 0x326   : > { %v2471_v1 = vpop.xlane.xlu0 %2470 }
 0x327   : > { %v3308_v5 = vpop.f32.mrb[144].mxu0  ;;  %5344 = vrcp.f32 %v2471_v1 }
 0x328   : > { %v3757_v23 = vmul.f32 %v5321_v16, %v3308_v5  ;;  %v4898_v59 = vpop.f32.mrb[145].mxu0  ;;  %v2474_v22 = vpop.xlane.xlu1 %2473 }
 0x329   : > { %v3311_v63 = vpop.f32.mrb[146].mxu0  ;;  %v5337_v25 = vpop.eup %5336  ;;  %5346 = vrcp.f32 %v2474_v22 }
 0x32a   : > { %3847 = vst [vmem:[%s7266_s11 + $0x1e0] sm:$0xff] %v3757_v23  ;;  %v3758_v45 = vmul.f32 %v5323_v39, %v3311_v63  ;;  %v4899_v54 = vpop.f32.mrb[147].mxu0  ;;  %v2489_v47 = vpop.xlane.xlu0 %2488  ;;  %5348 = vrcp.f32 %v7381_v61 }
 0x32b   : > { %v3247_v57 = vpop.f32.mrb[148].mxu1  ;;  %v5339_v42 = vpop.eup %5338  ;;  %5350 = vrcp.f32 %v7385_v62 }
 0x32c   : > { %3848 = vst [vmem:[%s7266_s11 + $0x1e8] sm:$0xff] %v3758_v45  ;;  %v3753_v50 = vmul.f32 %v5325_v9, %v3247_v57  ;;  %v4884_v43 = vpop.f32.mrb[149].mxu1  ;;  %v2492_v55 = vpop.xlane.xlu1 %2491 }
 0x32d   : > { %v3250_v19 = vpop.f32.mrb[150].mxu1  ;;  %v5341_v28 = vpop.eup %5340 }
 0x32e   : > { %3843 = vst [vmem:[%s7266_s11 + $0x1c0] sm:$0xff] %v3753_v50  ;;  %v3754_v32 = vmul.f32 %v5327_v44, %v3250_v19  ;;  %v4885_v12 = vpop.f32.mrb[151].mxu1  ;;  %v5343_v51 = vpop.eup %5342 }
 0x32f   : > { %v3316_v4 = vpop.f32.mrb[148].mxu0  ;;  %v2477_v34 = vpop.xlane.xlu0 %2476 }
 0x330   : > { %3844 = vst [vmem:[%s7266_s11 + $0x1c8] sm:$0xff] %v3754_v32  ;;  %v3759_v56 = vmul.f32 %v5329_v0, %v3316_v4  ;;  %v4902_v15 = vpop.f32.mrb[149].mxu0  ;;  %v2480_v7 = vpop.xlane.xlu1 %2479  ;;  %5352 = vrcp.f32 %v2477_v34 }
 0x331   : > { %v3319_v49 = vpop.f32.mrb[150].mxu0  ;;  %v5345_v38 = vpop.eup %5344  ;;  %5354 = vrcp.f32 %v2480_v7 }
 0x332   : > { %3849 = vst [vmem:[%s7266_s11 + $0x1f0] sm:$0xff] %v3759_v56  ;;  %v3760_v3 = vmul.f32 %v5331_v40, %v3319_v49  ;;  %v4903_v53 = vpop.f32.mrb[151].mxu0  ;;  %5356 = vrcp.f32 %v7391_v26 }
 0x333   : > { %v3255_v30 = vpop.f32.mrb[152].mxu1  ;;  %v7410_v37 = vpop.xlane.xlu0 %2494  ;;  %5358 = vrcp.f32 %v7394_v18 }
 0x334   : > { %3850 = vst [vmem:[%s7266_s11 + $0x1f8] sm:$0xff] %v3760_v3  ;;  %v3755_v29 = vmul.f32 %v5333_v10, %v3255_v30  ;;  %v4888_v58 = vpop.f32.mrb[153].mxu1  ;;  %v7412_v17 = vpop.xlane.xlu1 %2497 }
 0x335   : > { %v3258_v52 = vpop.f32.mrb[154].mxu1  ;;  %v5347_v5 = vpop.eup %5346 }
 0x336   : > { %3845 = vst [vmem:[%s7266_s11 + $0x1d0] sm:$0xff] %v3755_v29  ;;  %v3756_v8 = vmul.f32 %v5335_v21, %v3258_v52  ;;  %v4889_v2 = vpop.f32.mrb[155].mxu1  ;;  %v5349_v59 = vpop.eup %5348 }
 0x337   : > { %v3324_v11 = vpop.f32.mrb[152].mxu0  ;;  %v2483_v23 = vpop.xlane.xlu0 %2482 }
 0x338   : > { %3846 = vst [vmem:[%s7266_s11 + $0x1d8] sm:$0x1f] %v3756_v8  ;;  %v3761_v14 = vmul.f32 %v5337_v25, %v3324_v11  ;;  %v4906_v33 = vpop.f32.mrb[153].mxu0  ;;  %v2486_v63 = vpop.xlane.xlu1 %2485  ;;  %5360 = vrcp.f32 %v2483_v23 }
 0x339   : > { %v3327_v13 = vpop.f32.mrb[154].mxu0  ;;  %v5351_v9 = vpop.eup %5350  ;;  %5362 = vrcp.f32 %v2486_v63 }
 0x33a   : > { %3851 = vst [vmem:[%s7266_s11 + $0x200] sm:$0xff] %v3761_v14  ;;  %v3762_v36 = vmul.f32 %v5339_v42, %v3327_v13  ;;  %v4907_v48 = vpop.f32.mrb[155].mxu0  ;;  %v5353_v43 = vpop.eup %5352  ;;  %5364 = vrcp.f32 %v2489_v47 }
 0x33b   : > { %v3377_v31 = vpop.f32.mrb[156].mxu1  ;;  %v5355_v18 = vpop.eup %5354  ;;  %5366 = vrcp.f32 %v2492_v55 }
 0x33c   : > { %3852 = vst [vmem:[%s7266_s11 + $0x208] sm:$0x1f] %v3762_v36  ;;  %v3763_v6 = vmul.f32 %v5341_v28, %v3377_v31  ;;  %v4916_v20 = vpop.f32.mrb[157].mxu1  ;;  %v5357_v56 = vpop.eup %5356 }
 0x33d   : > { %v3380_v41 = vpop.f32.mrb[158].mxu1  ;;  %v2501_v40 = vpop.xlane.xlu0 %2500 }
 0x33e   : > { %3853 = vst [vmem:[%s7266_s11 + $0x210] sm:$0xff] %v3763_v6  ;;  %v3764_v60 = vmul.f32 %v5343_v51, %v3380_v41  ;;  %v4917_v35 = vpop.f32.mrb[159].mxu1  ;;  %v5359_v3 = vpop.eup %5358 }
 0x33f   : > { %v2504_v10 = vpop.xlane.xlu1 %2503 }
 0x340   : > { %3854 = vst [vmem:[%s7266_s11 + $0x218] sm:$0xff] %v3764_v60 }
 0x341   : > { %v2507_v25 = vpop.xlane.xlu0 %2506 }
 0x342   : > { %v5361_v29 = vpop.eup %5360  ;;  %5368 = vrcp.f32 %v2507_v25 }
 0x343   : > { %v5363_v8 = vpop.eup %5362  ;;  %v2510_v42 = vpop.xlane.xlu1 %2509 }
 0x344   : > { %v5365_v14 = vpop.eup %5364  ;;  %5370 = vrcp.f32 %v2510_v42 }
 0x345   : > { %v5367_v36 = vpop.eup %5366  ;;  %5372 = vrcp.f32 %v7410_v37  ;;  %v2513_v6 = vpop.xlane.xlu0 %2512 }
 0x346   : > { %5374 = vrcp.f32 %v7412_v17 }
 0x347   : > { %v3446_v27 = vpop.f32.mrb[156].mxu0  ;;  %v2516_v20 = vpop.xlane.xlu1 %2515  ;;  %5376 = vrcp.f32 %v2513_v6 }
 0x348   : > { %v3769_v24 = vmul.f32 %v5345_v38, %v3446_v27  ;;  %v4934_v16 = vpop.f32.mrb[157].mxu0  ;;  %5378 = vrcp.f32 %v2516_v20 }
 0x349   : > { %v3449_v46 = vpop.f32.mrb[158].mxu0  ;;  %5380 = vrcp.f32 %v2501_v40  ;;  %v2519_v38 = vpop.xlane.xlu0 %2518 }
 0x34a   : > { %3859 = vst [vmem:[%s7266_s11 + $0x240] sm:$0xff] %v3769_v24  ;;  %v3770_v61 = vmul.f32 %v5347_v5, %v3449_v46  ;;  %v4935_v62 = vpop.f32.mrb[159].mxu0  ;;  %5382 = vrcp.f32 %v2504_v10 }
 0x34b   : > { %v3385_v39 = vpop.f32.mrb[160].mxu1  ;;  %v2522_v16 = vpop.xlane.xlu1 %2521  ;;  %5384 = vrcp.f32 %v2519_v38 }
 0x34c   : > { %3860 = vst [vmem:[%s7266_s11 + $0x248] sm:$0xff] %v3770_v61  ;;  %v3765_v45 = vmul.f32 %v5349_v59, %v3385_v39  ;;  %v4920_v54 = vpop.f32.mrb[161].mxu1  ;;  %v5369_v51 = vpop.eup %5368  ;;  %5386 = vrcp.f32 %v2522_v16 }
 0x34d   : > { %v3388_v57 = vpop.f32.mrb[162].mxu1 }
 0x34e   : > { %3855 = vst [vmem:[%s7266_s11 + $0x220] sm:$0xff] %v3765_v45  ;;  %v3766_v26 = vmul.f32 %v5351_v9, %v3388_v57  ;;  %v4921_v50 = vpop.f32.mrb[163].mxu1  ;;  %v5371_v35 = vpop.eup %5370 }
 0x34f   : > { %v3454_v44 = vpop.f32.mrb[160].mxu0  ;;  %v5373_v37 = vpop.eup %5372 }
 0x350   : > { %3856 = vst [vmem:[%s7266_s11 + $0x228] sm:$0xff] %v3766_v26  ;;  %v3771_v19 = vmul.f32 %v5353_v43, %v3454_v44  ;;  %v4938_v32 = vpop.f32.mrb[161].mxu0  ;;  %v5375_v23 = vpop.eup %5374 }
 0x351   : > { %v3457_v12 = vpop.f32.mrb[162].mxu0  ;;  %v5377_v39 = vpop.eup %5376 }
 0x352   : > { %3861 = vst [vmem:[%s7266_s11 + $0x250] sm:$0xff] %v3771_v19  ;;  %v3772_v0 = vmul.f32 %v5355_v18, %v3457_v12  ;;  %v4939_v4 = vpop.f32.mrb[163].mxu0  ;;  %v5379_v9 = vpop.eup %5378 }
 0x353   : > { %v3393_v15 = vpop.f32.mrb[164].mxu1  ;;  %v5381_v43 = vpop.eup %5380 }
 0x354   : > { %3862 = vst [vmem:[%s7266_s11 + $0x258] sm:$0xff] %v3772_v0  ;;  %v3767_v49 = vmul.f32 %v5357_v56, %v3393_v15  ;;  %v4924_v1 = vpop.f32.mrb[165].mxu1  ;;  %v5383_v18 = vpop.eup %5382 }
 0x355   : > { %v3396_v53 = vpop.f32.mrb[166].mxu1  ;;  %v5385_v56 = vpop.eup %5384 }
 0x356   : > { %3857 = vst [vmem:[%s7266_s11 + $0x230] sm:$0xff] %v3767_v49  ;;  %v3768_v30 = vmul.f32 %v5359_v3, %v3396_v53  ;;  %v4925_v22 = vpop.f32.mrb[167].mxu1  ;;  %v5387_v1 = vpop.eup %5386 }
 0x357   : > { %v3462_v58 = vpop.f32.mrb[164].mxu0 }
 0x358   : > { %3858 = vst [vmem:[%s7266_s11 + $0x238] sm:$0x1f] %v3768_v30  ;;  %v3773_v21 = vmul.f32 %v5361_v29, %v3462_v58  ;;  %v4942_v52 = vpop.f32.mrb[165].mxu0 }
 0x359   : > { %v3465_v2 = vpop.f32.mrb[166].mxu0 }
 0x35a   : > { %3863 = vst [vmem:[%s7266_s11 + $0x260] sm:$0xff] %v3773_v21  ;;  %v3774_v11 = vmul.f32 %v5363_v8, %v3465_v2  ;;  %v4943_v47 = vpop.f32.mrb[167].mxu0 }
 0x35b   : > { %v3515_v33 = vpop.f32.mrb[168].mxu1 }
 0x35c   : > { %3864 = vst [vmem:[%s7266_s11 + $0x268] sm:$0x1f] %v3774_v11  ;;  %v3775_v13 = vmul.f32 %v5365_v14, %v3515_v33  ;;  %v4952_v55 = vpop.f32.mrb[169].mxu1 }
 0x35d   : > { %v3518_v48 = vpop.f32.mrb[170].mxu1 }
 0x35e   : > { %3865 = vst [vmem:[%s7266_s11 + $0x270] sm:$0xff] %v3775_v13  ;;  %v3776_v28 = vmul.f32 %v5367_v36, %v3518_v48  ;;  %v4953_v31 = vpop.f32.mrb[171].mxu1 }
 0x360   : > { %3866 = vst [vmem:[%s7266_s11 + $0x278] sm:$0xff] %v3776_v28 }
 0x367   : > { %v3584_v41 = vpop.f32.mrb[168].mxu0 }
 0x368   : > { %v3781_v34 = vmul.f32 %v5369_v51, %v3584_v41  ;;  %v4970_v60 = vpop.f32.mrb[169].mxu0 }
 0x369   : > { %v3587_v7 = vpop.f32.mrb[170].mxu0 }
 0x36a   : > { %3871 = vst [vmem:[%s7266_s11 + $0x2a0] sm:$0xff] %v3781_v34  ;;  %v3782_v27 = vmul.f32 %v5371_v35, %v3587_v7  ;;  %v4971_v24 = vpop.f32.mrb[171].mxu0 }
 0x36b   : > { %v3523_v17 = vpop.f32.mrb[172].mxu1 }
 0x36c   : > { %3872 = vst [vmem:[%s7266_s11 + $0x2a8] sm:$0xff] %v3782_v27  ;;  %v3777_v5 = vmul.f32 %v5373_v37, %v3523_v17  ;;  %v4956_v46 = vpop.f32.mrb[173].mxu1 }
 0x36d   : > { %v3526_v61 = vpop.f32.mrb[174].mxu1 }
 0x36e   : > { %3867 = vst [vmem:[%s7266_s11 + $0x280] sm:$0xff] %v3777_v5  ;;  %v3778_v62 = vmul.f32 %v5375_v23, %v3526_v61  ;;  %v4957_v59 = vpop.f32.mrb[175].mxu1 }
 0x36f   : > { %v3592_v63 = vpop.f32.mrb[172].mxu0 }
 0x370   : > { %3868 = vst [vmem:[%s7266_s11 + $0x288] sm:$0xff] %v3778_v62  ;;  %v3783_v45 = vmul.f32 %v5377_v39, %v3592_v63  ;;  %v4974_v54 = vpop.f32.mrb[173].mxu0 }
 0x371   : > { %v3595_v57 = vpop.f32.mrb[174].mxu0 }
 0x372   : > { %3873 = vst [vmem:[%s7266_s11 + $0x2b0] sm:$0xff] %v3783_v45  ;;  %v3784_v26 = vmul.f32 %v5379_v9, %v3595_v57  ;;  %v4975_v50 = vpop.f32.mrb[175].mxu0 }
 0x373   : > { %v3531_v44 = vpop.f32.mrb[176].mxu1 }
 0x374   : > { %3874 = vst [vmem:[%s7266_s11 + $0x2b8] sm:$0xff] %v3784_v26  ;;  %v3779_v19 = vmul.f32 %v5381_v43, %v3531_v44  ;;  %v4960_v32 = vpop.f32.mrb[177].mxu1 }
 0x375   : > { %v3534_v12 = vpop.f32.mrb[178].mxu1 }
 0x376   : > { %3869 = vst [vmem:[%s7266_s11 + $0x290] sm:$0xff] %v3779_v19  ;;  %v3780_v0 = vmul.f32 %v5383_v18, %v3534_v12  ;;  %v4961_v4 = vpop.f32.mrb[179].mxu1 }
 0x377   : > { %v3600_v15 = vpop.f32.mrb[176].mxu0 }
 0x378   : > { %3870 = vst [vmem:[%s7266_s11 + $0x298] sm:$0x1f] %v3780_v0  ;;  %v3785_v40 = vmul.f32 %v5385_v56, %v3600_v15  ;;  %v4978_v49 = vpop.f32.mrb[177].mxu0 }
 0x379   : > { %v3603_v3 = vpop.f32.mrb[178].mxu0 }
 0x37a   : > { %3875 = vst [vmem:[%s7266_s11 + $0x2c0] sm:$0xff] %v3785_v40  ;;  %v3786_v53 = vmul.f32 %v5387_v1, %v3603_v3  ;;  %v4979_v10 = vpop.f32.mrb[179].mxu0 }
 0x37c   : > { %3876 = vst [vmem:[%s7266_s11 + $0x2c8] sm:$0x1f] %v3786_v53 }
 0x37d   : > { %5401 = shalt.err (!%p5398_p3)
}
 0x37e   : > { %s5402_s30 = scalar_lea.hbm %s7443_s25, 11520  ;;  %s5406_s6 = scalar_lea.hbm %s7495_s3, 23040 }
 0x37f   : > { %p5403_p4 = scmp.ne.s32.totalorder %s7443_s25, %s5402_s30  ;;  %p5407_p9 = scmp.lt.u32.totalorder %s7443_s25, %s7495_s3 }
 0x380   : > { %p5408_p10 = scmp.lt.u32.totalorder %s5406_s6, %s5402_s30  ;;  %p5410_p12 = scmp.lt.u32.totalorder %s5402_s30, %s7443_s25 }
 0x381   : > { %p5404_p7 = pnand %p5403_p4, %p5516_p5 }
 0x382   : > { %p5409_p11 = por %p5408_p10, %p5407_p9 }
 0x383   : > { %p5405_p8 = pneg %p5404_p7 }
 0x384   : > { %p5411_p13 = por %p5410_p12, %p5409_p11 }
 0x386   : > { %p5412_p0 = pnand %p5411_p13, %p5405_p8 }
 0x388   : > { %5415 = shalt.err (!%p5412_p0)
}
 0x389   : > { %s5456_s9 = smov 128   ;;  %s5457_s10 = smov 8  }
 0x38a   : > { %4983 = dma.vmem_to_hbm [thread:$0]  (%p5516_p5), %s7445_s19, 11520, %s7443_s25, %s7451_s16, %s5456_s9, %s5456_s9, %s5457_s10  }
 0x38b PF: > { %p4990_p1 = scmp.ge.s32.totalorder %s5450_s15, 2  ;;  %s3907_s11 = sand.u32 1, %s5438_s12  }
 0x38c   : > { %s3908_s17 = scalar_lea.sflag [#allocation3], %s3907_s11 }
 0x38d   : > { %p4986_p2 = pnand %p4990_p1, %p5520_p6 }
 0x38f   : > { %5433 = dma.done.wait (!%p4986_p2), %s3908_s17, 11520  }
 0x390   : > { %5435 = vsyncadd (!%p4986_p2), %s3908_s17, 4294955776  ;;  %p13_p3 = scmp.ge.s32.totalorder %s5503_s18, 4   ;;  %s7630_s12 = smov %s5442_s13 }
 0x391   : > { %s7631_s13 = smov %s5446_s14  ;;  %s7632_s14 = smov %s5514_s21 }
 0x392   : > { %s7633_s15 = smov %s5503_s18  ;;  %15 = sbr.rel (!%p13_p3) target bundleno = 3 (0x3), region = 73 }
 0x399   :  { %3913 = vsyncpa [#allocation3], 1 }
 0x39a   :  { %3915 = vsyncpa [#allocation3 + $0x1], 1 }

</bundles_post_ra>
